<compile_context>
chip_gen: v5e
topology: v5e:2x2
jax: 0.10.0
libtpu: 0.0.40
codegen_flags: <defaults>
</compile_context>

<pallas_src>
import math
from functools import partial

import jax
import jax.numpy as jnp
from jax.experimental import pallas as pl
from jax.experimental.pallas import tpu as pltpu

GEN_EPS = 1e-7    # GENConv message eps
BN_EPS = 1e-5     # torch BatchNorm1d default eps
OUT_PAD = 128     # lane-dense output slab width: [mu | logstd | zero pad]


def _gen_conv(h, gsrc, tgt, ea, w_a, bn_g, bn_b, w_b, b_b):
    """One GENConv layer over TB independent events.

    h: [TB,N,C]  gsrc: [TB,E,N]  tgt: [TB,N,E]  ea: [TB,E,C]
    softmax aggregation (t=1); MLP = Linear -> BatchNorm1d(batch stats) -> ReLU -> Linear.
    """
    tb, n, _ = h.shape

    # message: relu(x_j + edge_attr) + eps ; x_j gathered via one-hot matmul (MXU)
    x_j = jnp.einsum('ben,bnc->bec', gsrc, h, preferred_element_type=jnp.float32)
    msg = jnp.maximum(x_j + ea, 0.0) + GEN_EPS                        # [TB,E,C] > 0

    # Softmax aggregation, stabilized with a per-event per-channel max.  The
    # same constant is subtracted from every edge of a target group, so the
    # group softmax is mathematically unchanged; the 1e-12 clamp guards
    # isolated targets (numer == 0 there -> agg == 0, PyG-like).
    m = jnp.max(msg, axis=1, keepdims=True)                           # [TB,1,C]
    w = jnp.exp(msg - m)                                              # (0, 1]
    denom = jnp.einsum('bne,bec->bnc', tgt, w,
                       preferred_element_type=jnp.float32)            # [TB,N,C]
    numer = jnp.einsum('bne,bec->bnc', tgt, w * msg,
                       preferred_element_type=jnp.float32)            # [TB,N,C]
    agg = numer * pl.reciprocal(jnp.maximum(denom, 1e-12), approx=True)

    out = agg + h                                                     # residual x_r

    # MLP: shared-weight matmuls on the flattened [TB*N, C] slab (bigger MXU
    # LHS); BatchNorm statistics stay per event (axis=1) to match the original
    # per-graph forward.  Pre-BN Linear bias dropped: cancels under batch-stat BN.
    hid = jnp.dot(out.reshape(tb * n, -1), w_a,
                  preferred_element_type=jnp.float32)                 # [TB*N, 2C]
    hid3 = hid.reshape(tb, n, -1)
    mean = jnp.mean(hid3, axis=1, keepdims=True)
    var = jnp.mean((hid3 - mean) ** 2, axis=1, keepdims=True)
    hid3 = (hid3 - mean) * jax.lax.rsqrt(var + BN_EPS) * bn_g + bn_b
    hid3 = jnp.maximum(hid3, 0.0)
    out2 = jnp.dot(hid3.reshape(tb * n, -1), w_b,
                   preferred_element_type=jnp.float32) + b_b          # [TB*N, C_out]
    return out2.reshape(tb, n, -1)


def vpfae_gen_kernel(node_ref, edge_ref, w1a_ref, w1b_ref, w2a_ref, w2b_ref,
                     wh_ref, vp_ref, out_ref):
    c_in = w1a_ref.shape[0]
    tb, n = node_ref.shape[0], node_ref.shape[1]
    e = edge_ref.shape[1]
    hid1, c1 = w1a_ref.shape[1], w1b_ref.shape[1]
    hid2, c2 = w2a_ref.shape[1], w2b_ref.shape[1]
    d_out = wh_ref.shape[1]

    node = node_ref[...]                 # [TB, N, c_in | N | E] = x | A_hat | tgt
    edge = edge_ref[...]                 # [TB, E, c_in | N]     = edge_attr | one_hot(src)
    x = node[:, :, :c_in]
    anorm = node[:, :, c_in:c_in + n]
    tgt = node[:, :, c_in + n:c_in + n + e]
    ea = edge[:, :, :c_in]
    gsrc = edge[:, :, c_in:c_in + n]

    # packed per-channel vectors: one [8, 128] slab, sliced statically
    vp = vp_ref[...]
    g1, be1, b1b = vp[0:1, :hid1], vp[1:2, :hid1], vp[2:3, :c1]
    g2, be2, b2b = vp[3:4, :hid2], vp[4:5, :hid2], vp[5:6, :c2]
    bh = vp[6:7, :d_out]

    h1 = jnp.maximum(_gen_conv(x, gsrc, tgt, ea, w1a_ref[...], g1, be1,
                               w1b_ref[...], b1b), 0.0)   # .relu() after conv1
    h2 = jnp.maximum(_gen_conv(h1, gsrc, tgt, ea, w2a_ref[...], g2, be2,
                               w2b_ref[...], b2b), 0.0)   # .relu() after conv2

    # packed GCN heads: [mu | logstd | 0] = A_hat @ (h2 @ [Wmu | Wls | 0]) + [bmu | bls | 0]
    xw = jnp.dot(h2.reshape(tb * n, c2), wh_ref[...],
                 preferred_element_type=jnp.float32)                  # [TB*N, 128]
    out_ref[...] = jnp.einsum('bnm,bmd->bnd', anorm, xw.reshape(tb, n, d_out),
                              preferred_element_type=jnp.float32) + bh


# ----------------------------------------------------------------------------
# plain-JAX glue: parameters, graph preprocessing, batched pallas_call wrapper
# ----------------------------------------------------------------------------
def init_params(key, in_channels, out_channels):
    layer1_out = in_channels - math.floor((in_channels - out_channels) / 3)
    layer2_out = in_channels - math.floor(2 * (in_channels - out_channels) / 3)
    # edge_attr (dim = in_channels) is added to node messages in BOTH GENConv
    # layers, so conv2's input dim must equal in_channels as well.
    assert layer1_out == in_channels, "need in_channels - out_channels <= 2"

    keys = jax.random.split(key, 6)

    def lin(k, fan_in, fan_out):
        return (jax.random.normal(k, (fan_in, fan_out), jnp.float32)
                / jnp.sqrt(jnp.float32(fan_in)))

    c_in, c1, c2, c_out = in_channels, layer1_out, layer2_out, out_channels
    return dict(
        # GENConv1 MLP: [c_in, 2*c_in, c1] (first Linear bias omitted: cancels in BN)
        w1a=lin(keys[0], c_in, 2 * c_in),
        g1=jnp.ones((1, 2 * c_in), jnp.float32),
        be1=jnp.zeros((1, 2 * c_in), jnp.float32),
        w1b=lin(keys[1], 2 * c_in, c1), b1b=jnp.zeros((1, c1), jnp.float32),
        # GENConv2 MLP: [c1, 2*c1, c2]
        w2a=lin(keys[2], c1, 2 * c1),
        g2=jnp.ones((1, 2 * c1), jnp.float32),
        be2=jnp.zeros((1, 2 * c1), jnp.float32),
        w2b=lin(keys[3], 2 * c1, c2), b2b=jnp.zeros((1, c2), jnp.float32),
        # GCNConv heads packed: W = [Wmu | Wls], b = [bmu | bls]
        wh=jnp.concatenate([lin(keys[4], c2, c_out), lin(keys[5], c2, c_out)], axis=1),
        bh=jnp.zeros((1, 2 * c_out), jnp.float32),
    )


def _pack_vectors(params):
    bh = jnp.zeros((1, OUT_PAD), jnp.float32).at[:, :params["bh"].shape[1]].set(params["bh"])
    rows = [params["g1"], params["be1"], params["b1b"],
            params["g2"], params["be2"], params["b2b"], bh]
    width = max(int(r.shape[1]) for r in rows)
    packed = jnp.zeros((8, width), jnp.float32)        # pad to 8 sublanes
    for i, r in enumerate(rows):
        packed = packed.at[i, : r.shape[1]].set(r[0])
    return packed


def build_graph_mats(edge_index, num_nodes):
    src, dst = edge_index[0], edge_index[1]
    gsrc = jax.nn.one_hot(src, num_nodes, dtype=jnp.float32)          # [E, N]
    tgt = jax.nn.one_hot(dst, num_nodes, dtype=jnp.float32).T         # [N, E] scatter-to-target
    # dense adjacency with multiplicity, A[target, source]
    a = jnp.zeros((num_nodes, num_nodes), jnp.float32).at[dst, src].add(1.0)
    eye = jnp.eye(num_nodes, dtype=jnp.float32)
    has_self = jnp.sum(a * eye, axis=1, keepdims=True)
    a = a + eye * jnp.where(has_self == 0.0, 1.0, 0.0)                # add_remaining_self_loops
    deg = jnp.sum(a, axis=1)                                          # in-degree
    dinv = jnp.where(deg > 0, jax.lax.rsqrt(deg), 0.0)
    a_norm = dinv[:, None] * a * dinv[None, :]
    return gsrc, tgt, a_norm


@partial(jax.jit, static_argnames=("tb",))
def vpfae_gen_forward(params, x, edge_index, edge_attr, tb=16):
    """x: [B,N,C_in], edge_index: [B,2,E] int32, edge_attr: [B,E,C_in]."""
    B, N, c_in = x.shape
    E = edge_attr.shape[1]
    c2 = params["w2b"].shape[1]
    c_out2 = params["bh"].shape[1]
    c_out = c_out2 // 2

    gsrc, tgt, a_norm = jax.vmap(lambda ei: build_graph_mats(ei, N))(edge_index)

    # lane-dense per-event slabs: one DMA descriptor each per grid step
    node_pack = jnp.concatenate([x, a_norm, tgt], axis=-1)            # [B, N, c_in+N+E]
    edge_pack = jnp.concatenate([edge_attr, gsrc], axis=-1)           # [B, E, c_in+N]
    vec_pack = _pack_vectors(params)
    wh_pad = jnp.zeros((c2, OUT_PAD), jnp.float32).at[:, :c_out2].set(params["wh"])

    # batch TB events per grid step (amortizes ~600-cycle fixed step cost,
    # fills MXU rows); pad the batch with zero events if needed.
    TB = min(tb, B)
    steps = pl.cdiv(B, TB)
    b_pad = steps * TB
    if b_pad != B:
        node_pack = jnp.concatenate(
            [node_pack, jnp.zeros((b_pad - B,) + node_pack.shape[1:], jnp.float32)], 0)
        edge_pack = jnp.concatenate(
            [edge_pack, jnp.zeros((b_pad - B,) + edge_pack.shape[1:], jnp.float32)], 0)

    def per_event(arr):
        return pl.BlockSpec((TB,) + tuple(arr.shape[1:]), lambda b: (b, 0, 0))

    def shared(arr):
        return pl.BlockSpec(tuple(arr.shape), lambda b: (0, 0))

    out = pl.pallas_call(
        vpfae_gen_kernel,
        out_shape=jax.ShapeDtypeStruct((b_pad, N, OUT_PAD), jnp.float32),
        grid=(steps,),
        in_specs=[per_event(node_pack), per_event(edge_pack),
                  shared(params["w1a"]), shared(params["w1b"]),
                  shared(params["w2a"]), shared(params["w2b"]),
                  shared(wh_pad), shared(vec_pack)],
        out_specs=pl.BlockSpec((TB, N, OUT_PAD), lambda b: (b, 0, 0)),
        compiler_params=pltpu.CompilerParams(
            dimension_semantics=("parallel",)),
    )(node_pack, edge_pack, params["w1a"], params["w1b"],
      params["w2a"], params["w2b"], wh_pad, vec_pack)

    out = out[:B, :, :c_out2]
    return out[..., :c_out], out[..., c_out:]                         # mu, logstd


if __name__ == "__main__":
    B, N, E = 32, 8, 16            # TB=16 -> 2 grid steps (even: both v7x TCs busy)
    IN_CHANNELS, OUT_CHANNELS = 8, 6   # layer1_out = 8, layer2_out = 7

    root = jax.random.PRNGKey(0)
    k_x, k_ea, k_src, k_dst, k_par = jax.random.split(root, 5)

    x = jax.random.normal(k_x, (B, N, IN_CHANNELS), jnp.float32)
    edge_attr = jax.random.normal(k_ea, (B, E, IN_CHANNELS), jnp.float32)
    # every node gets at least one incoming edge; sources random
    dst = jnp.concatenate(
        [jnp.broadcast_to(jnp.arange(N, dtype=jnp.int32), (B, N)),
         jax.random.randint(k_dst, (B, E - N), 0, N, jnp.int32)], axis=1)
    src = jax.random.randint(k_src, (B, E), 0, N, jnp.int32)
    edge_index = jnp.stack([src, dst], axis=1)      # [B, 2, E]

    params = init_params(k_par, IN_CHANNELS, OUT_CHANNELS)

    mu, logstd = vpfae_gen_forward(params, x, edge_index, edge_attr)
    jax.block_until_ready((mu, logstd))

    assert mu.shape == (B, N, OUT_CHANNELS) and logstd.shape == (B, N, OUT_CHANNELS)
    assert bool(jnp.all(jnp.isfinite(mu))) and bool(jnp.all(jnp.isfinite(logstd)))
    print("KERNEL_OK")
</pallas_src>

<mosaic_0001>
module attributes {stable_mosaic.version = 11 : i64} {
  func.func @vpfae_gen_kernel(%arg0: i32, %arg1: memref<16x8x32xf32, #tpu.memory_space<vmem>>, %arg2: memref<16x16x16xf32, #tpu.memory_space<vmem>>, %arg3: memref<8x16xf32, #tpu.memory_space<vmem>>, %arg4: memref<16x8xf32, #tpu.memory_space<vmem>>, %arg5: memref<8x16xf32, #tpu.memory_space<vmem>>, %arg6: memref<16x7xf32, #tpu.memory_space<vmem>>, %arg7: memref<7x128xf32, #tpu.memory_space<vmem>>, %arg8: memref<8x128xf32, #tpu.memory_space<vmem>>, %arg9: memref<16x8x128xf32, #tpu.memory_space<vmem>>) attributes {dimension_semantics = [#tpu.dimension_semantics<parallel>], iteration_bounds = array<i64: 2>, scalar_prefetch = 0 : i64, scratch_operands = 0 : i64, tpu.core_type = #tpu.core_type<tc>, window_params = [{transform_indices = @transform_0, window_bounds = array<i64: 16, 8, 32>}, {transform_indices = @transform_1, window_bounds = array<i64: 16, 16, 16>}, {pipeline_mode = #tpu.pipeline_mode<synchronous>, transform_indices = @transform_2, window_bounds = array<i64: 8, 16>}, {pipeline_mode = #tpu.pipeline_mode<synchronous>, transform_indices = @transform_3, window_bounds = array<i64: 16, 8>}, {pipeline_mode = #tpu.pipeline_mode<synchronous>, transform_indices = @transform_4, window_bounds = array<i64: 8, 16>}, {pipeline_mode = #tpu.pipeline_mode<synchronous>, transform_indices = @transform_5, window_bounds = array<i64: 16, 7>}, {pipeline_mode = #tpu.pipeline_mode<synchronous>, transform_indices = @transform_6, window_bounds = array<i64: 7, 128>}, {pipeline_mode = #tpu.pipeline_mode<synchronous>, transform_indices = @transform_7, window_bounds = array<i64: 8, 128>}, {transform_indices = @transform_8, window_bounds = array<i64: 16, 8, 128>}]} {
    %c0 = arith.constant 0 : index
    %c0_0 = arith.constant 0 : index
    %c0_1 = arith.constant 0 : index
    %0 = vector.load %arg1[%c0, %c0_0, %c0_1] : memref<16x8x32xf32, #tpu.memory_space<vmem>>, vector<16x8x32xf32>
    %c0_2 = arith.constant 0 : index
    %c0_3 = arith.constant 0 : index
    %c0_4 = arith.constant 0 : index
    %1 = vector.load %arg2[%c0_2, %c0_3, %c0_4] : memref<16x16x16xf32, #tpu.memory_space<vmem>>, vector<16x16x16xf32>
    %2 = vector.extract_strided_slice %0 {offsets = [0, 0, 0], sizes = [16, 8, 8], strides = [1, 1, 1]} : vector<16x8x32xf32> to vector<16x8x8xf32>
    %3 = vector.extract_strided_slice %0 {offsets = [0, 0, 8], sizes = [16, 8, 8], strides = [1, 1, 1]} : vector<16x8x32xf32> to vector<16x8x8xf32>
    %4 = vector.extract_strided_slice %0 {offsets = [0, 0, 16], sizes = [16, 8, 16], strides = [1, 1, 1]} : vector<16x8x32xf32> to vector<16x8x16xf32>
    %5 = vector.extract_strided_slice %1 {offsets = [0, 0, 0], sizes = [16, 16, 8], strides = [1, 1, 1]} : vector<16x16x16xf32> to vector<16x16x8xf32>
    %6 = vector.extract_strided_slice %1 {offsets = [0, 0, 8], sizes = [16, 16, 8], strides = [1, 1, 1]} : vector<16x16x16xf32> to vector<16x16x8xf32>
    %c0_5 = arith.constant 0 : index
    %c0_6 = arith.constant 0 : index
    %7 = vector.load %arg8[%c0_5, %c0_6] : memref<8x128xf32, #tpu.memory_space<vmem>>, vector<8x128xf32>
    %8 = vector.extract_strided_slice %7 {offsets = [0, 0], sizes = [1, 16], strides = [1, 1]} : vector<8x128xf32> to vector<1x16xf32>
    %9 = vector.extract_strided_slice %7 {offsets = [1, 0], sizes = [1, 16], strides = [1, 1]} : vector<8x128xf32> to vector<1x16xf32>
    %10 = vector.extract_strided_slice %7 {offsets = [2, 0], sizes = [1, 8], strides = [1, 1]} : vector<8x128xf32> to vector<1x8xf32>
    %11 = vector.extract_strided_slice %7 {offsets = [3, 0], sizes = [1, 16], strides = [1, 1]} : vector<8x128xf32> to vector<1x16xf32>
    %12 = vector.extract_strided_slice %7 {offsets = [4, 0], sizes = [1, 16], strides = [1, 1]} : vector<8x128xf32> to vector<1x16xf32>
    %13 = vector.extract_strided_slice %7 {offsets = [5, 0], sizes = [1, 7], strides = [1, 1]} : vector<8x128xf32> to vector<1x7xf32>
    %14 = vector.extract_strided_slice %7 {offsets = [6, 0], sizes = [1, 128], strides = [1, 1]} : vector<8x128xf32> to vector<1x128xf32>
    %c0_7 = arith.constant 0 : index
    %c0_8 = arith.constant 0 : index
    %15 = vector.load %arg3[%c0_7, %c0_8] : memref<8x16xf32, #tpu.memory_space<vmem>>, vector<8x16xf32>
    %c0_9 = arith.constant 0 : index
    %c0_10 = arith.constant 0 : index
    %16 = vector.load %arg4[%c0_9, %c0_10] : memref<16x8xf32, #tpu.memory_space<vmem>>, vector<16x8xf32>
    "tpu.trace_start"() <{level = 10 : i32, message = "ben,bnc->bec"}> : () -> ()
    %cst = arith.constant dense<0.000000e+00> : vector<16x16x8xf32>
    %17 = tpu.matmul %6, %2, %cst {dimension_numbers = #tpu.dot_dimension_numbers<[2], [1], [1], [2], [0, 0, 0, 1, 1, 2], [0], [0]>} : vector<16x16x8xf32>, vector<16x8x8xf32>, vector<16x16x8xf32> -> vector<16x16x8xf32>
    "tpu.trace_stop"() : () -> ()
    %18 = arith.addf %17, %5 : vector<16x16x8xf32>
    %cst_11 = arith.constant 0.000000e+00 : f32
    %19 = vector.broadcast %cst_11 : f32 to vector<16x16x8xf32>
    %20 = arith.maximumf %18, %19 : vector<16x16x8xf32>
    %cst_12 = arith.constant 1.000000e-07 : f32
    %21 = vector.broadcast %cst_12 : f32 to vector<16x16x8xf32>
    %22 = arith.addf %20, %21 : vector<16x16x8xf32>
    %cst_13 = arith.constant dense<0xFF800000> : vector<16x8xf32>
    %23 = vector.multi_reduction <maximumf>, %22, %cst_13 [1] : vector<16x16x8xf32> to vector<16x8xf32>
    %24 = vector.shape_cast %23 : vector<16x8xf32> to vector<16x1x8xf32>
    %25 = vector.broadcast %24 : vector<16x1x8xf32> to vector<16x16x8xf32>
    %26 = arith.subf %22, %25 : vector<16x16x8xf32>
    %27 = math.exp %26 : vector<16x16x8xf32>
    "tpu.trace_start"() <{level = 10 : i32, message = "bne,bec->bnc"}> : () -> ()
    %cst_14 = arith.constant dense<0.000000e+00> : vector<16x8x8xf32>
    %28 = tpu.matmul %4, %27, %cst_14 {dimension_numbers = #tpu.dot_dimension_numbers<[2], [1], [1], [2], [0, 0, 0, 1, 1, 2], [0], [0]>} : vector<16x8x16xf32>, vector<16x16x8xf32>, vector<16x8x8xf32> -> vector<16x8x8xf32>
    "tpu.trace_stop"() : () -> ()
    %29 = arith.mulf %27, %22 : vector<16x16x8xf32>
    "tpu.trace_start"() <{level = 10 : i32, message = "bne,bec->bnc"}> : () -> ()
    %cst_15 = arith.constant dense<0.000000e+00> : vector<16x8x8xf32>
    %30 = tpu.matmul %4, %29, %cst_15 {dimension_numbers = #tpu.dot_dimension_numbers<[2], [1], [1], [2], [0, 0, 0, 1, 1, 2], [0], [0]>} : vector<16x8x16xf32>, vector<16x16x8xf32>, vector<16x8x8xf32> -> vector<16x8x8xf32>
    "tpu.trace_stop"() : () -> ()
    %cst_16 = arith.constant 9.99999996E-13 : f32
    %31 = vector.broadcast %cst_16 : f32 to vector<16x8x8xf32>
    %32 = arith.maximumf %28, %31 : vector<16x8x8xf32>
    %33 = tpu.reciprocal %32 {approx = true} : vector<16x8x8xf32> -> vector<16x8x8xf32>
    %34 = arith.mulf %30, %33 : vector<16x8x8xf32>
    %35 = arith.addf %34, %2 : vector<16x8x8xf32>
    %36 = vector.shape_cast %35 : vector<16x8x8xf32> to vector<128x8xf32>
    %cst_17 = arith.constant dense<0.000000e+00> : vector<128x16xf32>
    %37 = tpu.matmul %36, %15, %cst_17 {dimension_numbers = #tpu.dot_dimension_numbers<[1], [0], [0], [1], [0, 0, 1, 1], [], []>} : vector<128x8xf32>, vector<8x16xf32>, vector<128x16xf32> -> vector<128x16xf32>
    %38 = vector.shape_cast %37 : vector<128x16xf32> to vector<16x8x16xf32>
    %cst_18 = arith.constant dense<0.000000e+00> : vector<16x16xf32>
    %39 = vector.multi_reduction <add>, %38, %cst_18 [1] : vector<16x8x16xf32> to vector<16x16xf32>
    %40 = vector.shape_cast %39 : vector<16x16xf32> to vector<16x1x16xf32>
    %cst_19 = arith.constant 8.000000e+00 : f32
    %41 = vector.broadcast %cst_19 : f32 to vector<16x1x16xf32>
    %42 = arith.divf %40, %41 : vector<16x1x16xf32>
    %43 = vector.broadcast %42 : vector<16x1x16xf32> to vector<16x8x16xf32>
    %44 = arith.subf %38, %43 : vector<16x8x16xf32>
    %45 = arith.mulf %44, %44 : vector<16x8x16xf32>
    %cst_20 = arith.constant dense<0.000000e+00> : vector<16x16xf32>
    %46 = vector.multi_reduction <add>, %45, %cst_20 [1] : vector<16x8x16xf32> to vector<16x16xf32>
    %47 = vector.shape_cast %46 : vector<16x16xf32> to vector<16x1x16xf32>
    %cst_21 = arith.constant 8.000000e+00 : f32
    %48 = vector.broadcast %cst_21 : f32 to vector<16x1x16xf32>
    %49 = arith.divf %47, %48 : vector<16x1x16xf32>
    %50 = vector.broadcast %42 : vector<16x1x16xf32> to vector<16x8x16xf32>
    %51 = arith.subf %38, %50 : vector<16x8x16xf32>
    %cst_22 = arith.constant 9.99999974E-6 : f32
    %52 = vector.broadcast %cst_22 : f32 to vector<16x1x16xf32>
    %53 = arith.addf %49, %52 : vector<16x1x16xf32>
    %54 = math.rsqrt %53 : vector<16x1x16xf32>
    %55 = vector.broadcast %54 : vector<16x1x16xf32> to vector<16x8x16xf32>
    %56 = arith.mulf %51, %55 : vector<16x8x16xf32>
    %57 = vector.shape_cast %8 : vector<1x16xf32> to vector<1x1x16xf32>
    %58 = vector.broadcast %57 : vector<1x1x16xf32> to vector<16x8x16xf32>
    %59 = arith.mulf %56, %58 : vector<16x8x16xf32>
    %60 = vector.shape_cast %9 : vector<1x16xf32> to vector<1x1x16xf32>
    %61 = vector.broadcast %60 : vector<1x1x16xf32> to vector<16x8x16xf32>
    %62 = arith.addf %59, %61 : vector<16x8x16xf32>
    %cst_23 = arith.constant 0.000000e+00 : f32
    %63 = vector.broadcast %cst_23 : f32 to vector<16x8x16xf32>
    %64 = arith.maximumf %62, %63 : vector<16x8x16xf32>
    %65 = vector.shape_cast %64 : vector<16x8x16xf32> to vector<128x16xf32>
    %cst_24 = arith.constant dense<0.000000e+00> : vector<128x8xf32>
    %66 = tpu.matmul %65, %16, %cst_24 {dimension_numbers = #tpu.dot_dimension_numbers<[1], [0], [0], [1], [0, 0, 1, 1], [], []>} : vector<128x16xf32>, vector<16x8xf32>, vector<128x8xf32> -> vector<128x8xf32>
    %67 = vector.broadcast %10 : vector<1x8xf32> to vector<128x8xf32>
    %68 = arith.addf %66, %67 : vector<128x8xf32>
    %69 = vector.shape_cast %68 : vector<128x8xf32> to vector<16x8x8xf32>
    %cst_25 = arith.constant 0.000000e+00 : f32
    %70 = vector.broadcast %cst_25 : f32 to vector<16x8x8xf32>
    %71 = arith.maximumf %69, %70 : vector<16x8x8xf32>
    %c0_26 = arith.constant 0 : index
    %c0_27 = arith.constant 0 : index
    %72 = vector.load %arg5[%c0_26, %c0_27] : memref<8x16xf32, #tpu.memory_space<vmem>>, vector<8x16xf32>
    %c0_28 = arith.constant 0 : index
    %c0_29 = arith.constant 0 : index
    %73 = vector.load %arg6[%c0_28, %c0_29] : memref<16x7xf32, #tpu.memory_space<vmem>>, vector<16x7xf32>
    "tpu.trace_start"() <{level = 10 : i32, message = "ben,bnc->bec"}> : () -> ()
    %cst_30 = arith.constant dense<0.000000e+00> : vector<16x16x8xf32>
    %74 = tpu.matmul %6, %71, %cst_30 {dimension_numbers = #tpu.dot_dimension_numbers<[2], [1], [1], [2], [0, 0, 0, 1, 1, 2], [0], [0]>} : vector<16x16x8xf32>, vector<16x8x8xf32>, vector<16x16x8xf32> -> vector<16x16x8xf32>
    "tpu.trace_stop"() : () -> ()
    %75 = arith.addf %74, %5 : vector<16x16x8xf32>
    %cst_31 = arith.constant 0.000000e+00 : f32
    %76 = vector.broadcast %cst_31 : f32 to vector<16x16x8xf32>
    %77 = arith.maximumf %75, %76 : vector<16x16x8xf32>
    %cst_32 = arith.constant 1.000000e-07 : f32
    %78 = vector.broadcast %cst_32 : f32 to vector<16x16x8xf32>
    %79 = arith.addf %77, %78 : vector<16x16x8xf32>
    %cst_33 = arith.constant dense<0xFF800000> : vector<16x8xf32>
    %80 = vector.multi_reduction <maximumf>, %79, %cst_33 [1] : vector<16x16x8xf32> to vector<16x8xf32>
    %81 = vector.shape_cast %80 : vector<16x8xf32> to vector<16x1x8xf32>
    %82 = vector.broadcast %81 : vector<16x1x8xf32> to vector<16x16x8xf32>
    %83 = arith.subf %79, %82 : vector<16x16x8xf32>
    %84 = math.exp %83 : vector<16x16x8xf32>
    "tpu.trace_start"() <{level = 10 : i32, message = "bne,bec->bnc"}> : () -> ()
    %cst_34 = arith.constant dense<0.000000e+00> : vector<16x8x8xf32>
    %85 = tpu.matmul %4, %84, %cst_34 {dimension_numbers = #tpu.dot_dimension_numbers<[2], [1], [1], [2], [0, 0, 0, 1, 1, 2], [0], [0]>} : vector<16x8x16xf32>, vector<16x16x8xf32>, vector<16x8x8xf32> -> vector<16x8x8xf32>
    "tpu.trace_stop"() : () -> ()
    %86 = arith.mulf %84, %79 : vector<16x16x8xf32>
    "tpu.trace_start"() <{level = 10 : i32, message = "bne,bec->bnc"}> : () -> ()
    %cst_35 = arith.constant dense<0.000000e+00> : vector<16x8x8xf32>
    %87 = tpu.matmul %4, %86, %cst_35 {dimension_numbers = #tpu.dot_dimension_numbers<[2], [1], [1], [2], [0, 0, 0, 1, 1, 2], [0], [0]>} : vector<16x8x16xf32>, vector<16x16x8xf32>, vector<16x8x8xf32> -> vector<16x8x8xf32>
    "tpu.trace_stop"() : () -> ()
    %cst_36 = arith.constant 9.99999996E-13 : f32
    %88 = vector.broadcast %cst_36 : f32 to vector<16x8x8xf32>
    %89 = arith.maximumf %85, %88 : vector<16x8x8xf32>
    %90 = tpu.reciprocal %89 {approx = true} : vector<16x8x8xf32> -> vector<16x8x8xf32>
    %91 = arith.mulf %87, %90 : vector<16x8x8xf32>
    %92 = arith.addf %91, %71 : vector<16x8x8xf32>
    %93 = vector.shape_cast %92 : vector<16x8x8xf32> to vector<128x8xf32>
    %cst_37 = arith.constant dense<0.000000e+00> : vector<128x16xf32>
    %94 = tpu.matmul %93, %72, %cst_37 {dimension_numbers = #tpu.dot_dimension_numbers<[1], [0], [0], [1], [0, 0, 1, 1], [], []>} : vector<128x8xf32>, vector<8x16xf32>, vector<128x16xf32> -> vector<128x16xf32>
    %95 = vector.shape_cast %94 : vector<128x16xf32> to vector<16x8x16xf32>
    %cst_38 = arith.constant dense<0.000000e+00> : vector<16x16xf32>
    %96 = vector.multi_reduction <add>, %95, %cst_38 [1] : vector<16x8x16xf32> to vector<16x16xf32>
    %97 = vector.shape_cast %96 : vector<16x16xf32> to vector<16x1x16xf32>
    %cst_39 = arith.constant 8.000000e+00 : f32
    %98 = vector.broadcast %cst_39 : f32 to vector<16x1x16xf32>
    %99 = arith.divf %97, %98 : vector<16x1x16xf32>
    %100 = vector.broadcast %99 : vector<16x1x16xf32> to vector<16x8x16xf32>
    %101 = arith.subf %95, %100 : vector<16x8x16xf32>
    %102 = arith.mulf %101, %101 : vector<16x8x16xf32>
    %cst_40 = arith.constant dense<0.000000e+00> : vector<16x16xf32>
    %103 = vector.multi_reduction <add>, %102, %cst_40 [1] : vector<16x8x16xf32> to vector<16x16xf32>
    %104 = vector.shape_cast %103 : vector<16x16xf32> to vector<16x1x16xf32>
    %cst_41 = arith.constant 8.000000e+00 : f32
    %105 = vector.broadcast %cst_41 : f32 to vector<16x1x16xf32>
    %106 = arith.divf %104, %105 : vector<16x1x16xf32>
    %107 = vector.broadcast %99 : vector<16x1x16xf32> to vector<16x8x16xf32>
    %108 = arith.subf %95, %107 : vector<16x8x16xf32>
    %cst_42 = arith.constant 9.99999974E-6 : f32
    %109 = vector.broadcast %cst_42 : f32 to vector<16x1x16xf32>
    %110 = arith.addf %106, %109 : vector<16x1x16xf32>
    %111 = math.rsqrt %110 : vector<16x1x16xf32>
    %112 = vector.broadcast %111 : vector<16x1x16xf32> to vector<16x8x16xf32>
    %113 = arith.mulf %108, %112 : vector<16x8x16xf32>
    %114 = vector.shape_cast %11 : vector<1x16xf32> to vector<1x1x16xf32>
    %115 = vector.broadcast %114 : vector<1x1x16xf32> to vector<16x8x16xf32>
    %116 = arith.mulf %113, %115 : vector<16x8x16xf32>
    %117 = vector.shape_cast %12 : vector<1x16xf32> to vector<1x1x16xf32>
    %118 = vector.broadcast %117 : vector<1x1x16xf32> to vector<16x8x16xf32>
    %119 = arith.addf %116, %118 : vector<16x8x16xf32>
    %cst_43 = arith.constant 0.000000e+00 : f32
    %120 = vector.broadcast %cst_43 : f32 to vector<16x8x16xf32>
    %121 = arith.maximumf %119, %120 : vector<16x8x16xf32>
    %122 = vector.shape_cast %121 : vector<16x8x16xf32> to vector<128x16xf32>
    %cst_44 = arith.constant dense<0.000000e+00> : vector<128x7xf32>
    %123 = tpu.matmul %122, %73, %cst_44 {dimension_numbers = #tpu.dot_dimension_numbers<[1], [0], [0], [1], [0, 0, 1, 1], [], []>} : vector<128x16xf32>, vector<16x7xf32>, vector<128x7xf32> -> vector<128x7xf32>
    %124 = vector.broadcast %13 : vector<1x7xf32> to vector<128x7xf32>
    %125 = arith.addf %123, %124 : vector<128x7xf32>
    %126 = vector.shape_cast %125 : vector<128x7xf32> to vector<16x8x7xf32>
    %cst_45 = arith.constant 0.000000e+00 : f32
    %127 = vector.broadcast %cst_45 : f32 to vector<16x8x7xf32>
    %128 = arith.maximumf %126, %127 : vector<16x8x7xf32>
    %129 = vector.shape_cast %128 : vector<16x8x7xf32> to vector<128x7xf32>
    %c0_46 = arith.constant 0 : index
    %c0_47 = arith.constant 0 : index
    %130 = vector.load %arg7[%c0_46, %c0_47] : memref<7x128xf32, #tpu.memory_space<vmem>>, vector<7x128xf32>
    %cst_48 = arith.constant dense<0.000000e+00> : vector<128x128xf32>
    %131 = tpu.matmul %129, %130, %cst_48 {dimension_numbers = #tpu.dot_dimension_numbers<[1], [0], [0], [1], [0, 0, 1, 1], [], []>} : vector<128x7xf32>, vector<7x128xf32>, vector<128x128xf32> -> vector<128x128xf32>
    %132 = vector.shape_cast %131 : vector<128x128xf32> to vector<16x8x128xf32>
    "tpu.trace_start"() <{level = 10 : i32, message = "bnm,bmd->bnd"}> : () -> ()
    %cst_49 = arith.constant dense<0.000000e+00> : vector<16x8x128xf32>
    %133 = tpu.matmul %3, %132, %cst_49 {dimension_numbers = #tpu.dot_dimension_numbers<[2], [1], [1], [2], [0, 0, 0, 1, 1, 2], [0], [0]>} : vector<16x8x8xf32>, vector<16x8x128xf32>, vector<16x8x128xf32> -> vector<16x8x128xf32>
    "tpu.trace_stop"() : () -> ()
    %134 = vector.shape_cast %14 : vector<1x128xf32> to vector<1x1x128xf32>
    %135 = vector.broadcast %134 : vector<1x1x128xf32> to vector<16x8x128xf32>
    %136 = arith.addf %133, %135 : vector<16x8x128xf32>
    %c0_50 = arith.constant 0 : index
    %c0_51 = arith.constant 0 : index
    %c0_52 = arith.constant 0 : index
    %137 = vector.load %arg9[%c0_50, %c0_51, %c0_52] : memref<16x8x128xf32, #tpu.memory_space<vmem>>, vector<16x8x128xf32>
    tpu.vector_store %arg9[%c0_50, %c0_51, %c0_52], %136 {strides = array<i32>} : memref<16x8x128xf32, #tpu.memory_space<vmem>>, vector<16x8x128xf32>,
    return
  }
  func.func @transform_0(%arg0: i32) -> (i32, i32, i32) {
    %c0_i32 = arith.constant 0 : i32
    %c0_i32_0 = arith.constant 0 : i32
    %c0_i32_1 = arith.constant 0 : i32
    return %arg0, %c0_i32, %c0_i32_0 : i32, i32, i32
  }
  func.func @transform_1(%arg0: i32) -> (i32, i32, i32) {
    %c0_i32 = arith.constant 0 : i32
    %c0_i32_0 = arith.constant 0 : i32
    %c0_i32_1 = arith.constant 0 : i32
    return %arg0, %c0_i32, %c0_i32_0 : i32, i32, i32
  }
  func.func @transform_2(%arg0: i32) -> (i32, i32) {
    %c0_i32 = arith.constant 0 : i32
    %c0_i32_0 = arith.constant 0 : i32
    %c0_i32_1 = arith.constant 0 : i32
    return %c0_i32, %c0_i32_0 : i32, i32
  }
  func.func @transform_3(%arg0: i32) -> (i32, i32) {
    %c0_i32 = arith.constant 0 : i32
    %c0_i32_0 = arith.constant 0 : i32
    %c0_i32_1 = arith.constant 0 : i32
    return %c0_i32, %c0_i32_0 : i32, i32
  }
  func.func @transform_4(%arg0: i32) -> (i32, i32) {
    %c0_i32 = arith.constant 0 : i32
    %c0_i32_0 = arith.constant 0 : i32
    %c0_i32_1 = arith.constant 0 : i32
    return %c0_i32, %c0_i32_0 : i32, i32
  }
  func.func @transform_5(%arg0: i32) -> (i32, i32) {
    %c0_i32 = arith.constant 0 : i32
    %c0_i32_0 = arith.constant 0 : i32
    %c0_i32_1 = arith.constant 0 : i32
    return %c0_i32, %c0_i32_0 : i32, i32
  }
  func.func @transform_6(%arg0: i32) -> (i32, i32) {
    %c0_i32 = arith.constant 0 : i32
    %c0_i32_0 = arith.constant 0 : i32
    %c0_i32_1 = arith.constant 0 : i32
    return %c0_i32, %c0_i32_0 : i32, i32
  }
  func.func @transform_7(%arg0: i32) -> (i32, i32) {
    %c0_i32 = arith.constant 0 : i32
    %c0_i32_0 = arith.constant 0 : i32
    %c0_i32_1 = arith.constant 0 : i32
    return %c0_i32, %c0_i32_0 : i32, i32
  }
  func.func @transform_8(%arg0: i32) -> (i32, i32, i32) {
    %c0_i32 = arith.constant 0 : i32
    %c0_i32_0 = arith.constant 0 : i32
    %c0_i32_1 = arith.constant 0 : i32
    return %arg0, %c0_i32, %c0_i32_0 : i32, i32, i32
  }
}

</mosaic_0001>

<bundles_post_ra>
// kernel: vpfae_gen_forward.1
= control target key start
LH: loop header
LB: loop body
LE: loop exit
PB: predicated region body
PF: predicated region fallthrough
CT: control target
= control target key end

     0   :  { %s6203_s27 = smov 0   ;;  %s8414_s0 = inlined_call_operand.vmem [shape: f32[32,8,32], index: 0, kind: input, shape index: {}]   ;;  %s8415_s1 = inlined_call_operand.vmem [shape: f32[32,16,16], index: 1, kind: input, shape index: {}]   ;;  %s8416_s2 = inlined_call_operand.vmem [shape: f32[8,16], index: 2, kind: input, shape index: {}]   ;;  %s8417_s3 = inlined_call_operand.vmem [shape: f32[16,8], index: 3, kind: input, shape index: {}]   ;;  %s8418_s4 = inlined_call_operand.vmem [shape: f32[8,16], index: 4, kind: input, shape index: {}]   ;;  %s8419_s5 = inlined_call_operand.vmem [shape: f32[16,7], index: 5, kind: input, shape index: {}]   ;;  %s8420_s6 = inlined_call_operand.vmem [shape: f32[7,128], index: 6, kind: input, shape index: {}]   ;;  %s8421_s7 = inlined_call_operand.vmem [shape: f32[8,128], index: 7, kind: input, shape index: {}]   ;;  %s8422_s8 = inlined_call_operand.vmem [shape: f32[32,8,128], index: 8, kind: output, shape index: {}]  }
   0x1 LB: > { %s5588_s28 = sadd.s32 4294967295, %s6153_s27   ;;  %p5592_p0 = scmp.ge.s32.totalorder %s6153_s27, 1  ;;  %s6153_s27 = sphi %s6203_s27, %s18_s27  }
   0x2   : > { %p275_p1 = scmp.lt.s32.totalorder %s6153_s27, 3 }
   0x4   : > { %p276_p2 = pnand %p5592_p0, %p275_p1 }
   0x6   : > { %279 = sbr.rel (%p276_p2) target bundleno = 1961 (0x7a9), region = 52 }
   0xb   : > { %s5593_s29 = sshll.u32 %s5588_s28, 4  ;;  %s6155_s12 = smov 120   ;;  %vm392_vm0 = vcmask 64512   ;;  %vm1222_vm1 = vcmask 130048  }
   0xc   : > { %p316_p3 = scmp.lt.s32.totalorder %s5593_s29, 31  ;;  %s6156_s17 = smov 112  }
   0xe   : > { %s8680_s29 = smov (!%p316_p3, %s5593_s29), 31 }
   0xf   : > { %s5827_s30 = sshll.u32 %s8680_s29, 4  ;;  %s5594_s13 = sshll.u32 %s8680_s29, 3 }
  0x10   : > { %s6217_s11 = scalar_lea.vmem %s8415_s1, %s5827_s30  ;;  %s6354_s16 = scalar_lea.vmem %s8414_s0, %s5594_s13 }
  0x11   : > { %v6220_v0 = vld [vmem:[%s6217_s11 + $0x28] sm:$0xff]  ;;  %v6226_v2 = vld [vmem:[%s6217_s11] sm:$0xff]  ;;  %v6235_v3 = vld [vmem:[%s6217_s11 + $0x30] sm:$0xff]  ;;  %s8392_s21 = scalar_lea.vmem %s8422_s8, %s5594_s13 }
  0x12   : > { %v6223_v1 = vld [vmem:[%s6217_s11 + $0x8] sm:$0xff]  ;;  %457 = vrot.lane.b32.xlu2 %v6220_v0, %s6155_s12  ;;  %388 = vrot.lane.b32.xlu0 %v6226_v2, %s6155_s12  ;;  %v6238_v4 = vld [vmem:[%s6217_s11 + $0x10] sm:$0xff] }
  0x13   : > { %390 = vrot.lane.b32.xlu1 %v6223_v1, %s6155_s12  ;;  %v6241_v5 = vld [vmem:[%s6217_s11 + $0x20] sm:$0xff]  ;;  %v6250_v6 = vld [vmem:[%s6217_s11 + $0x38] sm:$0xff]  ;;  %v6265_v9 = vld [vmem:[%s6217_s11 + $0x48] sm:$0xff] }
  0x14   : > { %v6253_v7 = vld [vmem:[%s6217_s11 + $0x40] sm:$0xff]  ;;  %v6256_v8 = vld [vmem:[%s6217_s11 + $0x18] sm:$0xff]  ;;  %v6268_v10 = vld [vmem:[%s6217_s11 + $0x50] sm:$0xff] }
  0x15   : > { %v6271_v11 = vld [vmem:[%s6217_s11 + $0x60] sm:$0xff]  ;;  %v6280_v12 = vld [vmem:[%s6217_s11 + $0x70] sm:$0xff]  ;;  %v6283_v13 = vld [vmem:[%s6217_s11 + $0x58] sm:$0xff] }
  0x16   : > { %v6286_v14 = vld [vmem:[%s6217_s11 + $0x68] sm:$0xff]  ;;  %v6295_v15 = vld [vmem:[%s6217_s11 + $0x78] sm:$0xff]  ;;  %v6298_v16 = vld [vmem:[%s6217_s11 + $0xa0] sm:$0xff] }
  0x17   : > { %v6301_v17 = vld [vmem:[%s6217_s11 + $0x80] sm:$0xff]  ;;  %v6310_v18 = vld [vmem:[%s6217_s11 + $0x90] sm:$0xff]  ;;  %v6313_v19 = vld [vmem:[%s6217_s11 + $0xa8] sm:$0xff] }
  0x18   : > { %v6316_v20 = vld [vmem:[%s6217_s11 + $0x88] sm:$0xff]  ;;  %v6325_v21 = vld [vmem:[%s6217_s11 + $0x98] sm:$0xff]  ;;  %v6328_v22 = vld [vmem:[%s6217_s11 + $0xc0] sm:$0xff] }
  0x19   : > { %v6331_v23 = vld [vmem:[%s6217_s11 + $0xb0] sm:$0xff]  ;;  %v6341_v24 = vld [vmem:[%s6217_s11 + $0xe0] sm:$0xff]  ;;  %v6344_v25 = vld [vmem:[%s6217_s11 + $0xc8] sm:$0xff] }
  0x1a   : > { %488 = vrot.lane.b32.xlu2 %v6235_v3, %s6155_s12  ;;  %455 = vrot.lane.b32.xlu0 %v6241_v5, %s6155_s12  ;;  %v6347_v26 = vld [vmem:[%s6217_s11 + $0xb8] sm:$0xff]  ;;  %v6367_v28 = vld [vmem:[%s6217_s11 + $0xe8] sm:$0xff] }
  0x1b   : > { %422 = vrot.lane.b32.xlu1 %v6238_v4, %s6155_s12  ;;  %v6363_v27 = vld [vmem:[%s6354_s16 + $0x18] sm:$0xff]  ;;  %v6370_v29 = vld [vmem:[%s6217_s11 + $0xf0] sm:$0xff]  ;;  %v6392_v33 = vld [vmem:[%s6354_s16] sm:$0xff] }
  0x1c   : > { %511 = vmatpush.msra.mxu3 %v6363_v27  ;;  %v6373_v30 = vld [vmem:[%s6217_s11 + $0xd0] sm:$0xff]  ;;  %v6382_v31 = vld [vmem:[%s6217_s11 + $0xf8] sm:$0xff]  ;;  %412 = vmatpush.msra.mxu0 %v6392_v33  ;;  %v6400_v35 = vld [vmem:[%s6354_s16 + $0x8] sm:$0xff] }
  0x1d   : > { %v6385_v32 = vld [vmem:[%s6217_s11 + $0xd8] sm:$0xff]  ;;  %v6403_v36 = vld [vmem:[%s6354_s16 + $0x10] sm:$0xff]  ;;  %445 = vmatpush.msra.mxu1 %v6400_v35  ;;  %v6414_v38 = vld [vmem:[%s6354_s16 + $0x20] sm:$0xff] }
  0x1e   : > { %478 = vmatpush.msra.mxu2 %v6403_v36  ;;  %544 = vmatpush.msrb.mxu0 %v6414_v38  ;;  %v6428_v40 = vld [vmem:[%s6354_s16 + $0x28] sm:$0xff]  ;;  %v6431_v41 = vld [vmem:[%s6354_s16 + $0x30] sm:$0xff]  ;;  %v6442_v44 = vld [vmem:[%s6354_s16 + $0x38] sm:$0xff] }
  0x1f   : > { %577 = vmatpush.msrb.mxu1 %v6428_v40  ;;  %643 = vmatpush.msrb.mxu3 %v6442_v44  ;;  %v6456_v47 = vld [vmem:[%s6354_s16 + $0x40] sm:$0xff]  ;;  %v6459_v48 = vld [vmem:[%s6354_s16 + $0x50] sm:$0xff]  ;;  %v343_v52 = vld [vmem:[%s6354_s16 + $0x48] sm:$0xff] }
  0x20   : > { %610 = vmatpush.msrb.mxu2 %v6431_v41  ;;  %v6492_v56 = vld [vmem:[%s6354_s16 + $0x58] sm:$0xff]  ;;  %v346_v57 = vld [vmem:[%s6354_s16 + $0x60] sm:$0xff]  ;;  %v348_v61 = vld [vmem:[%s6354_s16 + $0x70] sm:$0xff] }
  0x22   : > { %490 = vrot.lane.b32.xlu2 %v6250_v6, %s6155_s12  ;;  %424 = vrot.lane.b32.xlu0 %v6256_v8, %s6155_s12 }
  0x23   : > { %521 = vrot.lane.b32.xlu1 %v6253_v7, %s6155_s12 }
  0x2a   : > { %554 = vrot.lane.b32.xlu2 %v6268_v10, %s6155_s12  ;;  %587 = vrot.lane.b32.xlu0 %v6271_v11, %s6155_s12 }
  0x2b   : > { %523 = vrot.lane.b32.xlu1 %v6265_v9, %s6155_s12 }
  0x32   : > { %556 = vrot.lane.b32.xlu2 %v6283_v13, %s6155_s12  ;;  %589 = vrot.lane.b32.xlu0 %v6286_v14, %s6155_s12 }
  0x33   : > { %620 = vrot.lane.b32.xlu1 %v6280_v12, %s6155_s12 }
  0x3a   : > { %719 = vrot.lane.b32.xlu2 %v6298_v16, %s6155_s12  ;;  %653 = vrot.lane.b32.xlu0 %v6301_v17, %s6155_s12 }
  0x3b   : > { %622 = vrot.lane.b32.xlu1 %v6295_v15, %s6155_s12 }
  0x42   : > { %721 = vrot.lane.b32.xlu2 %v6313_v19, %s6155_s12  ;;  %655 = vrot.lane.b32.xlu0 %v6316_v20, %s6155_s12 }
  0x43   : > { %686 = vrot.lane.b32.xlu1 %v6310_v18, %s6155_s12 }
  0x4a   : > { %785 = vrot.lane.b32.xlu2 %v6328_v22, %s6155_s12  ;;  %752 = vrot.lane.b32.xlu0 %v6331_v23, %s6155_s12 }
  0x4b   : > { %688 = vrot.lane.b32.xlu1 %v6325_v21, %s6155_s12 }
  0x52   : > { %787 = vrot.lane.b32.xlu2 %v6344_v25, %s6155_s12  ;;  %754 = vrot.lane.b32.xlu0 %v6347_v26, %s6155_s12 }
  0x53   : > { %851 = vrot.lane.b32.xlu1 %v6341_v24, %s6155_s12 }
  0x5a   : > { %884 = vrot.lane.b32.xlu2 %v6370_v29, %s6155_s12  ;;  %818 = vrot.lane.b32.xlu0 %v6373_v30, %s6155_s12 }
  0x5b   : > { %853 = vrot.lane.b32.xlu1 %v6367_v28, %s6155_s12 }
  0x62   : > { %820 = vrot.lane.b32.xlu0 %v6385_v32, %s6155_s12  ;;  %1220 = vrot.lane.b32.xlu2 %v6392_v33, %s6156_s17 }
  0x63   : > { %886 = vrot.lane.b32.xlu1 %v6382_v31, %s6155_s12 }
  0x6a   : > { %1246 = vrot.lane.b32.xlu0 %v6400_v35, %s6156_s17  ;;  %1271 = vrot.lane.b32.xlu2 %v6403_v36, %s6156_s17 }
  0x6b   : > { %1321 = vrot.lane.b32.xlu1 %v6414_v38, %s6156_s17 }
  0x6c   : > { %v6397_v34 = vpop.permute.xlu2 %457 }
  0x6d   : > { %8517 = vst [vmem:[#allocation2_spill] sm:$0xff] %v6397_v34 }
  0x72   : > { %1296 = vrot.lane.b32.xlu2 %v6363_v27, %s6156_s17  ;;  %1346 = vrot.lane.b32.xlu0 %v6428_v40, %s6156_s17 }
  0x73   : > { %1421 = vrot.lane.b32.xlu1 %v6456_v47, %s6156_s17 }
  0x74   : > { %v6411_v37 = vpop.permute.xlu2 %488 }
  0x75   : > { %8518 = vst [vmem:[#allocation3_spill] sm:$0xff] %v6411_v37  ;;  %5606 = vmatmul.msk.f32.vlgmr.msra.gmra.mxu3 %vm392_vm0, %v6411_v37 }
  0x76   : > { %775 = vmatpush.msra.mxu3 %v6492_v56 }
  0x7a   : > { %1371 = vrot.lane.b32.xlu0 %v6431_v41, %s6156_s17  ;;  %1521 = vrot.lane.b32.xlu2 %v346_v57, %s6156_s17 }
  0x7b   : > { %1446 = vrot.lane.b32.xlu1 %v343_v52, %s6156_s17 }
  0x7c   : > { %v6423_v39 = vpop.permute.xlu2 %490 }
  0x7d   : > { %8519 = vst [vmem:[#allocation4_spill] sm:$0xff] %v6423_v39  ;;  %5607 = vmatmul.msk.f32.gmra.mxu3 %vm392_vm0, %v6423_v39 }
  0x82   : > { %1396 = vrot.lane.b32.xlu0 %v6442_v44, %s6156_s17 }
  0x83   : > { %1471 = vrot.lane.b32.xlu1 %v6459_v48, %s6156_s17 }
  0x84   : > { %v6439_v43 = vpop.permute.xlu0 %388  ;;  %v6465_v49 = vpop.permute.xlu2 %554 }
  0x85   : > { %v6437_v42 = vpop.permute.xlu1 %390  ;;  %8521 = vst [vmem:[#allocation6_spill] sm:$0xff] %v6439_v43  ;;  %5600 = vmatmul.msk.f32.vlgmr.msra.gmra.mxu0 %vm392_vm0, %v6439_v43 }
  0x86   : > { %8520 = vst [vmem:[#allocation5_spill] sm:$0xff] %v6437_v42  ;;  %676 = vmatpush.msra.mxu0 %v6456_v47 }
  0x87   : > { %8524 = vst [vmem:[#allocation9_spill] sm:$0xff] %v6465_v49 }
  0x8a   : > { %1496 = vrot.lane.b32.xlu0 %v6492_v56, %s6156_s17 }
  0x8b   : > { %1571 = vrot.lane.b32.xlu1 %v348_v61, %s6156_s17 }
  0x8c   : > { %v6451_v46 = vpop.permute.xlu0 %455  ;;  %v6485_v53 = vpop.permute.xlu2 %556 }
  0x8d   : > { %v6449_v45 = vpop.permute.xlu1 %422  ;;  %8523 = vst [vmem:[#allocation8_spill] sm:$0xff] %v6451_v46  ;;  %5601 = vmatmul.msk.f32.gmra.mxu0 %vm392_vm0, %v6437_v42  ;;  %5604 = vmatmul.msk.f32.vlgmr.msra.gmra.mxu2 %vm392_vm0, %v6451_v46 }
  0x8e   : > { %8522 = vst [vmem:[#allocation7_spill] sm:$0xff] %v6449_v45  ;;  %5602 = vmatmul.msk.f32.vlgmr.msra.gmra.mxu1 %vm392_vm0, %v6449_v45  ;;  %742 = vmatpush.msra.mxu2 %v6459_v48 }
  0x8f   : > { %709 = vmatpush.msra.mxu1 %v343_v52  ;;  %8527 = vst [vmem:[#allocation12_spill] sm:$0xff] %v6485_v53 }
  0x92   : > { %5120 = vrot.lane.b32.xlu0 %v6392_v33, %s6155_s12 }
  0x93   : > { %5144 = vrot.lane.b32.xlu1 %v6400_v35, %s6155_s12 }
  0x94   : > { %v6475_v51 = vpop.permute.xlu0 %424  ;;  %v6507_v58 = vpop.permute.xlu2 %719 }
  0x95   : > { %v6473_v50 = vpop.permute.xlu1 %521  ;;  %8526 = vst [vmem:[#allocation11_spill] sm:$0xff] %v6475_v51  ;;  %5605 = vmatmul.msk.f32.gmra.mxu2 %vm392_vm0, %v6397_v34 }
  0x96   : > { %8525 = vst [vmem:[#allocation10_spill] sm:$0xff] %v6473_v50  ;;  %5603 = vmatmul.msk.f32.gmra.mxu1 %vm392_vm0, %v6475_v51  ;;  %5608 = vmatmul.msk.f32.vlgmr.msrb.gmra.mxu0 %vm392_vm0, %v6473_v50 }
  0x97   : > { %808 = vmatpush.msrb.mxu0 %v346_v57  ;;  %8530 = vst [vmem:[#allocation15_spill] sm:$0xff] %v6507_v58 }
  0x9a   : > { %5192 = vrot.lane.b32.xlu0 %v6363_v27, %s6155_s12 }
  0x9b   : > { %5216 = vrot.lane.b32.xlu1 %v6414_v38, %s6155_s12 }
  0x9c   : > { %v6489_v55 = vpop.permute.xlu0 %587 }
  0x9d   : > { %v6487_v54 = vpop.permute.xlu1 %523  ;;  %8529 = vst [vmem:[#allocation14_spill] sm:$0xff] %v6489_v55  ;;  %5612 = vmatmul.msk.f32.vlgmr.msrb.gmra.mxu2 %vm392_vm0, %v6489_v55  ;;  %v347_v55 = vld [vmem:[%s6354_s16 + $0x68] sm:$0xff] }
  0x9e   : > { %8528 = vst [vmem:[#allocation13_spill] sm:$0xff] %v6487_v54  ;;  %5610 = vmatmul.msk.f32.vlgmr.msrb.gmra.mxu1 %vm392_vm0, %v6465_v49  ;;  %5609 = vmatmul.msk.f32.gmra.mxu0 %vm392_vm0, %v6487_v54 }
  0x9f   : > { %874 = vmatpush.msrb.mxu2 %v348_v61  ;;  %841 = vmatpush.msrb.mxu1 %v347_v55 }
  0xa0   : > { %1546 = vrot.lane.b32.xlu2 %v347_v55, %s6156_s17 }
  0xa2   : > { %5264 = vrot.lane.b32.xlu0 %v6431_v41, %s6155_s12 }
  0xa3   : > { %5288 = vrot.lane.b32.xlu1 %v6442_v44, %s6155_s12 }
  0xa4   : > { %v6511_v60 = vpop.permute.xlu0 %589 }
  0xa5   : > { %v6509_v59 = vpop.permute.xlu1 %620  ;;  %8532 = vst [vmem:[#allocation17_spill] sm:$0xff] %v6511_v60  ;;  %5613 = vmatmul.msk.f32.gmra.mxu2 %vm392_vm0, %v6511_v60 }
  0xa6   : > { %8531 = vst [vmem:[#allocation16_spill] sm:$0xff] %v6509_v59  ;;  %5614 = vmatmul.msk.f32.vlgmr.msrb.gmra.mxu3 %vm392_vm0, %v6509_v59  ;;  %5611 = vmatmul.msk.f32.gmra.mxu1 %vm392_vm0, %v6485_v53  ;;  %v6529_v59 = vpop.permute.xlu2 %721  ;;  %v349_v53 = vld [vmem:[%s6354_s16 + $0x78] sm:$0xff] }
  0xa7   : > { %8535 = vst [vmem:[#allocation20_spill] sm:$0xff] %v6529_v59  ;;  %907 = vmatpush.msrb.mxu3 %v349_v53 }
  0xa8   : > { %1596 = vrot.lane.b32.xlu2 %v349_v53, %s6156_s17 }
  0xaa   : > { %5336 = vrot.lane.b32.xlu0 %v343_v52, %s6155_s12 }
  0xab   : > { %5360 = vrot.lane.b32.xlu1 %v6459_v48, %s6155_s12 }
  0xac   : > { %v6525_v63 = vpop.permute.xlu0 %653 }
  0xad   : > { %v6523_v62 = vpop.permute.xlu1 %622  ;;  %8534 = vst [vmem:[#allocation19_spill] sm:$0xff] %v6525_v63  ;;  %5616 = vmatmul.msk.f32.vlgmr.msra.gmra.mxu0 %vm392_vm0, %v6525_v63  ;;  %5620 = vmatmul.msk.f32.vlgmr.msra.gmra.mxu2 %vm392_vm0, %v6507_v58 }
  0xae   : > { %8533 = vst [vmem:[#allocation18_spill] sm:$0xff] %v6523_v62  ;;  %5615 = vmatmul.msk.f32.gmra.mxu3 %vm392_vm0, %v6523_v62  ;;  %v6552_v58 = vpop.permute.xlu2 %785 }
  0xaf   : > { %8538 = vst [vmem:[#allocation23_spill] sm:$0xff] %v6552_v58 }
  0xb0   : > { %5168 = vrot.lane.b32.xlu2 %v6403_v36, %s6155_s12 }
  0xb2   : > { %5408 = vrot.lane.b32.xlu0 %v346_v57, %s6155_s12 }
  0xb3   : > { %5432 = vrot.lane.b32.xlu1 %v347_v55, %s6155_s12 }
  0xb4   : > { %v6544_v62 = vpop.permute.xlu0 %655 }
  0xb5   : > { %v6542_v33 = vpop.permute.xlu1 %686  ;;  %8537 = vst [vmem:[#allocation22_spill] sm:$0xff] %v6544_v62  ;;  %5617 = vmatmul.msk.f32.gmra.mxu0 %vm392_vm0, %v6544_v62  ;;  %5621 = vmatmul.msk.f32.gmra.mxu2 %vm392_vm0, %v6529_v59 }
  0xb6   : > { %8536 = vst [vmem:[#allocation21_spill] sm:$0xff] %v6542_v33  ;;  %5618 = vmatmul.msk.f32.vlgmr.msra.gmra.mxu1 %vm392_vm0, %v6542_v33  ;;  %v6573_v38 = vpop.permute.xlu2 %787 }
  0xb7   : > { %8541 = vst [vmem:[#allocation26_spill] sm:$0xff] %v6573_v38 }
  0xb8   : > { %5240 = vrot.lane.b32.xlu2 %v6428_v40, %s6155_s12 }
  0xba   : > { %5480 = vrot.lane.b32.xlu0 %v349_v53, %s6155_s12 }
  0xbc   : > { %v6561_v35 = vpop.permute.xlu0 %752 }
  0xbd   : > { %v6559_v27 = vpop.permute.xlu1 %688  ;;  %8540 = vst [vmem:[#allocation25_spill] sm:$0xff] %v6561_v35  ;;  %5622 = vmatmul.msk.f32.vlgmr.msra.gmra.mxu3 %vm392_vm0, %v6561_v35  ;;  %5624 = vmatmul.msk.f32.vlgmr.msrb.gmra.mxu0 %vm392_vm0, %v6552_v58 }
  0xbe   : > { %8539 = vst [vmem:[#allocation24_spill] sm:$0xff] %v6559_v27  ;;  %5619 = vmatmul.msk.f32.gmra.mxu1 %vm392_vm0, %v6559_v27  ;;  %v6591_v36 = vpop.permute.xlu2 %884 }
  0xbf   : > { %8544 = vst [vmem:[#allocation29_spill] sm:$0xff] %v6591_v36 }
  0xc0   : > { %5312 = vrot.lane.b32.xlu2 %v6456_v47, %s6155_s12 }
  0xc4   : > { %v6578_v59 = vpop.permute.xlu0 %754 }
  0xc5   : > { %v6576_v41 = vpop.permute.xlu1 %851  ;;  %8543 = vst [vmem:[#allocation28_spill] sm:$0xff] %v6578_v59  ;;  %5623 = vmatmul.msk.f32.gmra.mxu3 %vm392_vm0, %v6578_v59  ;;  %5625 = vmatmul.msk.f32.gmra.mxu0 %vm392_vm0, %v6573_v38 }
  0xc6   : > { %8542 = vst [vmem:[#allocation27_spill] sm:$0xff] %v6576_v41  ;;  %5628 = vmatmul.msk.f32.vlgmr.msrb.gmra.mxu2 %vm392_vm0, %v6576_v41 }
  0xc8   : > { %5384 = vrot.lane.b32.xlu2 %v6492_v56, %s6155_s12 }
  0xcc   : > { %v6595_v52 = vpop.permute.xlu0 %818 }
  0xcd   : > { %v6593_v44 = vpop.permute.xlu1 %853  ;;  %8546 = vst [vmem:[#allocation31_spill] sm:$0xff] %v6595_v52  ;;  %5626 = vmatmul.msk.f32.vlgmr.msrb.gmra.mxu1 %vm392_vm0, %v6595_v52  ;;  %5630 = vmatmul.msk.f32.vlgmr.msrb.gmra.mxu3 %vm392_vm0, %v6591_v36 }
  0xce   : > { %8545 = vst [vmem:[#allocation30_spill] sm:$0xff] %v6593_v44  ;;  %5629 = vmatmul.msk.f32.gmra.mxu2 %vm392_vm0, %v6593_v44 }
  0xd0   : > { %5456 = vrot.lane.b32.xlu2 %v348_v61, %s6155_s12 }
  0xd4   : > { %v6609_v48 = vpop.permute.xlu0 %820 }
  0xd5   : > { %v6607_v40 = vpop.permute.xlu1 %886  ;;  %8548 = vst [vmem:[#allocation33_spill] sm:$0xff] %v6609_v48  ;;  %5627 = vmatmul.msk.f32.gmra.mxu1 %vm392_vm0, %v6609_v48 }
  0xd6   : > { %8547 = vst [vmem:[#allocation32_spill] sm:$0xff] %v6607_v40  ;;  %5631 = vmatmul.msk.f32.gmra.mxu3 %vm392_vm0, %v6607_v40 }
  0xf8   : > { %v513_v47 = vpop.f32.mrf.mxu3 }
  0xf9   : > { %v514_v55 = vadd.f32 %v513_v47, %v6235_v3 }
  0xfb   : > { %v921_v57 = vmax.f32 %v514_v55, 0.0 }
  0xfd   : > { %v6619_v36 = vadd.f32 1e-07, %v921_v57 }
  0xff   : > { %v1006_v48 = vsel %vm392_vm0, %v6619_v36, -inf }
 0x100   : > { %v516_v53 = vpop.f32.mrf.mxu3 }
 0x101   : > { %v517_v44 = vadd.f32 %v516_v53, %v6250_v6 }
 0x102   : > { %v414_v52 = vpop.f32.mrf.mxu0 }
 0x103   : > { %v922_v41 = vmax.f32 %v517_v44, 0.0  ;;  %v415_v56 = vadd.f32 %v414_v52, %v6226_v2 }
 0x105   : > { %v6624_v40 = vadd.f32 1e-07, %v922_v41  ;;  %v915_v47 = vmax.f32 %v415_v56, 0.0 }
 0x107   : > { %v1007_v61 = vsel %vm392_vm0, %v6624_v40, -inf  ;;  %v6630_v53 = vadd.f32 1e-07, %v915_v47 }
 0x108   : > { %v1008_v38 = vmax.f32 %v1006_v48, %v1007_v61 }
 0x109   : > { %v979_v48 = vsel %vm392_vm0, %v6630_v53, -inf }
 0x10a   : > { %v1009_v3 = vrot.slane %v1008_v38, 4  ;;  %v417_v57 = vpop.f32.mrf.mxu0 }
 0x10b   : > { %v447_v55 = vpop.f32.mrf.mxu1  ;;  %v418_v6 = vadd.f32 %v417_v57, %v6223_v1 }
 0x10c   : > { %v1010_v58 = vmax.f32 %v1008_v38, %v1009_v3  ;;  %v448_v41 = vadd.f32 %v447_v55, %v6238_v4 }
 0x10d   : > { %v916_v59 = vmax.f32 %v418_v6, 0.0 }
 0x10e   : > { %v1011_v44 = vrot.slane %v1010_v58, 2  ;;  %v917_v61 = vmax.f32 %v448_v41, 0.0 }
 0x10f   : > { %v6633_v27 = vadd.f32 1e-07, %v916_v59 }
 0x110   : > { %v1012_v35 = vmax.f32 %v1010_v58, %v1011_v44  ;;  %v480_v2 = vpop.f32.mrf.mxu2  ;;  %v6644_v62 = vadd.f32 1e-07, %v917_v61 }
 0x111   : > { %v980_v56 = vsel %vm392_vm0, %v6633_v27, -inf  ;;  %v481_v47 = vadd.f32 %v480_v2, %v6241_v5 }
 0x112   : > { %v1013_v52 = vrot.slane %v1012_v35, 1  ;;  %v981_v38 = vmax.f32 %v979_v48, %v980_v56 }
 0x113   : > { %v450_v1 = vpop.f32.mrf.mxu1  ;;  %v546_v4 = vpop.f32.mrf.mxu0  ;;  %v919_v41 = vmax.f32 %v481_v47, 0.0 }
 0x114   : > { %v1014_v3 = vmax.f32 %v1012_v35, %v1013_v52  ;;  %v451_v57 = vadd.f32 %v450_v1, %v6256_v8  ;;  %v982_v58 = vrot.slane %v981_v38, 4  ;;  %v547_v44 = vadd.f32 %v546_v4, %v6253_v7 }
 0x115   : > { %v6653_v61 = vadd.f32 1e-07, %v919_v41 }
 0x116   : > { %v1129_v59 = vsub.f32 %v6619_v36, %v1014_v3  ;;  %v1130_v55 = vsub.f32 %v6624_v40, %v1014_v3  ;;  %v918_v6 = vmax.f32 %v451_v57, 0.0  ;;  %v983_v33 = vmax.f32 %v981_v38, %v982_v58 }
 0x117   : > { %v923_v8 = vmax.f32 %v547_v44, 0.0  ;;  %v988_v3 = vsel %vm392_vm0, %v6644_v62, -inf  ;;  %v997_v41 = vsel %vm392_vm0, %v6653_v61, -inf }
 0x118   : > { %v1169_v48 = vmul.f32 1.442695, %v1130_v55  ;;  %v1167_v56 = vmul.f32 1.442695, %v1129_v59  ;;  %v984_v35 = vrot.slane %v983_v33, 2  ;;  %v483_v5 = vpop.f32.mrf.mxu2 }
 0x119   : > { %v6646_v52 = vadd.f32 1e-07, %v918_v6  ;;  %v484_v2 = vadd.f32 %v483_v5, %v6220_v0 }
 0x11a   : > { %5839 = vpow2.f32 %v1169_v48  ;;  %v985_v1 = vmax.f32 %v983_v33, %v984_v35  ;;  %v6657_v33 = vadd.f32 1e-07, %v923_v8 }
 0x11b   : > { %v989_v7 = vsel %vm392_vm0, %v6646_v52, -inf  ;;  %v579_v38 = vpop.f32.mrf.mxu1  ;;  %v920_v57 = vmax.f32 %v484_v2, 0.0  ;;  %v549_v4 = vpop.f32.mrf.mxu0  ;;  %5841 = vpow2.f32 %v1167_v56 }
 0x11c   : > { %v990_v47 = vmax.f32 %v988_v3, %v989_v7  ;;  %v580_v58 = vadd.f32 %v579_v38, %v6268_v10  ;;  %v986_v59 = vrot.slane %v985_v1, 1  ;;  %v550_v0 = vadd.f32 %v549_v4, %v6265_v9 }
 0x11d   : > { %v6659_v6 = vadd.f32 1e-07, %v920_v57  ;;  %v1015_v57 = vsel %vm392_vm0, %v6657_v33, -inf }
 0x11e   : > { %v991_v55 = vrot.slane %v990_v47, 4  ;;  %v925_v44 = vmax.f32 %v580_v58, 0.0  ;;  %v987_v48 = vmax.f32 %v985_v1, %v986_v59  ;;  %v924_v35 = vmax.f32 %v550_v0, 0.0 }
 0x11f   : > { %v998_v2 = vsel %vm392_vm0, %v6659_v6, -inf }
 0x120   : > { %v992_v5 = vmax.f32 %v990_v47, %v991_v55  ;;  %v5840_v10 = vpop.eup %5839  ;;  %v1123_v56 = vsub.f32 %v6630_v53, %v987_v48  ;;  %v1124_v9 = vsub.f32 %v6633_v27, %v987_v48  ;;  %v999_v3 = vmax.f32 %v997_v41, %v998_v2  ;;  %v612_v7 = vpop.f32.mrf.mxu2 }
 0x121   : > { %v6667_v8 = vadd.f32 1e-07, %v924_v35  ;;  %v6670_v38 = vmul.f32 %v5840_v10, %v6624_v40  ;;  %v6674_v47 = vadd.f32 1e-07, %v925_v44  ;;  %1314 = vmatpush.msra.mxu3 %v5840_v10  ;;  %v5842_v4 = vpop.eup %5841  ;;  %v613_v55 = vadd.f32 %v612_v7, %v6271_v11 }
 0x122   : > { %v993_v1 = vrot.slane %v992_v5, 2  ;;  %v1157_v58 = vmul.f32 1.442695, %v1124_v9  ;;  %v1000_v59 = vrot.slane %v999_v3, 4  ;;  %v1155_v35 = vmul.f32 1.442695, %v1123_v56 }
 0x123   : > { %v1016_v0 = vsel %vm392_vm0, %v6667_v8, -inf  ;;  %v582_v48 = vpop.f32.mrf.mxu1  ;;  %1315 = vmatpush.msra.mxu3 %v5842_v4  ;;  %v927_v49 = vmax.f32 %v613_v55, 0.0  ;;  %v1024_v11 = vsel %vm392_vm0, %v6674_v47, -inf }
 0x124   : > { %v994_v41 = vmax.f32 %v992_v5, %v993_v1  ;;  %v1017_v40 = vmax.f32 %v1015_v57, %v1016_v0  ;;  %v583_v2 = vadd.f32 %v582_v48, %v6283_v13  ;;  %v1001_v63 = vmax.f32 %v999_v3, %v1000_v59 }
 0x125   : > { %5843 = vpow2.f32 %v1157_v58  ;;  %v6686_v3 = vmul.f32 %v5842_v4, %v6619_v36  ;;  %v6691_v55 = vadd.f32 1e-07, %v927_v49 }
 0x126   : > { %v995_v44 = vrot.slane %v994_v41, 1  ;;  %v1018_v60 = vrot.slane %v1017_v40, 4  ;;  %v1002_v10 = vrot.slane %v1001_v63, 2  ;;  %v926_v9 = vmax.f32 %v583_v2, 0.0 }
 0x127   : > { %5845 = vpow2.f32 %v1155_v35  ;;  %8549 = vst [vmem:[#allocation34_spill] sm:$0xff] %v6686_v3 }
 0x128   : > { %v996_v54 = vmax.f32 %v994_v41, %v995_v44  ;;  %v1019_v50 = vmax.f32 %v1017_v40, %v1018_v60  ;;  %v1003_v56 = vmax.f32 %v1001_v63, %v1002_v10  ;;  %v6682_v5 = vadd.f32 1e-07, %v926_v9  ;;  %v615_v1 = vpop.f32.mrf.mxu2 }
 0x129   : > { %v645_v7 = vpop.f32.mrf.mxu3  ;;  %v616_v60 = vadd.f32 %v615_v1, %v6286_v14 }
 0x12a   : > { %v646_v13 = vadd.f32 %v645_v7, %v6280_v12  ;;  %v1125_v57 = vsub.f32 %v6644_v62, %v996_v54  ;;  %v1126_v58 = vsub.f32 %v6646_v52, %v996_v54  ;;  %v1020_v59 = vrot.slane %v1019_v50, 2  ;;  %v678_v35 = vpop.f32.mrf.mxu0 }
 0x12b   : > { %v1004_v0 = vrot.slane %v1003_v56, 1  ;;  %v1025_v63 = vsel %vm392_vm0, %v6682_v5, -inf  ;;  %v5844_v41 = vpop.eup %5843  ;;  %v928_v44 = vmax.f32 %v616_v60, 0.0  ;;  %v679_v7 = vadd.f32 %v678_v35, %v6301_v17 }
 0x12c   : > { %v929_v48 = vmax.f32 %v646_v13, 0.0  ;;  %v1159_v12 = vmul.f32 1.442695, %v1125_v57  ;;  %v1161_v40 = vmul.f32 1.442695, %v1126_v58  ;;  %v1021_v36 = vmax.f32 %v1019_v50, %v1020_v59  ;;  %1239 = vmatpush.msra.mxu0 %v5844_v41 }
 0x12d   : > { %v1026_v4 = vmax.f32 %v1024_v11, %v1025_v63  ;;  %v6696_v2 = vmul.f32 %v5844_v41, %v6633_v27  ;;  %v1005_v54 = vmax.f32 %v1003_v56, %v1004_v0  ;;  %v5846_v14 = vpop.eup %5845  ;;  %v6703_v50 = vadd.f32 1e-07, %v928_v44 }
 0x12e   : > { %v1022_v10 = vrot.slane %v1021_v36, 1  ;;  %v6698_v9 = vadd.f32 1e-07, %v929_v48  ;;  %5847 = vpow2.f32 %v1161_v40  ;;  %1240 = vmatpush.msra.mxu0 %v5846_v14  ;;  %v1033_v11 = vsel %vm392_vm0, %v6691_v55, -inf }
 0x12f   : > { %v1027_v49 = vrot.slane %v1026_v4, 4  ;;  %v1127_v1 = vsub.f32 %v6653_v61, %v1005_v54  ;;  %v1128_v13 = vsub.f32 %v6659_v6, %v1005_v54  ;;  %5849 = vpow2.f32 %v1159_v12 }
 0x130   : > { %8550 = vst [vmem:[#allocation35_spill] sm:$0xff] %v6698_v9  ;;  %v1023_v27 = vmax.f32 %v1021_v36, %v1022_v10  ;;  %v1034_v17 = vsel %vm392_vm0, %v6703_v50, -inf  ;;  %v744_v0 = vpop.f32.mrf.mxu2  ;;  %v1042_v40 = vsel %vm392_vm0, %v6698_v9, -inf  ;;  %v931_v36 = vmax.f32 %v679_v7, 0.0  ;;  %v6715_v10 = vpop.permute.xlu2 %1220 }
 0x131   : > { %v1028_v56 = vmax.f32 %v1026_v4, %v1027_v49  ;;  %v648_v57 = vpop.f32.mrf.mxu3  ;;  %v1163_v58 = vmul.f32 1.442695, %v1127_v1  ;;  %v1165_v59 = vmul.f32 1.442695, %v1128_v13  ;;  %v1035_v41 = vmax.f32 %v1033_v11, %v1034_v17  ;;  %5632 = vmatmul.msk.f32.vlgmr.msra.gmra.mxu0 %vm1222_vm1, %v6715_v10 }
 0x132   : > { %v649_v60 = vadd.f32 %v648_v57, %v6295_v15  ;;  %v1131_v63 = vsub.f32 %v6657_v33, %v1023_v27  ;;  %v1132_v48 = vsub.f32 %v6667_v8, %v1023_v27  ;;  %v745_v54 = vadd.f32 %v744_v0, %v6298_v16  ;;  %v681_v44 = vpop.f32.mrf.mxu0 }
 0x133   : > { %v1029_v35 = vrot.slane %v1028_v56, 2  ;;  %v711_v12 = vpop.f32.mrf.mxu1  ;;  %5851 = vpow2.f32 %v1165_v59  ;;  %v1036_v27 = vrot.slane %v1035_v41, 4  ;;  %v6725_v0 = vadd.f32 1e-07, %v931_v36 }
 0x134   : > { %v930_v4 = vmax.f32 %v649_v60, 0.0  ;;  %v1171_v15 = vmul.f32 1.442695, %v1131_v63  ;;  %v1173_v49 = vmul.f32 1.442695, %v1132_v48  ;;  %v5848_v13 = vpop.eup %5847  ;;  %5853 = vpow2.f32 %v1163_v58 }
 0x135   : > { %v1030_v1 = vmax.f32 %v1028_v56, %v1029_v35  ;;  %v935_v11 = vmax.f32 %v745_v54, 0.0  ;;  %v6719_v17 = vpop.eup %5849  ;;  %v6722_v7 = vmul.f32 %v5848_v13, %v6646_v52  ;;  %v682_v60 = vadd.f32 %v681_v44, %v6316_v20  ;;  %1264 = vmatpush.msra.mxu1 %v5848_v13 }
 0x136   : > { %v6717_v57 = vadd.f32 1e-07, %v930_v4  ;;  %5855 = vpow2.f32 %v1171_v15  ;;  %v1037_v59 = vmax.f32 %v1035_v41, %v1036_v27  ;;  %v712_v35 = vadd.f32 %v711_v12, %v6310_v18  ;;  %v6748_v27 = vpop.permute.xlu0 %1246 }
 0x137   : > { %v1031_v16 = vrot.slane %v1030_v1, 1  ;;  %5857 = vpow2.f32 %v1173_v49  ;;  %v932_v48 = vmax.f32 %v682_v60, 0.0  ;;  %1265 = vmatpush.msra.mxu1 %v6719_v17  ;;  %v6731_v4 = vadd.f32 1e-07, %v935_v11  ;;  %8553 = vst [vmem:[#allocation38_spill] sm:$0xff] %v6748_v27 }
 0x138   : > { %8551 = vst [vmem:[#allocation36_spill] sm:$0xff] %v6717_v57  ;;  %v1043_v56 = vsel %vm392_vm0, %v6717_v57, -inf  ;;  %v1038_v52 = vrot.slane %v1037_v59, 2  ;;  %v747_v54 = vpop.f32.mrf.mxu2  ;;  %v6734_v20 = vmul.f32 %v5846_v14, %v6630_v53  ;;  %v933_v53 = vmax.f32 %v712_v35, 0.0  ;;  %5633 = vmatmul.msk.f32.vlgmr.msra.gmra.mxu1 %vm1222_vm1, %v6748_v27 }
 0x139   : > { %v1032_v58 = vmax.f32 %v1030_v1, %v1031_v16  ;;  %v1044_v63 = vmax.f32 %v1042_v40, %v1043_v56  ;;  %8552 = vst [vmem:[#allocation37_spill] sm:$0xff] %v6731_v4  ;;  %v5852_v41 = vpop.eup %5851  ;;  %v6738_v40 = vadd.f32 1e-07, %v932_v48  ;;  %v748_v14 = vadd.f32 %v747_v54, %v6313_v19 }
 0x13a   : > { %v6742_v18 = vpop.eup %5853  ;;  %v6745_v12 = vmul.f32 %v5852_v41, %v6659_v6  ;;  %v1039_v1 = vmax.f32 %v1037_v59, %v1038_v52  ;;  %1289 = vmatpush.msra.mxu2 %v5852_v41  ;;  %v810_v13 = vpop.f32.mrf.mxu0  ;;  %v1051_v60 = vsel %vm392_vm0, %v6725_v0, -inf }
 0x13b   : > { %v1133_v36 = vsub.f32 %v6674_v47, %v1032_v58  ;;  %v1134_v44 = vsub.f32 %v6682_v5, %v1032_v58  ;;  %v1045_v15 = vrot.slane %v1044_v63, 4  ;;  %v714_v49 = vpop.f32.mrf.mxu1  ;;  %v1052_v58 = vsel %vm392_vm0, %v6738_v40, -inf  ;;  %v6756_v6 = vpop.permute.xlu2 %1271 }
 0x13c   : > { %v6750_v11 = vpop.eup %5855  ;;  %v1040_v48 = vrot.slane %v1039_v1, 1  ;;  %v1053_v35 = vmax.f32 %v1051_v60, %v1052_v58  ;;  %v936_v52 = vmax.f32 %v748_v14, 0.0  ;;  %1290 = vmatpush.msra.mxu2 %v6742_v18  ;;  %v715_v41 = vadd.f32 %v714_v49, %v6325_v21  ;;  %v6771_v60 = vpop.permute.xlu1 %1321 }
 0x13d   : > { %v1177_v16 = vmul.f32 1.442695, %v1134_v44  ;;  %v1046_v56 = vmax.f32 %v1044_v63, %v1045_v15  ;;  %v6760_v19 = vpop.eup %5857  ;;  %v1175_v59 = vmul.f32 1.442695, %v1133_v36  ;;  %v1069_v63 = vsel %vm392_vm0, %v6731_v4, -inf  ;;  %5634 = vmatmul.msk.f32.vlgmr.msra.gmra.mxu2 %vm1222_vm1, %v6756_v6 }
 0x13e   : > { %1339 = vmatpush.msrb.mxu0 %v6760_v19  ;;  %v1041_v44 = vmax.f32 %v1039_v1, %v1040_v48  ;;  %v1054_v15 = vrot.slane %v1053_v35, 4  ;;  %v6769_v36 = vadd.f32 1e-07, %v933_v53  ;;  %v6773_v58 = vadd.f32 1e-07, %v936_v52 }
 0x13f   : > { %v1047_v54 = vrot.slane %v1046_v56, 2  ;;  %5859 = vpow2.f32 %v1177_v16  ;;  %v934_v39 = vmax.f32 %v715_v41, 0.0  ;;  %v811_v37 = vadd.f32 %v810_v13, %v6328_v22 }
 0x140   : > { %8554 = vst [vmem:[#allocation39_spill] sm:$0xff] %v6769_v36  ;;  %1340 = vmatpush.msrb.mxu0 %v6750_v11  ;;  %5861 = vpow2.f32 %v1175_v59  ;;  %v1135_v21 = vsub.f32 %v6691_v55, %v1041_v44  ;;  %v1136_v49 = vsub.f32 %v6703_v50, %v1041_v44  ;;  %v1055_v16 = vmax.f32 %v1053_v35, %v1054_v15  ;;  %v777_v1 = vpop.f32.mrf.mxu3 }
 0x141   : > { %v1048_v14 = vmax.f32 %v1046_v56, %v1047_v54  ;;  %v1070_v53 = vsel %vm392_vm0, %v6773_v58, -inf  ;;  %v6781_v34 = vadd.f32 1e-07, %v934_v39  ;;  %v939_v56 = vmax.f32 %v811_v37, 0.0  ;;  %5636 = vmatmul.msk.f32.vlgmr.msrb.gmra.mxu0 %vm1222_vm1, %v6771_v60  ;;  %v6787_v54 = vpop.permute.xlu0 %1346 }
 0x142   : > { %v1181_v22 = vmul.f32 1.442695, %v1136_v49  ;;  %v1056_v13 = vrot.slane %v1055_v16, 2  ;;  %v1060_v59 = vsel %vm392_vm0, %v6769_v36, -inf  ;;  %v1071_v52 = vmax.f32 %v1069_v63, %v1070_v53  ;;  %8555 = vst [vmem:[#allocation40_spill] sm:$0xff] %v6787_v54  ;;  %v813_v45 = vpop.f32.mrf.mxu0 }
 0x143   : > { %v1049_v48 = vrot.slane %v1048_v14, 1  ;;  %v1179_v35 = vmul.f32 1.442695, %v1135_v21  ;;  %v1061_v44 = vsel %vm392_vm0, %v6781_v34, -inf  ;;  %v778_v39 = vadd.f32 %v777_v1, %v6331_v23  ;;  %v6792_v15 = vpop.permute.xlu2 %1296 }
 0x144   : > { %8556 = vst [vmem:[#allocation41_spill] sm:$0xff] %v6792_v15  ;;  %v1057_v46 = vmax.f32 %v1055_v16, %v1056_v13  ;;  %v1072_v49 = vrot.slane %v1071_v52, 4  ;;  %v1062_v51 = vmax.f32 %v1060_v59, %v1061_v44  ;;  %5635 = vmatmul.msk.f32.vlgmr.msra.gmra.mxu3 %vm1222_vm1, %v6792_v15  ;;  %5863 = vpow2.f32 %v1181_v22  ;;  %v6807_v15 = vpop.permute.xlu1 %1421 }
 0x145   : > { %v1050_v41 = vmax.f32 %v1048_v14, %v1049_v48  ;;  %v6794_v37 = vpop.eup %5859  ;;  %v6800_v21 = vadd.f32 1e-07, %v939_v56  ;;  %5865 = vpow2.f32 %v1179_v35  ;;  %v937_v13 = vmax.f32 %v778_v39, 0.0 }
 0x146   : > { %1364 = vmatpush.msrb.mxu1 %v6794_v37  ;;  %v6803_v23 = vpop.eup %5861  ;;  %v1058_v1 = vrot.slane %v1057_v46, 1  ;;  %v1073_v48 = vmax.f32 %v1071_v52, %v1072_v49  ;;  %v1063_v16 = vrot.slane %v1062_v51, 4  ;;  %v814_v59 = vadd.f32 %v813_v45, %v6344_v25 }
 0x147   : > { %v1137_v63 = vsub.f32 %v6698_v9, %v1050_v41  ;;  %v1138_v14 = vsub.f32 %v6717_v57, %v1050_v41  ;;  %v1087_v52 = vsel %vm392_vm0, %v6800_v21, -inf }
 0x148   : > { %1365 = vmatpush.msrb.mxu1 %v6803_v23  ;;  %v1059_v42 = vmax.f32 %v1057_v46, %v1058_v1  ;;  %v1074_v41 = vrot.slane %v1073_v48, 2  ;;  %v1064_v56 = vmax.f32 %v1062_v51, %v1063_v16  ;;  %v780_v43 = vpop.f32.mrf.mxu3  ;;  %v940_v35 = vmax.f32 %v814_v59, 0.0 }
 0x149   : > { %v1185_v53 = vmul.f32 1.442695, %v1138_v14  ;;  %v876_v22 = vpop.f32.mrf.mxu2  ;;  %v1183_v44 = vmul.f32 1.442695, %v1137_v63  ;;  %5637 = vmatmul.msk.f32.vlgmr.msrb.gmra.mxu1 %vm1222_vm1, %v6787_v54  ;;  %v781_v39 = vadd.f32 %v780_v43, %v6347_v26  ;;  %v6818_v14 = vadd.f32 1e-07, %v937_v13  ;;  %v6824_v43 = vpop.permute.xlu0 %1371 }
 0x14a   : > { %v1139_v25 = vsub.f32 %v6725_v0, %v1059_v42  ;;  %v1140_v45 = vsub.f32 %v6738_v40, %v1059_v42  ;;  %v1075_v46 = vmax.f32 %v1073_v48, %v1074_v41  ;;  %v843_v49 = vpop.f32.mrf.mxu1  ;;  %v6816_v51 = vpop.eup %5863  ;;  %v1065_v63 = vrot.slane %v1064_v56, 2  ;;  %8558 = vst [vmem:[#allocation43_spill] sm:$0xff] %v6824_v43 }
 0x14b   : > { %5867 = vpow2.f32 %v1185_v53  ;;  %8557 = vst [vmem:[#allocation42_spill] sm:$0xff] %v6818_v14  ;;  %v6820_v1 = vadd.f32 1e-07, %v940_v35  ;;  %v938_v16 = vmax.f32 %v781_v39, 0.0  ;;  %v877_v26 = vadd.f32 %v876_v22, %v6341_v24  ;;  %1389 = vmatpush.msrb.mxu2 %v6816_v51  ;;  %v6826_v42 = vpop.eup %5865 }
 0x14c   : > { %5869 = vpow2.f32 %v1183_v44  ;;  %v1189_v54 = vmul.f32 1.442695, %v1140_v45  ;;  %v1076_v59 = vrot.slane %v1075_v46, 1  ;;  %v1187_v48 = vmul.f32 1.442695, %v1139_v25  ;;  %v6847_v57 = vpop.permute.xlu1 %1446 }
 0x14d   : > { %v1066_v53 = vmax.f32 %v1064_v56, %v1065_v63  ;;  %v1088_v13 = vsel %vm392_vm0, %v6820_v1, -inf  ;;  %v6830_v41 = vadd.f32 1e-07, %v938_v16  ;;  %1390 = vmatpush.msrb.mxu2 %v6826_v42  ;;  %v1078_v24 = vsel %vm392_vm0, %v6818_v14, -inf  ;;  %8561 = vst [vmem:[#allocation46_spill] sm:$0xff] %v6847_v57 }
 0x14e   : > { %v1077_v35 = vmax.f32 %v1075_v46, %v1076_v59  ;;  %v1089_v39 = vmax.f32 %v1087_v52, %v1088_v13  ;;  %5871 = vpow2.f32 %v1189_v54  ;;  %5638 = vmatmul.msk.f32.vlgmr.msrb.gmra.mxu2 %vm1222_vm1, %v6824_v43  ;;  %v943_v59 = vmax.f32 %v877_v26, 0.0 }
 0x14f   : > { %8559 = vst [vmem:[#allocation44_spill] sm:$0xff] %v6830_v41  ;;  %v1067_v44 = vrot.slane %v1066_v53, 1  ;;  %v1079_v22 = vsel %vm392_vm0, %v6830_v41, -inf  ;;  %5873 = vpow2.f32 %v1187_v48  ;;  %v844_v13 = vadd.f32 %v843_v49, %v6373_v30 }
 0x150   : > { %v1143_v25 = vsub.f32 %v6731_v4, %v1077_v35  ;;  %v1144_v45 = vsub.f32 %v6773_v58, %v1077_v35  ;;  %v1090_v52 = vrot.slane %v1089_v39, 4  ;;  %v1080_v46 = vmax.f32 %v1078_v24, %v1079_v22  ;;  %v909_v54 = vpop.f32.mrf.mxu3 }
 0x151   : > { %v6839_v56 = vpop.eup %5867  ;;  %v879_v63 = vpop.f32.mrf.mxu2  ;;  %v1068_v16 = vmax.f32 %v1066_v53, %v1067_v44  ;;  %v910_v49 = vadd.f32 %v909_v54, %v6370_v29  ;;  %v6856_v22 = vadd.f32 1e-07, %v943_v59 }
 0x152   : > { %1414 = vmatpush.msrb.mxu3 %v6839_v56  ;;  %v6845_v9 = vpop.eup %5869  ;;  %v1197_v43 = vmul.f32 1.442695, %v1144_v45  ;;  %v1091_v3 = vmax.f32 %v1089_v39, %v1090_v52  ;;  %v1081_v27 = vrot.slane %v1080_v46, 4  ;;  %v1195_v4 = vmul.f32 1.442695, %v1143_v25  ;;  %v846_v53 = vpop.f32.mrf.mxu1 }
 0x153   : > { %8560 = vst [vmem:[#allocation45_spill] sm:$0xff] %v6845_v9  ;;  %v1141_v35 = vsub.f32 %v6769_v36, %v1068_v16  ;;  %v1142_v24 = vsub.f32 %v6781_v34, %v1068_v16  ;;  %v880_v48 = vadd.f32 %v879_v63, %v6367_v28  ;;  %v941_v25 = vmax.f32 %v844_v13, 0.0 }
 0x154   : > { %1415 = vmatpush.msrb.mxu3 %v6845_v9  ;;  %v1092_v26 = vrot.slane %v1091_v3, 2  ;;  %v1082_v30 = vmax.f32 %v1080_v46, %v1081_v27  ;;  %v6854_v44 = vpop.eup %5871  ;;  %5875 = vpow2.f32 %v1197_v43  ;;  %v945_v27 = vmax.f32 %v910_v49, 0.0 }
 0x155   : > { %v1193_v39 = vmul.f32 1.442695, %v1142_v24  ;;  %v1191_v45 = vmul.f32 1.442695, %v1141_v35  ;;  %v944_v16 = vmax.f32 %v880_v48, 0.0  ;;  %1439 = vmatpush.msra.mxu0 %v6854_v44  ;;  %v6859_v28 = vpop.eup %5873  ;;  %5877 = vpow2.f32 %v1195_v4 }
 0x156   : > { %v1093_v52 = vmax.f32 %v1091_v3, %v1092_v26  ;;  %v1083_v36 = vrot.slane %v1082_v30, 2  ;;  %v847_v29 = vadd.f32 %v846_v53, %v6385_v32  ;;  %v1105_v3 = vsel %vm392_vm0, %v6856_v22, -inf  ;;  %v6872_v32 = vpop.permute.xlu0 %1396 }
 0x157   : > { %5879 = vpow2.f32 %v1193_v39  ;;  %v6862_v43 = vadd.f32 1e-07, %v944_v16  ;;  %1440 = vmatpush.msra.mxu0 %v6859_v28  ;;  %v6867_v59 = vadd.f32 1e-07, %v941_v25  ;;  %8562 = vst [vmem:[#allocation47_spill] sm:$0xff] %v6872_v32  ;;  %5639 = vmatmul.msk.f32.vlgmr.msrb.gmra.mxu3 %vm1222_vm1, %v6872_v32 }
 0x158   : > { %v1094_v46 = vrot.slane %v1093_v52, 1  ;;  %v1084_v63 = vmax.f32 %v1082_v30, %v1083_v36  ;;  %v942_v13 = vmax.f32 %v847_v29, 0.0  ;;  %5640 = vmatmul.msk.f32.vlgmr.msra.gmra.mxu0 %vm1222_vm1, %v6807_v15  ;;  %5881 = vpow2.f32 %v1191_v45  ;;  %v6887_v45 = vpop.permute.xlu1 %1471 }
 0x159   : > { %v912_v54 = vpop.f32.mrf.mxu3  ;;  %v1106_v24 = vsel %vm392_vm0, %v6862_v43, -inf  ;;  %v6880_v30 = vadd.f32 1e-07, %v945_v27  ;;  %8563 = vst [vmem:[#allocation48_spill] sm:$0xff] %v6887_v45  ;;  %v1096_v16 = vsel %vm392_vm0, %v6867_v59, -inf }
 0x15a   : > { %v913_v35 = vadd.f32 %v912_v54, %v6382_v31  ;;  %v1095_v4 = vmax.f32 %v1093_v52, %v1094_v46  ;;  %v1085_v36 = vrot.slane %v1084_v63, 1  ;;  %v6878_v48 = vpop.eup %5875  ;;  %v1107_v26 = vmax.f32 %v1105_v3, %v1106_v24 }
 0x15b   : > { %v6882_v31 = vadd.f32 1e-07, %v942_v13  ;;  %1489 = vmatpush.msra.mxu2 %v6878_v48  ;;  %v6889_v52 = vpop.eup %5877 }
 0x15c   : > { %v946_v49 = vmax.f32 %v913_v35, 0.0  ;;  %v1147_v53 = vsub.f32 %v6800_v21, %v1095_v4  ;;  %v1148_v39 = vsub.f32 %v6820_v1, %v1095_v4  ;;  %v1086_v25 = vmax.f32 %v1084_v63, %v1085_v36  ;;  %8564 = vst [vmem:[#allocation49_spill] sm:$0xff] %v6889_v52 }
 0x15d   : > { %v1108_v29 = vrot.slane %v1107_v26, 4  ;;  %v1097_v27 = vsel %vm392_vm0, %v6882_v31, -inf  ;;  %v6897_v54 = vpop.eup %5879  ;;  %1490 = vmatpush.msra.mxu2 %v6889_v52  ;;  %v1114_v36 = vsel %vm392_vm0, %v6880_v30, -inf }
 0x15e   : > { %v6895_v46 = vadd.f32 1e-07, %v946_v49  ;;  %v1203_v3 = vmul.f32 1.442695, %v1147_v53  ;;  %v1205_v13 = vmul.f32 1.442695, %v1148_v39  ;;  %v1145_v63 = vsub.f32 %v6818_v14, %v1086_v25  ;;  %1464 = vmatpush.msra.mxu1 %v6897_v54  ;;  %5642 = vmatmul.msk.f32.vlgmr.msra.gmra.mxu2 %vm1222_vm1, %v6887_v45  ;;  %v6909_v49 = vpop.eup %5881 }
 0x15f   : > { %v1146_v35 = vsub.f32 %v6830_v41, %v1086_v25  ;;  %v1109_v4 = vmax.f32 %v1107_v26, %v1108_v29  ;;  %v1098_v24 = vmax.f32 %v1096_v16, %v1097_v27  ;;  %8565 = vst [vmem:[#allocation50_spill] sm:$0xff] %v6909_v49 }
 0x160   : > { %v1115_v32 = vsel %vm392_vm0, %v6895_v46, -inf  ;;  %5883 = vpow2.f32 %v1205_v13  ;;  %v1199_v25 = vmul.f32 1.442695, %v1145_v63  ;;  %1465 = vmatpush.msra.mxu1 %v6909_v49 }
 0x161   : > { %v1201_v53 = vmul.f32 1.442695, %v1146_v35  ;;  %v1116_v39 = vmax.f32 %v1114_v36, %v1115_v32  ;;  %v1110_v14 = vrot.slane %v1109_v4, 2  ;;  %v1099_v26 = vrot.slane %v1098_v24, 4  ;;  %5641 = vmatmul.msk.f32.vlgmr.msra.gmra.mxu1 %vm1222_vm1, %v6847_v57 }
 0x162   : > { %5885 = vpow2.f32 %v1203_v3  ;;  %v6916_v3 = vpop.permute.xlu2 %1521 }
 0x163   : > { %v1117_v16 = vrot.slane %v1116_v39, 4  ;;  %5887 = vpow2.f32 %v1201_v53  ;;  %v1111_v29 = vmax.f32 %v1109_v4, %v1110_v14  ;;  %v1100_v27 = vmax.f32 %v1098_v24, %v1099_v26 }
 0x164   : > { %5889 = vpow2.f32 %v1199_v25 }
 0x165   : > { %v1118_v41 = vmax.f32 %v1116_v39, %v1117_v16  ;;  %v1112_v45 = vrot.slane %v1111_v29, 1  ;;  %v1101_v9 = vrot.slane %v1100_v27, 2  ;;  %v1629_v16 = vmul.f32 %v6760_v19, %v6667_v8 }
 0x166   : > { %v5884_v32 = vpop.eup %5883  ;;  %v1637_v19 = vmul.f32 %v6854_v44, %v6738_v40 }
 0x167   : > { %v1119_v35 = vrot.slane %v1118_v41, 2  ;;  %v1113_v13 = vmax.f32 %v1111_v29, %v1112_v45  ;;  %v1102_v63 = vmax.f32 %v1100_v27, %v1101_v9  ;;  %1539 = vmatpush.msrb.mxu0 %v5884_v32  ;;  %v6924_v45 = vpop.permute.xlu0 %1496 }
 0x168   : > { %v6914_v36 = vpop.eup %5885 }
 0x169   : > { %v1120_v52 = vmax.f32 %v1118_v41, %v1119_v35  ;;  %v6918_v49 = vpop.eup %5887  ;;  %v1151_v53 = vsub.f32 %v6856_v22, %v1113_v13  ;;  %v1152_v14 = vsub.f32 %v6862_v43, %v1113_v13  ;;  %v1103_v4 = vrot.slane %v1102_v63, 1  ;;  %1540 = vmatpush.msrb.mxu0 %v6914_v36 }
 0x16a   : > { %1514 = vmatpush.msra.mxu3 %v6918_v49  ;;  %v6926_v9 = vpop.eup %5889  ;;  %5644 = vmatmul.msk.f32.vlgmr.msrb.gmra.mxu0 %vm1222_vm1, %v6916_v3 }
 0x16b   : > { %v1121_v24 = vrot.slane %v1120_v52, 1  ;;  %v1213_v41 = vmul.f32 1.442695, %v1152_v14  ;;  %v1104_v39 = vmax.f32 %v1102_v63, %v1103_v4  ;;  %v1211_v25 = vmul.f32 1.442695, %v1151_v53  ;;  %1666 = vmatpush.msra.mxu0 %v6696_v2 }
 0x16c   : > { %1515 = vmatpush.msra.mxu3 %v6926_v9  ;;  %v1628_v2 = vmul.f32 %v6750_v11, %v6657_v33  ;;  %v6949_v33 = vpop.permute.xlu1 %1571  ;;  %v6951_v11 = vpop.permute.xlu2 %1546 }
 0x16d   : > { %v1122_v26 = vmax.f32 %v1120_v52, %v1121_v24  ;;  %v1149_v29 = vsub.f32 %v6867_v59, %v1104_v39  ;;  %v1150_v27 = vsub.f32 %v6882_v31, %v1104_v39  ;;  %5643 = vmatmul.msk.f32.vlgmr.msra.gmra.mxu3 %vm1222_vm1, %v6924_v45  ;;  %5891 = vpow2.f32 %v1213_v41  ;;  %1667 = vmatpush.msra.mxu0 %v6734_v20 }
 0x16e   : > { %5893 = vpow2.f32 %v1211_v25  ;;  %v1636_v20 = vmul.f32 %v6859_v28, %v6725_v0  ;;  %v1624_v0 = vmul.f32 %v6742_v18, %v6653_v61  ;;  %v1645_v24 = vmul.f32 %v5884_v32, %v6820_v1  ;;  %v8570_v1 = vld [vmem:[#allocation34_spill] sm:$0xff]  ;;  %v8576_v25 = vld [vmem:[#allocation43_spill] sm:$0xff] }
 0x16f   : > { %v1154_v35 = vsub.f32 %v6895_v46, %v1122_v26  ;;  %v1209_v52 = vmul.f32 1.442695, %v1150_v27  ;;  %1746 = vmatpush.msrb.mxu0 %v1629_v16  ;;  %v1207_v13 = vmul.f32 1.442695, %v1149_v29  ;;  %v1153_v63 = vsub.f32 %v6880_v30, %v1122_v26  ;;  %v8577_v26 = vld [vmem:[#allocation41_spill] sm:$0xff]  ;;  %v8578_v29 = vld [vmem:[#allocation42_spill] sm:$0xff] }
 0x170   : > { %v1633_v41 = vmul.f32 %v6816_v51, %v6703_v50  ;;  %v1622_v61 = vmul.f32 %v6719_v17, %v6644_v62  ;;  %v1644_v18 = vmul.f32 %v6914_v36, %v6800_v21  ;;  %v1632_v50 = vmul.f32 %v6826_v42, %v6691_v55  ;;  %v8566_v55 = vld [vmem:[#allocation36_spill] sm:$0xff]  ;;  %v8569_v21 = vld [vmem:[#allocation49_spill] sm:$0xff]  ;;  %v8571_v42 = vld [vmem:[#allocation39_spill] sm:$0xff] }
 0x171   : > { %v1217_v8 = vmul.f32 1.442695, %v1154_v35  ;;  %1747 = vmatpush.msrb.mxu0 %v1628_v2  ;;  %5895 = vpow2.f32 %v1209_v52  ;;  %v1215_v40 = vmul.f32 1.442695, %v1153_v63  ;;  %v1630_v62 = vmul.f32 %v6803_v23, %v6674_v47  ;;  %v8575_v36 = vld [vmem:[#allocation44_spill] sm:$0xff] }
 0x172   : > { %5648 = vmatmul.msk.f32.vlgmr.msra.gmra.mxu0 %vm1222_vm1, %v6715_v10  ;;  %5897 = vpow2.f32 %v1207_v13  ;;  %v1641_v17 = vmul.f32 %v6878_v48, %v6773_v58  ;;  %v1635_v47 = vmul.f32 %v6839_v56, %v8566_v55  ;;  %v8568_v58 = vld [vmem:[#allocation37_spill] sm:$0xff]  ;;  %v1643_v39 = vmul.f32 %v6918_v49, %v8575_v36  ;;  %v8579_v35 = vld [vmem:[#allocation40_spill] sm:$0xff] }
 0x173   : > { %v5892_v53 = vpop.eup %5891  ;;  %1826 = vmatpush.msra.mxu0 %v1637_v19  ;;  %5899 = vpow2.f32 %v1217_v8  ;;  %v1640_v23 = vmul.f32 %v8569_v21, %v8568_v58  ;;  %v1642_v27 = vmul.f32 %v6926_v9, %v8578_v29  ;;  %v8580_v52 = vld [vmem:[#allocation48_spill] sm:$0xff]  ;;  %v8581_v9 = vld [vmem:[#allocation47_spill] sm:$0xff] }
 0x174   : > { %1589 = vmatpush.msrb.mxu2 %v5892_v53  ;;  %v6953_v14 = vpop.eup %5893  ;;  %5901 = vpow2.f32 %v1215_v40  ;;  %v6977_v51 = vpop.permute.xlu2 %1596  ;;  %v1649_v32 = vmul.f32 %v5892_v53, %v6862_v43 }
 0x175   : > { %1827 = vmatpush.msra.mxu0 %v1636_v20  ;;  %v1648_v43 = vmul.f32 %v6953_v14, %v6856_v22 }
 0x176   : > { %1590 = vmatpush.msrb.mxu2 %v6953_v14 }
 0x177   : > { %v5896_v44 = vpop.eup %5895  ;;  %5646 = vmatmul.msk.f32.vlgmr.msrb.gmra.mxu2 %vm1222_vm1, %v6949_v33 }
 0x178   : > { %1564 = vmatpush.msrb.mxu1 %v5896_v44  ;;  %1706 = vmatpush.msra.mxu2 %v6745_v12  ;;  %v5898_v28 = vpop.eup %5897  ;;  %v1631_v12 = vmul.f32 %v6794_v37, %v6682_v5  ;;  %v1639_v5 = vmul.f32 %v6897_v54, %v6781_v34  ;;  %v8567_v37 = vld [vmem:[#allocation38_spill] sm:$0xff]  ;;  %v8574_v54 = vld [vmem:[#allocation45_spill] sm:$0xff]  ;;  %v1647_v16 = vmul.f32 %v5896_v44, %v6882_v31 }
 0x179   : > { %v5900_v4 = vpop.eup %5899  ;;  %v8572_v34 = vld [vmem:[#allocation50_spill] sm:$0xff]  ;;  %v1646_v49 = vmul.f32 %v5898_v28, %v6867_v59 }
 0x17a   : > { %1565 = vmatpush.msrb.mxu1 %v5898_v28  ;;  %1707 = vmatpush.msra.mxu2 %v1624_v0  ;;  %v1638_v48 = vmul.f32 %v8572_v34, %v8571_v42  ;;  %v1651_v31 = vmul.f32 %v5900_v4, %v6895_v46  ;;  %v383_v59 = vld [vmem:[%s8416_s2] sm:$0xff] }
 0x17b   : > { %5645 = vmatmul.msk.f32.vlgmr.msrb.gmra.mxu1 %vm1222_vm1, %v6951_v11  ;;  %5652 = vmatmul.msk.f32.vlgmr.msrb.gmra.mxu0 %vm1222_vm1, %v6771_v60 }
 0x17c   : > { %1686 = vmatpush.msra.mxu1 %v6722_v7  ;;  %1906 = vmatpush.msrb.mxu0 %v1645_v24  ;;  %v5902_v7 = vpop.eup %5901 }
 0x17d   : > { %1786 = vmatpush.msrb.mxu2 %v1633_v41  ;;  %1614 = vmatpush.msrb.mxu3 %v5900_v4  ;;  %v1650_v2 = vmul.f32 %v5902_v7, %v6880_v30  ;;  %v6097_v41 = vld [vmem:[%s6354_s16] sm:$0xff] }
 0x17e   : > { %1687 = vmatpush.msra.mxu1 %v1622_v61  ;;  %1907 = vmatpush.msrb.mxu0 %v1644_v18 }
 0x17f   : > { %1787 = vmatpush.msrb.mxu2 %v1632_v50  ;;  %1615 = vmatpush.msrb.mxu3 %v5902_v7 }
 0x180   : > { %1766 = vmatpush.msrb.mxu1 %v1631_v12  ;;  %5650 = vmatmul.msk.f32.vlgmr.msra.gmra.mxu2 %vm1222_vm1, %v6756_v6 }
 0x181   : > { %5647 = vmatmul.msk.f32.vlgmr.msrb.gmra.mxu3 %vm1222_vm1, %v6977_v51  ;;  %1866 = vmatpush.msra.mxu2 %v1641_v17 }
 0x182   : > { %1767 = vmatpush.msrb.mxu1 %v1630_v62  ;;  %1726 = vmatpush.msra.mxu3 %v6670_v38  ;;  %v8573_v38 = vld [vmem:[#allocation35_spill] sm:$0xff] }
 0x183   : > { %5649 = vmatmul.msk.f32.vlgmr.msra.gmra.mxu1 %vm1222_vm1, %v8567_v37  ;;  %5656 = vmatmul.msk.f32.vlgmr.msra.gmra.mxu0 %vm1222_vm1, %v6807_v15  ;;  %v1634_v56 = vmul.f32 %v8574_v54, %v8573_v38 }
 0x184   : > { %1727 = vmatpush.msra.mxu3 %v8570_v1  ;;  %1846 = vmatpush.msra.mxu1 %v1639_v5 }
 0x185   : > { %1867 = vmatpush.msra.mxu2 %v1640_v23  ;;  %2099 = vmatpush.msra.mxu0 %v383_v59 }
 0x186   : > { %1806 = vmatpush.msrb.mxu3 %v1635_v47  ;;  %1847 = vmatpush.msra.mxu1 %v1638_v48  ;;  %v6098_v47 = vld [vmem:[%s6354_s16 + $0x8] sm:$0xff]  ;;  %v6099_v48 = vld [vmem:[%s6354_s16 + $0x10] sm:$0xff] }
 0x188   : > { %1807 = vmatpush.msrb.mxu3 %v1634_v56  ;;  %5654 = vmatmul.msk.f32.vlgmr.msrb.gmra.mxu2 %vm1222_vm1, %v8576_v25 }
 0x189   : > { %5651 = vmatmul.msk.f32.vlgmr.msra.gmra.mxu3 %vm1222_vm1, %v8577_v26  ;;  %1946 = vmatpush.msrb.mxu2 %v1649_v32 }
 0x18a   : > { %1886 = vmatpush.msra.mxu3 %v1643_v39  ;;  %v6100_v39 = vld [vmem:[%s6354_s16 + $0x18] sm:$0xff] }
 0x18b   : > { %5653 = vmatmul.msk.f32.vlgmr.msrb.gmra.mxu1 %vm1222_vm1, %v8579_v35  ;;  %5660 = vmatmul.msk.f32.vlgmr.msrb.gmra.mxu0 %vm1222_vm1, %v6916_v3 }
 0x18c   : > { %1887 = vmatpush.msra.mxu3 %v1642_v27  ;;  %1926 = vmatpush.msrb.mxu1 %v1647_v16 }
 0x18d   : > { %1947 = vmatpush.msrb.mxu2 %v1648_v43 }
 0x18e   : > { %1927 = vmatpush.msrb.mxu1 %v1646_v49 }
 0x190   : > { %5658 = vmatmul.msk.f32.vlgmr.msra.gmra.mxu2 %vm1222_vm1, %v8580_v52 }
 0x191   : > { %5655 = vmatmul.msk.f32.vlgmr.msrb.gmra.mxu3 %vm1222_vm1, %v8581_v9 }
 0x192   : > { %1966 = vmatpush.msrb.mxu3 %v1651_v31  ;;  %v6101_v31 = vld [vmem:[%s6354_s16 + $0x20] sm:$0xff] }
 0x193   : > { %5657 = vmatmul.msk.f32.vlgmr.msra.gmra.mxu1 %vm1222_vm1, %v6847_v57 }
 0x194   : > { %1967 = vmatpush.msrb.mxu3 %v1650_v2 }
 0x198   : > { %5662 = vmatmul.msk.f32.vlgmr.msrb.gmra.mxu2 %vm1222_vm1, %v6949_v33 }
 0x199   : > { %5659 = vmatmul.msk.f32.vlgmr.msra.gmra.mxu3 %vm1222_vm1, %v6924_v45 }
 0x19b   : > { %5661 = vmatmul.msk.f32.vlgmr.msrb.gmra.mxu1 %vm1222_vm1, %v6951_v11 }
 0x1a1   : > { %5663 = vmatmul.msk.f32.vlgmr.msrb.gmra.mxu3 %vm1222_vm1, %v6977_v51 }
 0x1ae   : > { %v1242_v22 = vpop.f32.mrf.mxu0 }
 0x1af   : > { %v1972_v19 = vmax.f32 %v1242_v22, 1e-12 }
 0x1b1   : > { %5903 = vrcp.f32 %v1972_v19 }
 0x1b5   : > { %v1267_v46 = vpop.f32.mrf.mxu1 }
 0x1b6   : > { %v1973_v18 = vmax.f32 %v1267_v46, 1e-12 }
 0x1b7   : > { %v5904_v40 = vpop.eup %5903 }
 0x1b8   : > { %5905 = vrcp.f32 %v1973_v18 }
 0x1be   : > { %v1342_v30 = vpop.f32.mrf.mxu0  ;;  %v5906_v17 = vpop.eup %5905 }
 0x1bf   : > { %v1976_v54 = vmax.f32 %v1342_v30, 1e-12 }
 0x1c0   : > { %v1292_v13 = vpop.f32.mrf.mxu2 }
 0x1c1   : > { %v1974_v62 = vmax.f32 %v1292_v13, 1e-12  ;;  %v6102_v13 = vld [vmem:[%s6354_s16 + $0x28] sm:$0xff] }
 0x1c3   : > { %5907 = vrcp.f32 %v1974_v62 }
 0x1c6   : > { %v1367_v53 = vpop.f32.mrf.mxu1 }
 0x1c7   : > { %v1317_v63 = vpop.f32.mrf.mxu3  ;;  %v1977_v29 = vmax.f32 %v1367_v53, 1e-12 }
 0x1c8   : > { %v1975_v21 = vmax.f32 %v1317_v63, 1e-12 }
 0x1c9   : > { %v5908_v42 = vpop.eup %5907 }
 0x1ca   : > { %5909 = vrcp.f32 %v1975_v21  ;;  %v6105_v21 = vld [vmem:[%s6354_s16 + $0x40] sm:$0xff] }
 0x1cb   : > { %5911 = vrcp.f32 %v1976_v54 }
 0x1cc   : > { %5913 = vrcp.f32 %v1977_v29 }
 0x1d0   : > { %v5910_v32 = vpop.eup %5909 }
 0x1d1   : > { %v1392_v20 = vpop.f32.mrf.mxu2  ;;  %v5912_v43 = vpop.eup %5911 }
 0x1d2   : > { %v1978_v22 = vmax.f32 %v1392_v20, 1e-12  ;;  %v5914_v30 = vpop.eup %5913 }
 0x1d4   : > { %5915 = vrcp.f32 %v1978_v22 }
 0x1d5   : > { %v7039_v8 = vpop.f32.mrf.mxu0 }
 0x1d6   : > { %v1980_v20 = vmax.f32 %v7039_v8, 1e-12 }
 0x1da   : > { %v1417_v0 = vpop.f32.mrf.mxu3 }
 0x1db   : > { %v1979_v63 = vmax.f32 %v1417_v0, 1e-12 }
 0x1dd   : > { %5917 = vrcp.f32 %v1979_v63 }
 0x1de   : > { %v7043_v28 = vpop.f32.mrf.mxu1  ;;  %5919 = vrcp.f32 %v1980_v20 }
 0x1e1   : > { %v7045_v24 = vpop.f32.mrf.mxu2 }
 0x1e7   : > { %v7041_v14 = vpop.f32.mrf.mxu0 }
 0x1ef   : > { %v1669_v44 = vpop.f32.mrf.mxu0 }
 0x1f0   : > { %v2004_v4 = vmul.f32 %v5904_v40, %v1669_v44  ;;  %v7051_v50 = vpop.f32.mrf.mxu3  ;;  %v5916_v40 = vpop.eup %5915 }
 0x1f1   : > { %v5918_v18 = vpop.eup %5917  ;;  %v1983_v54 = vmax.f32 %v7051_v50, 1e-12 }
 0x1f2   : > { %v2020_v61 = vadd.f32 %v6097_v41, %v2004_v4  ;;  %v6103_v4 = vld [vmem:[%s6354_s16 + $0x30] sm:$0xff] }
 0x1f4   : > { %5664 = vmatmul.msk.f32.vlgmr.msra.gmra.mxu0 %vm392_vm0, %v2020_v61 }
 0x1f8   : > { %v7049_v12 = vpop.f32.mrf.mxu1  ;;  %v1749_v27 = vpop.f32.mrf.mxu0 }
 0x1f9   : > { %v2008_v49 = vmul.f32 %v5912_v43, %v1749_v27 }
 0x1fa   : > { %v7053_v7 = vpop.f32.mrf.mxu2 }
 0x1fb   : > { %v2024_v2 = vadd.f32 %v6101_v31, %v2008_v49  ;;  %v6108_v49 = vld [vmem:[%s6354_s16 + $0x58] sm:$0xff]  ;;  %v1985_v31 = vmax.f32 %v7049_v12, 1e-12  ;;  %v6157_v12 = vmov 8.0  }
 0x200   : > { %v1689_v5 = vpop.f32.mrf.mxu1 }
 0x201   : > { %v2005_v55 = vmul.f32 %v5906_v17, %v1689_v5  ;;  %v6104_v17 = vld [vmem:[%s6354_s16 + $0x38] sm:$0xff]  ;;  %v1981_v5 = vmax.f32 %v7043_v28, 1e-12 }
 0x203   : > { %v2021_v58 = vadd.f32 %v6098_v47, %v2005_v55  ;;  %v1709_v1 = vpop.f32.mrf.mxu2  ;;  %v1829_v55 = vpop.f32.mrf.mxu0  ;;  %5921 = vrcp.f32 %v1981_v5 }
 0x204   : > { %v7056_v23 = vpop.f32.mrf.mxu3  ;;  %v2006_v34 = vmul.f32 %v5908_v42, %v1709_v1  ;;  %v5920_v47 = vpop.eup %5919  ;;  %v1982_v1 = vmax.f32 %v7045_v24, 1e-12 }
 0x205   : > { %5665 = vmatmul.msk.f32.gmra.mxu0 %vm392_vm0, %v2021_v58  ;;  %v2012_v58 = vmul.f32 %v5920_v47, %v1829_v55 }
 0x206   : > { %v2022_v38 = vadd.f32 %v6099_v48, %v2006_v34  ;;  %5923 = vrcp.f32 %v1982_v1 }
 0x207   : > { %v2028_v8 = vadd.f32 %v6105_v21, %v2012_v58  ;;  %5925 = vrcp.f32 %v1983_v54  ;;  %v6112_v58 = vld [vmem:[%s6354_s16 + $0x78] sm:$0xff] }
 0x208   : > { %v1769_v59 = vpop.f32.mrf.mxu1 }
 0x209   : > { %v2009_v46 = vmul.f32 %v5914_v30, %v1769_v59  ;;  %v5922_v34 = vpop.eup %5921  ;;  %v6109_v30 = vld [vmem:[%s6354_s16 + $0x60] sm:$0xff] }
 0x20b   : > { %v2025_v19 = vadd.f32 %v6102_v13, %v2009_v46  ;;  %v1789_v53 = vpop.f32.mrf.mxu2 }
 0x20c   : > { %v1729_v56 = vpop.f32.mrf.mxu3  ;;  %v2010_v44 = vmul.f32 %v5916_v40, %v1789_v53  ;;  %v6110_v53 = vld [vmem:[%s6354_s16 + $0x68] sm:$0xff] }
 0x20d   : > { %5666 = vmatmul.msk.f32.gmra.mxu0 %vm392_vm0, %v2022_v38  ;;  %v2007_v36 = vmul.f32 %v5910_v32, %v1729_v56  ;;  %v6106_v38 = vld [vmem:[%s6354_s16 + $0x48] sm:$0xff]  ;;  %v5924_v32 = vpop.eup %5923 }
 0x20e   : > { %v2026_v41 = vadd.f32 %v6103_v4, %v2010_v44  ;;  %v5926_v27 = vpop.eup %5925  ;;  %v1987_v44 = vmax.f32 %v7056_v23, 1e-12 }
 0x20f   : > { %v2023_v16 = vadd.f32 %v6100_v39, %v2007_v36  ;;  %v6107_v39 = vld [vmem:[%s6354_s16 + $0x50] sm:$0xff] }
 0x210   : > { %v1849_v42 = vpop.f32.mrf.mxu1 }
 0x211   : > { %v2013_v48 = vmul.f32 %v5922_v34, %v1849_v42 }
 0x213   : > { %v2029_v28 = vadd.f32 %v6106_v38, %v2013_v48  ;;  %v1869_v56 = vpop.f32.mrf.mxu2 }
 0x214   : > { %v1809_v61 = vpop.f32.mrf.mxu3  ;;  %v2014_v36 = vmul.f32 %v5924_v32, %v1869_v56 }
 0x215   : > { %5667 = vmatmul.msk.f32.gmra.mxu0 %vm392_vm0, %v2023_v16  ;;  %v2011_v62 = vmul.f32 %v5918_v18, %v1809_v61  ;;  %v1984_v16 = vmax.f32 %v7041_v14, 1e-12  ;;  %v1986_v14 = vmax.f32 %v7053_v7, 1e-12  ;;  %v6111_v61 = vld [vmem:[%s6354_s16 + $0x70] sm:$0xff] }
 0x216   : > { %v2030_v24 = vadd.f32 %v6107_v39, %v2014_v36 }
 0x217   : > { %v2027_v0 = vadd.f32 %v6104_v17, %v2011_v62  ;;  %5927 = vrcp.f32 %v1984_v16 }
 0x218   : > { %5929 = vrcp.f32 %v1985_v31  ;;  %v1929_v13 = vpop.f32.mrf.mxu1 }
 0x219   : > { %5931 = vrcp.f32 %v1986_v14 }
 0x21a   : > { %5933 = vrcp.f32 %v6157_v12 }
 0x21b   : > { %v1949_v4 = vpop.f32.mrf.mxu2  ;;  %5935 = vrcp.f32 %v1987_v44 }
 0x21c   : > { %v1889_v29 = vpop.f32.mrf.mxu3 }
 0x21d   : > { %5668 = vmatmul.msk.f32.gmra.mxu0 %vm392_vm0, %v2024_v2  ;;  %v2015_v43 = vmul.f32 %v5926_v27, %v1889_v29  ;;  %v1909_v2 = vpop.f32.mrf.mxu0  ;;  %v5928_v22 = vpop.eup %5927 }
 0x21e   : > { %v2016_v59 = vmul.f32 %v5928_v22, %v1909_v2 }
 0x21f   : > { %v2031_v50 = vadd.f32 %v6108_v49, %v2015_v43 }
 0x220   : > { %v2032_v46 = vadd.f32 %v6109_v30, %v2016_v59 }
 0x224   : > { %v1969_v62 = vpop.f32.mrf.mxu3 }
 0x225   : > { %5669 = vmatmul.msk.f32.gmra.mxu0 %vm392_vm0, %v2025_v19  ;;  %v5930_v19 = vpop.eup %5929 }
 0x226   : > { %v2017_v63 = vmul.f32 %v5930_v19, %v1929_v13 }
 0x228   : > { %v2033_v40 = vadd.f32 %v6110_v53, %v2017_v63 }
 0x22d   : > { %5670 = vmatmul.msk.f32.gmra.mxu0 %vm392_vm0, %v2026_v41  ;;  %v5932_v41 = vpop.eup %5931 }
 0x22e   : > { %v2018_v20 = vmul.f32 %v5932_v41, %v1949_v4  ;;  %v5934_v7 = vpop.eup %5933 }
 0x22f   : > { %v2262_v17 = vmul.f32 8.0, %v5934_v7  ;;  %vm2266_vm2 = vweird.f32 %v5934_v7 }
 0x230   : > { %v2034_v18 = vadd.f32 %v6111_v61, %v2018_v20 }
 0x231   : > { %v2263_v55 = vsub.f32 1.0, %v2262_v17 }
 0x233   : > { %v2264_v1 = vmul.f32 %v5934_v7, %v2263_v55 }
 0x235   : > { %5671 = vmatmul.msk.f32.gmra.mxu0 %vm392_vm0, %v2027_v0  ;;  %v5936_v0 = vpop.eup %5935  ;;  %v2265_v48 = vadd.f32 %v5934_v7, %v2264_v1 }
 0x236   : > { %v2019_v5 = vmul.f32 %v5936_v0, %v1969_v62 }
 0x237   : > { %v7096_v54 = vsel %vm2266_vm2, %v5934_v7, %v2265_v48 }
 0x238   : > { %v2035_v21 = vadd.f32 %v6112_v58, %v2019_v5  ;;  %8582 = vst [vmem:[#allocation36_spill] sm:$0xff] %v7096_v54 }
 0x23d   : > { %5672 = vmatmul.msk.f32.gmra.mxu0 %vm392_vm0, %v2028_v8 }
 0x245   : > { %5673 = vmatmul.msk.f32.gmra.mxu0 %vm392_vm0, %v2029_v28 }
 0x24d   : > { %5674 = vmatmul.msk.f32.gmra.mxu0 %vm392_vm0, %v2030_v24 }
 0x255   : > { %5675 = vmatmul.msk.f32.gmra.mxu0 %vm392_vm0, %v2031_v50 }
 0x25d   : > { %5676 = vmatmul.msk.f32.gmra.mxu0 %vm392_vm0, %v2032_v46 }
 0x265   : > { %5677 = vmatmul.msk.f32.gmra.mxu0 %vm392_vm0, %v2033_v40 }
 0x26d   : > { %5678 = vmatmul.msk.f32.gmra.mxu0 %vm392_vm0, %v2034_v18 }
 0x271   : > { %v2101_v47 = vpop.f32.mrf.mxu0 }
 0x272   : > { %v2149_v23 = vsel %vm1222_vm1, %v2101_v47, 0.0 }
 0x273   : > { %v2150_v8 = vrot.slane %v2149_v23, 4 }
 0x275   : > { %v2151_v42 = vadd.f32 %v2150_v8, %v2149_v23  ;;  %5679 = vmatmul.msk.f32.gmra.mxu0 %vm392_vm0, %v2035_v21 }
 0x277   : > { %v2152_v34 = vrot.slane %v2151_v42, 2 }
 0x279   : > { %v2153_v38 = vadd.f32 %v2152_v34, %v2151_v42 }
 0x27b   : > { %v2154_v28 = vrot.slane %v2153_v38, 1 }
 0x27d   : > { %v2155_v56 = vadd.f32 %v2154_v28, %v2153_v38 }
 0x27f   : > { %v2268_v32 = vmul.f32 %v7096_v54, %v2155_v56 }
 0x281   : > { %v7099_v36 = vsub.f32 %v2101_v47, %v2268_v32 }
 0x282   : > { %v2104_v24 = vpop.f32.mrf.mxu0 }
 0x283   : > { %v2300_v39 = vmul.f32 %v7099_v36, %v7099_v36  ;;  %v2156_v16 = vsel %vm1222_vm1, %v2104_v24, 0.0 }
 0x284   : > { %v2157_v27 = vrot.slane %v2156_v16, 4 }
 0x285   : > { %v2316_v29 = vsel %vm1222_vm1, %v2300_v39, 0.0 }
 0x286   : > { %v2317_v43 = vrot.slane %v2316_v29, 4  ;;  %v2158_v49 = vadd.f32 %v2157_v27, %v2156_v16 }
 0x288   : > { %v2318_v50 = vadd.f32 %v2317_v43, %v2316_v29  ;;  %v2159_v31 = vrot.slane %v2158_v49, 2 }
 0x28a   : > { %v2319_v2 = vrot.slane %v2318_v50, 2  ;;  %v2160_v22 = vadd.f32 %v2159_v31, %v2158_v49  ;;  %v2107_v59 = vpop.f32.mrf.mxu0 }
 0x28b   : > { %v2163_v46 = vsel %vm1222_vm1, %v2107_v59, 0.0 }
 0x28c   : > { %v2320_v30 = vadd.f32 %v2319_v2, %v2318_v50  ;;  %v2161_v14 = vrot.slane %v2160_v22, 1  ;;  %v2164_v13 = vrot.slane %v2163_v46, 4 }
 0x28e   : > { %v2321_v19 = vrot.slane %v2320_v30, 1  ;;  %v2162_v63 = vadd.f32 %v2161_v14, %v2160_v22  ;;  %v2165_v53 = vadd.f32 %v2164_v13, %v2163_v46  ;;  %v7125_v14 = vld [vmem:[%s8421_s7] sm:$0xff] }
 0x290   : > { %v2322_v40 = vadd.f32 %v2321_v19, %v2320_v30  ;;  %v2269_v12 = vmul.f32 %v7096_v54, %v2162_v63  ;;  %v2166_v44 = vrot.slane %v2165_v53, 2 }
 0x292   : > { %v2428_v4 = vmul.f32 %v2322_v40, %v7096_v54  ;;  %v7108_v41 = vsub.f32 %v2104_v24, %v2269_v12  ;;  %v2167_v20 = vadd.f32 %v2166_v44, %v2165_v53  ;;  %v2110_v7 = vpop.f32.mrf.mxu0 }
 0x293   : > { %v2170_v18 = vsel %vm1222_vm1, %v2110_v7, 0.0 }
 0x294   : > { %v2444_v61 = vadd.f32 1e-05, %v2428_v4  ;;  %v2301_v62 = vmul.f32 %v7108_v41, %v7108_v41  ;;  %v2168_v17 = vrot.slane %v2167_v20, 1  ;;  %v2171_v0 = vrot.slane %v2170_v18, 4 }
 0x296   : > { %5937 = vrsqrt.f32 %v2444_v61  ;;  %v2323_v5 = vsel %vm1222_vm1, %v2301_v62, 0.0  ;;  %v2169_v55 = vadd.f32 %v2168_v17, %v2167_v20  ;;  %v2172_v47 = vadd.f32 %v2171_v0, %v2170_v18 }
 0x297   : > { %v2324_v23 = vrot.slane %v2323_v5, 4  ;;  %vm2466_vm4 = vweird.f32 %v2444_v61  ;;  %v7134_v62 = vperm.slane %v7125_v14, 0 }
 0x298   : > { %v2270_v58 = vmul.f32 %v7096_v54, %v2169_v55  ;;  %v2173_v21 = vrot.slane %v2172_v47, 2 }
 0x299   : > { %v2325_v8 = vadd.f32 %v2324_v23, %v2323_v5 }
 0x29a   : > { %v7115_v1 = vsub.f32 %v2107_v59, %v2270_v58  ;;  %v2174_v42 = vadd.f32 %v2173_v21, %v2172_v47  ;;  %v2113_v34 = vpop.f32.mrf.mxu0 }
 0x29b   : > { %v2326_v38 = vrot.slane %v2325_v8, 2  ;;  %v2177_v28 = vsel %vm1222_vm1, %v2113_v34, 0.0 }
 0x29c   : > { %v5938_v48 = vpop.eup %5937  ;;  %v2302_v32 = vmul.f32 %v7115_v1, %v7115_v1  ;;  %v2175_v39 = vrot.slane %v2174_v42, 1  ;;  %v2178_v16 = vrot.slane %v2177_v28, 4 }
 0x29d   : > { %v2461_v56 = vmul.f32 %v5938_v48, %v2444_v61  ;;  %v2327_v24 = vadd.f32 %v2326_v38, %v2325_v8  ;;  %vm2467_vm3 = vweird.f32 %v5938_v48  ;;  %v7141_v61 = vperm.slane %v7125_v14, 1 }
 0x29e   : > { %v2330_v27 = vsel %vm1222_vm1, %v2302_v32, 0.0  ;;  %v2176_v43 = vadd.f32 %v2175_v39, %v2174_v42  ;;  %v2179_v31 = vadd.f32 %v2178_v16, %v2177_v28  ;;  %vm2468_vm5 = vmor %vm2466_vm4, %vm2467_vm3 }
 0x29f   : > { %v2462_v29 = vmul.f32 %v5938_v48, %v2461_v56  ;;  %v2328_v49 = vrot.slane %v2327_v24, 1  ;;  %v2331_v50 = vrot.slane %v2330_v27, 4 }
 0x2a0   : > { %v2271_v22 = vmul.f32 %v7096_v54, %v2176_v43  ;;  %v2180_v46 = vrot.slane %v2179_v31, 2 }
 0x2a1   : > { %v2463_v2 = vmul.f32 0.5, %v2462_v29  ;;  %v2329_v59 = vadd.f32 %v2328_v49, %v2327_v24  ;;  %v2332_v30 = vadd.f32 %v2331_v50, %v2330_v27 }
 0x2a2   : > { %v7127_v19 = vsub.f32 %v2110_v7, %v2271_v22  ;;  %v2116_v63 = vpop.f32.mrf.mxu0  ;;  %v2181_v12 = vadd.f32 %v2180_v46, %v2179_v31  ;;  %v385_v22 = vld [vmem:[%s8417_s3 + $0x8] sm:$0xff] }
 0x2a3   : > { %v2464_v13 = vsub.f32 1.5, %v2463_v2  ;;  %v2429_v53 = vmul.f32 %v2329_v59, %v7096_v54  ;;  %v2333_v40 = vrot.slane %v2332_v30, 2  ;;  %v2184_v44 = vsel %vm1222_vm1, %v2116_v63, 0.0  ;;  %2749 = vmatpush.msra.mxu1 %v385_v22 }
 0x2a4   : > { %v2303_v20 = vmul.f32 %v7127_v19, %v7127_v19  ;;  %v2185_v18 = vrot.slane %v2184_v44, 4  ;;  %v2182_v0 = vrot.slane %v2181_v12, 1 }
 0x2a5   : > { %v2465_v4 = vmul.f32 %v5938_v48, %v2464_v13  ;;  %v7136_v17 = vadd.f32 1e-05, %v2429_v53  ;;  %v2334_v7 = vadd.f32 %v2333_v40, %v2332_v30  ;;  %v384_v53 = vld [vmem:[%s8417_s3] sm:$0xff] }
 0x2a6   : > { %v2337_v55 = vsel %vm1222_vm1, %v2303_v20, 0.0  ;;  %v2186_v47 = vadd.f32 %v2185_v18, %v2184_v44  ;;  %v2183_v8 = vadd.f32 %v2182_v0, %v2181_v12  ;;  %2750 = vmatpush.msra.mxu1 %v384_v53 }
 0x2a7   : > { %v2469_v5 = vsel %vm2468_vm5, %v5938_v48, %v2465_v4  ;;  %5939 = vrsqrt.f32 %v7136_v17  ;;  %v2335_v58 = vrot.slane %v2334_v7, 1  ;;  %v2338_v21 = vrot.slane %v2337_v55, 4 }
 0x2a8   : > { %v2620_v23 = vmul.f32 %v2469_v5, %v7099_v36  ;;  %v2187_v42 = vrot.slane %v2186_v47, 2  ;;  %v2272_v48 = vmul.f32 %v7096_v54, %v2183_v8  ;;  %vm2476_vm7 = vweird.f32 %v7136_v17 }
 0x2a9   : > { %v2336_v28 = vadd.f32 %v2335_v58, %v2334_v7  ;;  %v2339_v56 = vadd.f32 %v2338_v21, %v2337_v55 }
 0x2aa   : > { %v2637_v38 = vmul.f32 %v7134_v62, %v2620_v23  ;;  %v2188_v32 = vadd.f32 %v2187_v42, %v2186_v47  ;;  %v7146_v39 = vpop.f32.mrf.mxu0  ;;  %v7152_v27 = vsub.f32 %v2113_v34, %v2272_v48 }
 0x2ab   : > { %v2430_v24 = vmul.f32 %v2336_v28, %v7096_v54  ;;  %v2191_v16 = vsel %vm1222_vm1, %v7146_v39, 0.0  ;;  %v2340_v29 = vrot.slane %v2339_v56, 2 }
 0x2ac   : > { %v2654_v36 = vadd.f32 %v7141_v61, %v2637_v38  ;;  %v2189_v43 = vrot.slane %v2188_v32, 1  ;;  %v2192_v49 = vrot.slane %v2191_v16, 4  ;;  %v2304_v46 = vmul.f32 %v7152_v27, %v7152_v27 }
 0x2ad   : > { %v5940_v50 = vpop.eup %5939  ;;  %v7154_v2 = vadd.f32 1e-05, %v2430_v24  ;;  %v2341_v30 = vadd.f32 %v2340_v29, %v2339_v56 }
 0x2ae   : > { %v2670_v31 = vmax.f32 %v2654_v36, 0.0  ;;  %v2471_v59 = vmul.f32 %v5940_v50, %v7136_v17  ;;  %v2190_v34 = vadd.f32 %v2189_v43, %v2188_v32  ;;  %v2193_v13 = vadd.f32 %v2192_v49, %v2191_v16 }
 0x2af   : > { %5941 = vrsqrt.f32 %v7154_v2  ;;  %v2342_v12 = vrot.slane %v2341_v30, 1  ;;  %v2344_v44 = vsel %vm1222_vm1, %v2304_v46, 0.0  ;;  %vm2477_vm6 = vweird.f32 %v5940_v50 }
 0x2b0   : > { %v2472_v40 = vmul.f32 %v5940_v50, %v2471_v59  ;;  %v2345_v4 = vrot.slane %v2344_v44, 4  ;;  %v2273_v20 = vmul.f32 %v7096_v54, %v2190_v34  ;;  %v2194_v18 = vrot.slane %v2193_v13, 2  ;;  %5680 = vmatmul.msk.f32.vlgmr.msra.gmra.mxu1 %vm1222_vm1, %v2670_v31  ;;  %vm2478_vm8 = vmor %vm2476_vm7, %vm2477_vm6 }
 0x2b1   : > { %v2343_v0 = vadd.f32 %v2342_v12, %v2341_v30  ;;  %vm2486_vm10 = vweird.f32 %v7154_v2 }
 0x2b2   : > { %v2473_v7 = vmul.f32 0.5, %v2472_v40  ;;  %v7169_v5 = vpop.f32.mrf.mxu0  ;;  %v2346_v55 = vadd.f32 %v2345_v4, %v2344_v44  ;;  %v7171_v47 = vsub.f32 %v2116_v63, %v2273_v20  ;;  %v2195_v23 = vadd.f32 %v2194_v18, %v2193_v13 }
 0x2b3   : > { %v2198_v58 = vsel %vm1222_vm1, %v7169_v5, 0.0  ;;  %v2431_v8 = vmul.f32 %v2343_v0, %v7096_v54 }
 0x2b4   : > { %v2474_v21 = vsub.f32 1.5, %v2473_v7  ;;  %v2199_v42 = vrot.slane %v2198_v58, 4  ;;  %v2347_v28 = vrot.slane %v2346_v55, 2  ;;  %v2305_v56 = vmul.f32 %v7171_v47, %v7171_v47 }
 0x2b5   : > { %v5942_v38 = vpop.eup %5941  ;;  %v2196_v48 = vrot.slane %v2195_v23, 1  ;;  %v7180_v36 = vadd.f32 1e-05, %v2431_v8 }
 0x2b6   : > { %v2475_v32 = vmul.f32 %v5940_v50, %v2474_v21  ;;  %v2481_v63 = vmul.f32 %v5942_v38, %v7154_v2  ;;  %v2348_v24 = vadd.f32 %v2347_v28, %v2346_v55  ;;  %v2351_v16 = vsel %vm1222_vm1, %v2305_v56, 0.0 }
 0x2b7   : > { %v2197_v29 = vadd.f32 %v2196_v48, %v2195_v23  ;;  %v2200_v43 = vadd.f32 %v2199_v42, %v2198_v58  ;;  %5943 = vrsqrt.f32 %v7180_v36  ;;  %v2352_v30 = vrot.slane %v2351_v16, 4 }
 0x2b8   : > { %v2479_v49 = vsel %vm2478_vm8, %v5940_v50, %v2475_v32  ;;  %v2482_v31 = vmul.f32 %v5942_v38, %v2481_v63  ;;  %v2349_v59 = vrot.slane %v2348_v24, 1  ;;  %vm2487_vm9 = vweird.f32 %v5942_v38 }
 0x2b9   : > { %v2621_v22 = vmul.f32 %v2479_v49, %v7108_v41  ;;  %v2274_v17 = vmul.f32 %v7096_v54, %v2197_v29  ;;  %v2201_v34 = vrot.slane %v2200_v43, 2  ;;  %v2353_v40 = vadd.f32 %v2352_v30, %v2351_v16  ;;  %vm2488_vm11 = vmor %vm2486_vm10, %vm2487_vm9 }
 0x2ba   : > { %v2483_v46 = vmul.f32 0.5, %v2482_v31  ;;  %v7186_v13 = vpop.f32.mrf.mxu0  ;;  %v2350_v53 = vadd.f32 %v2349_v59, %v2348_v24  ;;  %vm2496_vm13 = vweird.f32 %v7180_v36 }
 0x2bb   : > { %v7189_v12 = vsub.f32 %v7146_v39, %v2274_v17  ;;  %v2205_v50 = vsel %vm1222_vm1, %v7186_v13, 0.0  ;;  %v2202_v4 = vadd.f32 %v2201_v34, %v2200_v43  ;;  %v2638_v20 = vmul.f32 %v7134_v62, %v2621_v22 }
 0x2bc   : > { %v2484_v44 = vsub.f32 1.5, %v2483_v46  ;;  %v2206_v41 = vrot.slane %v2205_v50, 4  ;;  %v2432_v18 = vmul.f32 %v2350_v53, %v7096_v54  ;;  %v2354_v7 = vrot.slane %v2353_v40, 2 }
 0x2bd   : > { %v2306_v0 = vmul.f32 %v7189_v12, %v7189_v12  ;;  %v5944_v55 = vpop.eup %5943  ;;  %v2203_v39 = vrot.slane %v2202_v4, 1  ;;  %v2655_v28 = vadd.f32 %v7141_v61, %v2638_v20 }
 0x2be   : > { %v2485_v23 = vmul.f32 %v5942_v38, %v2484_v44  ;;  %v2207_v58 = vadd.f32 %v2206_v41, %v2205_v50  ;;  %v2491_v21 = vmul.f32 %v5944_v55, %v7180_v36  ;;  %v7200_v8 = vadd.f32 1e-05, %v2432_v18 }
 0x2bf   : > { %v2355_v42 = vadd.f32 %v2354_v7, %v2353_v40  ;;  %v2358_v48 = vsel %vm1222_vm1, %v2306_v0, 0.0  ;;  %v2204_v32 = vadd.f32 %v2203_v39, %v2202_v4  ;;  %v2671_v59 = vmax.f32 %v2655_v28, 0.0 }
 0x2c0   : > { %v2489_v56 = vsel %vm2488_vm11, %v5942_v38, %v2485_v23  ;;  %v2208_v63 = vrot.slane %v2207_v58, 2  ;;  %v2492_v16 = vmul.f32 %v5944_v55, %v2491_v21  ;;  %5945 = vrsqrt.f32 %v7200_v8 }
 0x2c1   : > { %v2622_v24 = vmul.f32 %v2489_v56, %v7115_v1  ;;  %v2356_v2 = vrot.slane %v2355_v42, 1  ;;  %v2359_v29 = vrot.slane %v2358_v48, 4  ;;  %v2275_v43 = vmul.f32 %v7096_v54, %v2204_v32  ;;  %5681 = vmatmul.msk.f32.gmra.mxu1 %vm1222_vm1, %v2671_v59 }
 0x2c2   : > { %v2209_v49 = vadd.f32 %v2208_v63, %v2207_v58  ;;  %v7207_v31 = vpop.f32.mrf.mxu0  ;;  %v2493_v22 = vmul.f32 0.5, %v2492_v16  ;;  %vm2497_vm12 = vweird.f32 %v5944_v55  ;;  %vm2506_vm2 = vweird.f32 %v7200_v8 }
 0x2c3   : > { %v2212_v38 = vsel %vm1222_vm1, %v7207_v31, 0.0  ;;  %v2639_v30 = vmul.f32 %v7134_v62, %v2622_v24  ;;  %v2357_v17 = vadd.f32 %v2356_v2, %v2355_v42  ;;  %v2360_v46 = vadd.f32 %v2359_v29, %v2358_v48  ;;  %vm2498_vm14 = vmor %vm2496_vm13, %vm2497_vm12 }
 0x2c4   : > { %v7213_v1 = vsub.f32 %v7169_v5, %v2275_v43  ;;  %v2210_v34 = vrot.slane %v2209_v49, 1  ;;  %v2494_v53 = vsub.f32 1.5, %v2493_v22  ;;  %v2213_v40 = vrot.slane %v2212_v38, 4 }
 0x2c5   : > { %v2656_v50 = vadd.f32 %v7141_v61, %v2639_v30  ;;  %v2433_v44 = vmul.f32 %v2357_v17, %v7096_v54  ;;  %v2361_v4 = vrot.slane %v2360_v46, 2 }
 0x2c6   : > { %v2307_v41 = vmul.f32 %v7213_v1, %v7213_v1  ;;  %v2211_v20 = vadd.f32 %v2210_v34, %v2209_v49  ;;  %v5946_v18 = vpop.eup %5945  ;;  %v2495_v7 = vmul.f32 %v5944_v55, %v2494_v53  ;;  %v2214_v5 = vadd.f32 %v2213_v40, %v2212_v38 }
 0x2c7   : > { %v2501_v0 = vmul.f32 %v5946_v18, %v7200_v8  ;;  %v7222_v23 = vadd.f32 1e-05, %v2433_v44  ;;  %v2362_v39 = vadd.f32 %v2361_v4, %v2360_v46  ;;  %v2672_v58 = vmax.f32 %v2656_v50, 0.0 }
 0x2c8   : > { %v2499_v21 = vsel %vm2498_vm14, %v5944_v55, %v2495_v7  ;;  %v2365_v42 = vsel %vm1222_vm1, %v2307_v41, 0.0  ;;  %v2276_v28 = vmul.f32 %v7096_v54, %v2211_v20  ;;  %v2215_v56 = vrot.slane %v2214_v5, 2 }
 0x2c9   : > { %v2623_v48 = vmul.f32 %v2499_v21, %v7127_v19  ;;  %v2502_v32 = vmul.f32 %v5946_v18, %v2501_v0  ;;  %5947 = vrsqrt.f32 %v7222_v23  ;;  %v2363_v63 = vrot.slane %v2362_v39, 1  ;;  %5682 = vmatmul.msk.f32.gmra.mxu1 %vm1222_vm1, %v2672_v58 }
 0x2ca   : > { %v7228_v36 = vpop.f32.mrf.mxu0  ;;  %v2366_v24 = vrot.slane %v2365_v42, 4  ;;  %v7231_v16 = vsub.f32 %v7186_v13, %v2276_v28  ;;  %v2216_v2 = vadd.f32 %v2215_v56, %v2214_v5  ;;  %vm2507_vm15 = vweird.f32 %v5946_v18 }
 0x2cb   : > { %v2503_v29 = vmul.f32 0.5, %v2502_v32  ;;  %v2219_v55 = vsel %vm1222_vm1, %v7228_v36, 0.0  ;;  %v2640_v43 = vmul.f32 %v7134_v62, %v2623_v48  ;;  %v2364_v49 = vadd.f32 %v2363_v63, %v2362_v39  ;;  %vm2508_vm3 = vmor %vm2506_vm2, %vm2507_vm15 }
 0x2cc   : > { %v2367_v22 = vadd.f32 %v2366_v24, %v2365_v42  ;;  %v2308_v19 = vmul.f32 %v7231_v16, %v7231_v16  ;;  %v2217_v59 = vrot.slane %v2216_v2, 1  ;;  %v2220_v30 = vrot.slane %v2219_v55, 4 }
 0x2cd   : > { %v2504_v38 = vsub.f32 1.5, %v2503_v29  ;;  %v2657_v13 = vadd.f32 %v7141_v61, %v2640_v43  ;;  %v2434_v17 = vmul.f32 %v2364_v49, %v7096_v54  ;;  %vm2516_vm4 = vweird.f32 %v7222_v23 }
 0x2ce   : > { %v2368_v46 = vrot.slane %v2367_v22, 2  ;;  %v2372_v34 = vsel %vm1222_vm1, %v2308_v19, 0.0  ;;  %v2218_v53 = vadd.f32 %v2217_v59, %v2216_v2  ;;  %v2221_v4 = vadd.f32 %v2220_v30, %v2219_v55 }
 0x2cf   : > { %v5948_v40 = vpop.eup %5947  ;;  %v2505_v50 = vmul.f32 %v5946_v18, %v2504_v38  ;;  %v2373_v44 = vrot.slane %v2372_v34, 4  ;;  %v7244_v20 = vadd.f32 1e-05, %v2434_v17  ;;  %v2673_v5 = vmax.f32 %v2657_v13, 0.0 }
 0x2d0   : > { %v2511_v41 = vmul.f32 %v5948_v40, %v7222_v23  ;;  %v2369_v7 = vadd.f32 %v2368_v46, %v2367_v22  ;;  %v2277_v58 = vmul.f32 %v7096_v54, %v2218_v53  ;;  %v2222_v21 = vrot.slane %v2221_v4, 2 }
 0x2d1   : > { %v2509_v0 = vsel %vm2508_vm3, %v5946_v18, %v2505_v50  ;;  %v2374_v39 = vadd.f32 %v2373_v44, %v2372_v34  ;;  %5949 = vrsqrt.f32 %v7244_v20  ;;  %5683 = vmatmul.msk.f32.gmra.mxu1 %vm1222_vm1, %v2673_v5  ;;  %vm2517_vm5 = vweird.f32 %v5948_v40 }
 0x2d2   : > { %v7247_v42 = vpop.f32.mrf.mxu0  ;;  %v2624_v28 = vmul.f32 %v2509_v0, %v7152_v27  ;;  %v2512_v56 = vmul.f32 %v5948_v40, %v2511_v41  ;;  %v2370_v8 = vrot.slane %v2369_v7, 1  ;;  %v7252_v32 = vsub.f32 %v7207_v31, %v2277_v58  ;;  %vm2518_vm6 = vmor %vm2516_vm4, %vm2517_vm5 }
 0x2d3   : > { %v2375_v48 = vrot.slane %v2374_v39, 2  ;;  %v2223_v63 = vadd.f32 %v2222_v21, %v2221_v4  ;;  %v2226_v18 = vsel %vm1222_vm1, %v7247_v42, 0.0  ;;  %vm2526_vm8 = vweird.f32 %v7244_v20 }
 0x2d4   : > { %v2513_v24 = vmul.f32 0.5, %v2512_v56  ;;  %v2641_v2 = vmul.f32 %v7134_v62, %v2624_v28  ;;  %v2371_v27 = vadd.f32 %v2370_v8, %v2369_v7  ;;  %v2309_v55 = vmul.f32 %v7252_v32, %v7252_v32 }
 0x2d5   : > { %v2376_v29 = vadd.f32 %v2375_v48, %v2374_v39  ;;  %v2224_v43 = vrot.slane %v2223_v63, 1  ;;  %v2227_v31 = vrot.slane %v2226_v18, 4 }
 0x2d6   : > { %v2514_v49 = vsub.f32 1.5, %v2513_v24  ;;  %v2658_v22 = vadd.f32 %v7141_v61, %v2641_v2  ;;  %v2435_v19 = vmul.f32 %v2371_v27, %v7096_v54  ;;  %v2379_v38 = vsel %vm1222_vm1, %v2309_v55, 0.0 }
 0x2d7   : > { %v2377_v59 = vrot.slane %v2376_v29, 1  ;;  %v2225_v30 = vadd.f32 %v2224_v43, %v2223_v63  ;;  %v5950_v13 = vpop.eup %5949  ;;  %v2380_v46 = vrot.slane %v2379_v38, 4  ;;  %v2228_v34 = vadd.f32 %v2227_v31, %v2226_v18 }
 0x2d8   : > { %v2515_v17 = vmul.f32 %v5948_v40, %v2514_v49  ;;  %v2674_v53 = vmax.f32 %v2658_v22, 0.0  ;;  %v2521_v50 = vmul.f32 %v5950_v13, %v7244_v20  ;;  %v7267_v44 = vadd.f32 1e-05, %v2435_v19 }
 0x2d9   : > { %v2378_v4 = vadd.f32 %v2377_v59, %v2376_v29  ;;  %v2381_v5 = vadd.f32 %v2380_v46, %v2379_v38  ;;  %v2278_v0 = vmul.f32 %v7096_v54, %v2225_v30  ;;  %v2229_v39 = vrot.slane %v2228_v34, 2 }
 0x2da   : > { %v7269_v41 = vpop.f32.mrf.mxu0  ;;  %v2519_v7 = vsel %vm2518_vm6, %v5948_v40, %v2515_v17  ;;  %v2522_v21 = vmul.f32 %v5950_v13, %v2521_v50  ;;  %5951 = vrsqrt.f32 %v7267_v44  ;;  %5684 = vmatmul.msk.f32.gmra.mxu1 %vm1222_vm1, %v2674_v53  ;;  %vm2527_vm7 = vweird.f32 %v5950_v13 }
 0x2db   : > { %v2625_v58 = vmul.f32 %v2519_v7, %v7171_v47  ;;  %v2436_v23 = vmul.f32 %v2378_v4, %v7096_v54  ;;  %v2382_v28 = vrot.slane %v2381_v5, 2  ;;  %v7276_v56 = vsub.f32 %v7228_v36, %v2278_v0  ;;  %vm2528_vm9 = vmor %vm2526_vm8, %vm2527_vm7 }
 0x2dc   : > { %v2230_v8 = vadd.f32 %v2229_v39, %v2228_v34  ;;  %v2523_v48 = vmul.f32 0.5, %v2522_v21  ;;  %v2233_v40 = vsel %vm1222_vm1, %v7269_v41, 0.0  ;;  %vm2536_vm10 = vweird.f32 %v7267_v44 }
 0x2dd   : > { %v2642_v63 = vmul.f32 %v7134_v62, %v2625_v58  ;;  %v7282_v24 = vadd.f32 1e-05, %v2436_v23  ;;  %v2383_v47 = vadd.f32 %v2382_v28, %v2381_v5  ;;  %v2310_v18 = vmul.f32 %v7276_v56, %v7276_v56 }
 0x2de   : > { %v2231_v2 = vrot.slane %v2230_v8, 1  ;;  %v2524_v27 = vsub.f32 1.5, %v2523_v48  ;;  %v2234_v36 = vrot.slane %v2233_v40, 4 }
 0x2df   : > { %v2659_v29 = vadd.f32 %v7141_v61, %v2642_v63  ;;  %5953 = vrsqrt.f32 %v7282_v24  ;;  %v2384_v55 = vrot.slane %v2383_v47, 1  ;;  %v2386_v43 = vsel %vm1222_vm1, %v2310_v18, 0.0 }
 0x2e0   : > { %v7290_v49 = vpop.eup %5951  ;;  %v2525_v31 = vmul.f32 %v5950_v13, %v2524_v27  ;;  %v2387_v22 = vrot.slane %v2386_v43, 4  ;;  %v2232_v19 = vadd.f32 %v2231_v2, %v2230_v8  ;;  %v2235_v59 = vadd.f32 %v2234_v36, %v2233_v40 }
 0x2e1   : > { %v2531_v30 = vmul.f32 %v7290_v49, %v7267_v44  ;;  %v2385_v17 = vadd.f32 %v2384_v55, %v2383_v47  ;;  %v2675_v46 = vmax.f32 %v2659_v29, 0.0  ;;  %vm2537_vm11 = vweird.f32 %v7290_v49 }
 0x2e2   : > { %v7292_v38 = vpop.f32.mrf.mxu0  ;;  %v2529_v20 = vsel %vm2528_vm9, %v5950_v13, %v2525_v31  ;;  %v2388_v34 = vadd.f32 %v2387_v22, %v2386_v43  ;;  %v2279_v53 = vmul.f32 %v7096_v54, %v2232_v19  ;;  %v2236_v50 = vrot.slane %v2235_v59, 2  ;;  %vm7322_vm12 = vmor %vm2536_vm10, %vm2537_vm11 }
 0x2e3   : > { %v2626_v4 = vmul.f32 %v2529_v20, %v7189_v12  ;;  %v2532_v7 = vmul.f32 %v7290_v49, %v2531_v30  ;;  %v2437_v5 = vmul.f32 %v2385_v17, %v7096_v54  ;;  %5685 = vmatmul.msk.f32.gmra.mxu1 %vm1222_vm1, %v2675_v46  ;;  %v2240_v0 = vsel %vm1222_vm1, %v7292_v38, 0.0 }
 0x2e4   : > { %v2389_v39 = vrot.slane %v2388_v34, 2  ;;  %v7304_v58 = vsub.f32 %v7247_v42, %v2279_v53  ;;  %v2237_v13 = vadd.f32 %v2236_v50, %v2235_v59  ;;  %v2241_v21 = vrot.slane %v2240_v0, 4 }
 0x2e5   : > { %v5954_v23 = vpop.eup %5953  ;;  %v2533_v28 = vmul.f32 0.5, %v2532_v7  ;;  %v7306_v8 = vadd.f32 1e-05, %v2437_v5  ;;  %v2643_v12 = vmul.f32 %v7134_v62, %v2626_v4  ;;  %vm2546_vm14 = vweird.f32 %v7282_v24 }
 0x2e6   : > { %v2541_v48 = vmul.f32 %v5954_v23, %v7282_v24  ;;  %v2390_v40 = vadd.f32 %v2389_v39, %v2388_v34  ;;  %v2311_v63 = vmul.f32 %v7304_v58, %v7304_v58  ;;  %v2238_v42 = vrot.slane %v2237_v13, 1 }
 0x2e7   : > { %v2534_v47 = vsub.f32 1.5, %v2533_v28  ;;  %5955 = vrsqrt.f32 %v7306_v8  ;;  %v2242_v36 = vadd.f32 %v2241_v21, %v2240_v0  ;;  %v2660_v22 = vadd.f32 %v7141_v61, %v2643_v12 }
 0x2e8   : > { %v2542_v18 = vmul.f32 %v5954_v23, %v2541_v48  ;;  %v2391_v2 = vrot.slane %v2390_v40, 1  ;;  %v2393_v27 = vsel %vm1222_vm1, %v2311_v63, 0.0  ;;  %v2239_v31 = vadd.f32 %v2238_v42, %v2237_v13 }
 0x2e9   : > { %v2535_v55 = vmul.f32 %v7290_v49, %v2534_v47  ;;  %v2394_v43 = vrot.slane %v2393_v27, 4  ;;  %v2243_v17 = vrot.slane %v2242_v36, 2  ;;  %v2676_v50 = vmax.f32 %v2660_v22, 0.0 }
 0x2ea   : > { %v7316_v29 = vpop.f32.mrf.mxu0  ;;  %v2543_v59 = vmul.f32 0.5, %v2542_v18  ;;  %v2392_v30 = vadd.f32 %v2391_v2, %v2390_v40  ;;  %v2280_v53 = vmul.f32 %v7096_v54, %v2239_v31  ;;  %vm2547_vm13 = vweird.f32 %v5954_v23 }
 0x2eb   : > { %v2247_v46 = vsel %vm1222_vm1, %v7316_v29, 0.0  ;;  %v2539_v20 = vsel %vm7322_vm12, %v7290_v49, %v2535_v55  ;;  %v2395_v34 = vadd.f32 %v2394_v43, %v2393_v27  ;;  %v2244_v7 = vadd.f32 %v2243_v17, %v2242_v36  ;;  %5686 = vmatmul.msk.f32.gmra.mxu1 %vm1222_vm1, %v2676_v50  ;;  %vm2548_vm15 = vmor %vm2546_vm14, %vm2547_vm13 }
 0x2ec   : > { %v2544_v4 = vsub.f32 1.5, %v2543_v59  ;;  %v2438_v44 = vmul.f32 %v2392_v30, %v7096_v54  ;;  %v7335_v39 = vsub.f32 %v7269_v41, %v2280_v53  ;;  %v2248_v13 = vrot.slane %v2247_v46, 4 }
 0x2ed   : > { %v5956_v5 = vpop.eup %5955  ;;  %v2396_v0 = vrot.slane %v2395_v34, 2  ;;  %v2627_v49 = vmul.f32 %v2539_v20, %v7213_v1  ;;  %v2245_v24 = vrot.slane %v2244_v7, 1  ;;  %vm2556_vm3 = vweird.f32 %v7306_v8 }
 0x2ee   : > { %v2545_v21 = vmul.f32 %v5954_v23, %v2544_v4  ;;  %v2551_v28 = vmul.f32 %v5956_v5, %v7306_v8  ;;  %v7340_v12 = vadd.f32 1e-05, %v2438_v44  ;;  %v2312_v40 = vmul.f32 %v7335_v39, %v7335_v39 }
 0x2ef   : > { %v2397_v48 = vadd.f32 %v2396_v0, %v2395_v34  ;;  %v2249_v63 = vadd.f32 %v2248_v13, %v2247_v46  ;;  %vm2557_vm2 = vweird.f32 %v5956_v5  ;;  %v2246_v27 = vadd.f32 %v2245_v24, %v2244_v7 }
 0x2f0   : > { %v2549_v47 = vsel %vm2548_vm15, %v5954_v23, %v2545_v21  ;;  %v2552_v41 = vmul.f32 %v5956_v5, %v2551_v28  ;;  %5957 = vrsqrt.f32 %v7340_v12  ;;  %v2400_v2 = vsel %vm1222_vm1, %v2312_v40, 0.0  ;;  %vm2558_vm4 = vmor %vm2556_vm3, %vm2557_vm2 }
 0x2f1   : > { %v2628_v1 = vmul.f32 %v2549_v47, %v7231_v16  ;;  %v2398_v18 = vrot.slane %v2397_v48, 1  ;;  %v2401_v55 = vrot.slane %v2400_v2, 4  ;;  %v2250_v43 = vrot.slane %v2249_v63, 2 }
 0x2f2   : > { %v7345_v42 = vpop.f32.mrf.mxu0  ;;  %v2553_v36 = vmul.f32 0.5, %v2552_v41  ;;  %v2644_v31 = vmul.f32 %v7134_v62, %v2627_v49  ;;  %v2281_v19 = vmul.f32 %v7096_v54, %v2246_v27  ;;  %vm2566_vm6 = vweird.f32 %v7340_v12 }
 0x2f3   : > { %v2645_v22 = vmul.f32 %v7134_v62, %v2628_v1  ;;  %v2399_v23 = vadd.f32 %v2398_v18, %v2397_v48  ;;  %v2254_v59 = vsel %vm1222_vm1, %v7345_v42, 0.0  ;;  %v2402_v17 = vadd.f32 %v2401_v55, %v2400_v2 }
 0x2f4   : > { %v2554_v30 = vsub.f32 1.5, %v2553_v36  ;;  %v2251_v16 = vadd.f32 %v2250_v43, %v2249_v63  ;;  %v2661_v46 = vadd.f32 %v7141_v61, %v2644_v31  ;;  %v7358_v34 = vsub.f32 %v7292_v38, %v2281_v19 }
 0x2f5   : > { %v2439_v20 = vmul.f32 %v2399_v23, %v7096_v54  ;;  %v2255_v53 = vrot.slane %v2254_v59, 4  ;;  %v2403_v44 = vrot.slane %v2402_v17, 2  ;;  %v2662_v21 = vadd.f32 %v7141_v61, %v2645_v22 }
 0x2f6   : > { %v5958_v50 = vpop.eup %5957  ;;  %v2555_v4 = vmul.f32 %v5956_v5, %v2554_v30  ;;  %v2252_v7 = vrot.slane %v2251_v16, 1  ;;  %v2677_v0 = vmax.f32 %v2661_v46, 0.0  ;;  %v2313_v8 = vmul.f32 %v7358_v34, %v7358_v34 }
 0x2f7   : > { %v2561_v13 = vmul.f32 %v5958_v50, %v7340_v12  ;;  %v7362_v49 = vadd.f32 1e-05, %v2439_v20  ;;  %v2404_v38 = vadd.f32 %v2403_v44, %v2402_v17  ;;  %v2256_v40 = vadd.f32 %v2255_v53, %v2254_v59 }
 0x2f8   : > { %v2559_v28 = vsel %vm2558_vm4, %v5956_v5, %v2555_v4  ;;  %v2253_v48 = vadd.f32 %v2252_v7, %v2251_v16  ;;  %5687 = vmatmul.msk.f32.gmra.mxu1 %vm1222_vm1, %v2677_v0  ;;  %v2407_v41 = vsel %vm1222_vm1, %v2313_v8, 0.0  ;;  %v2678_v31 = vmax.f32 %v2662_v21, 0.0 }
 0x2f9   : > { %v2629_v24 = vmul.f32 %v2559_v28, %v7252_v32  ;;  %v2562_v63 = vmul.f32 %v5958_v50, %v2561_v13  ;;  %5959 = vrsqrt.f32 %v7362_v49  ;;  %v2405_v47 = vrot.slane %v2404_v38, 1 }
 0x2fa   : > { %v2282_v1 = vmul.f32 %v7096_v54, %v2253_v48  ;;  %v2257_v18 = vrot.slane %v2256_v40, 2  ;;  %v2408_v5 = vrot.slane %v2407_v41, 4  ;;  %vm2567_vm5 = vweird.f32 %v5958_v50 }
 0x2fb   : > { %v2646_v2 = vmul.f32 %v7134_v62, %v2629_v24  ;;  %v2563_v27 = vmul.f32 0.5, %v2562_v63  ;;  %v2406_v36 = vadd.f32 %v2405_v47, %v2404_v38  ;;  %vm2568_vm7 = vmor %vm2566_vm6, %vm2567_vm5  ;;  %vm2576_vm9 = vweird.f32 %v7362_v49 }
 0x2fc   : > { %v7374_v55 = vsub.f32 %v7316_v29, %v2282_v1  ;;  %v2258_v43 = vadd.f32 %v2257_v18, %v2256_v40  ;;  %v2409_v22 = vadd.f32 %v2408_v5, %v2407_v41 }
 0x2fd   : > { %v2564_v32 = vsub.f32 1.5, %v2563_v27  ;;  %v2440_v23 = vmul.f32 %v2406_v36, %v7096_v54  ;;  %v2663_v53 = vadd.f32 %v7141_v61, %v2646_v2 }
 0x2fe   : > { %v2314_v19 = vmul.f32 %v7374_v55, %v7374_v55  ;;  %v2259_v59 = vrot.slane %v2258_v43, 1  ;;  %v2410_v16 = vrot.slane %v2409_v22, 2 }
 0x2ff   : > { %v5960_v30 = vpop.eup %5959  ;;  %v2565_v17 = vmul.f32 %v5958_v50, %v2564_v32  ;;  %v2456_v46 = vadd.f32 1e-05, %v2440_v23  ;;  %v2679_v40 = vmax.f32 %v2663_v53, 0.0 }
 0x300   : > { %v2571_v29 = vmul.f32 %v5960_v30, %v7362_v49  ;;  %v2414_v20 = vsel %vm1222_vm1, %v2314_v19, 0.0  ;;  %5688 = vmatmul.msk.f32.gmra.mxu1 %vm1222_vm1, %v2678_v31  ;;  %v2411_v44 = vadd.f32 %v2410_v16, %v2409_v22  ;;  %v2260_v0 = vadd.f32 %v2259_v59, %v2258_v43 }
 0x301   : > { %v2569_v4 = vsel %vm2568_vm7, %v5958_v50, %v2565_v17  ;;  %v2415_v7 = vrot.slane %v2414_v20, 4  ;;  %5961 = vrsqrt.f32 %v2456_v46  ;;  %vm2577_vm8 = vweird.f32 %v5960_v30 }
 0x302   : > { %v2630_v13 = vmul.f32 %v2569_v4, %v7276_v56  ;;  %v2572_v8 = vmul.f32 %v5960_v30, %v2571_v29  ;;  %v2412_v12 = vrot.slane %v2411_v44, 1  ;;  %v2283_v28 = vmul.f32 %v7096_v54, %v2260_v0  ;;  %vm2578_vm10 = vmor %vm2576_vm9, %vm2577_vm8 }
 0x303   : > { %v2416_v21 = vadd.f32 %v2415_v7, %v2414_v20  ;;  %vm2586_vm12 = vweird.f32 %v2456_v46 }
 0x304   : > { %v2647_v38 = vmul.f32 %v7134_v62, %v2630_v13  ;;  %v2573_v48 = vmul.f32 0.5, %v2572_v8  ;;  %v2413_v24 = vadd.f32 %v2412_v12, %v2411_v44  ;;  %v7388_v47 = vsub.f32 %v7345_v42, %v2283_v28 }
 0x305   : > { %v2417_v63 = vrot.slane %v2416_v21, 2 }
 0x306   : > { %v2574_v50 = vsub.f32 1.5, %v2573_v48  ;;  %v2441_v41 = vmul.f32 %v2413_v24, %v7096_v54  ;;  %v2315_v1 = vmul.f32 %v7388_v47, %v7388_v47  ;;  %v2664_v27 = vadd.f32 %v7141_v61, %v2647_v38 }
 0x307   : > { %v2418_v56 = vadd.f32 %v2417_v63, %v2416_v21  ;;  %v5962_v18 = vpop.eup %5961 }
 0x308   : > { %v2575_v2 = vmul.f32 %v5960_v30, %v2574_v50  ;;  %5689 = vmatmul.msk.f32.gmra.mxu1 %vm1222_vm1, %v2679_v40  ;;  %v2581_v5 = vmul.f32 %v5962_v18, %v2456_v46  ;;  %v2457_v42 = vadd.f32 1e-05, %v2441_v41  ;;  %v2421_v31 = vsel %vm1222_vm1, %v2315_v1, 0.0 }
 0x309   : > { %v2419_v36 = vrot.slane %v2418_v56, 1  ;;  %v2422_v19 = vrot.slane %v2421_v31, 4  ;;  %v2680_v59 = vmax.f32 %v2664_v27, 0.0  ;;  %vm2587_vm11 = vweird.f32 %v5962_v18 }
 0x30a   : > { %v2579_v43 = vsel %vm2578_vm10, %v5960_v30, %v2575_v2  ;;  %v2582_v22 = vmul.f32 %v5962_v18, %v2581_v5  ;;  %5963 = vrsqrt.f32 %v2457_v42  ;;  %vm2588_vm13 = vmor %vm2586_vm12, %vm2587_vm11  ;;  %vm2596_vm15 = vweird.f32 %v2457_v42 }
 0x30b   : > { %v2631_v32 = vmul.f32 %v2579_v43, %v7304_v58  ;;  %v2420_v23 = vadd.f32 %v2419_v36, %v2418_v56  ;;  %v2423_v29 = vadd.f32 %v2422_v19, %v2421_v31 }
 0x30c   : > { %v2583_v17 = vmul.f32 0.5, %v2582_v22 }
 0x30d   : > { %v2648_v49 = vmul.f32 %v7134_v62, %v2631_v32  ;;  %v2442_v16 = vmul.f32 %v2420_v23, %v7096_v54  ;;  %v2424_v4 = vrot.slane %v2423_v29, 2 }
 0x30e   : > { %v2584_v20 = vsub.f32 1.5, %v2583_v17 }
 0x30f   : > { %v2458_v53 = vadd.f32 1e-05, %v2442_v16  ;;  %v2665_v30 = vadd.f32 %v7141_v61, %v2648_v49  ;;  %v2425_v13 = vadd.f32 %v2424_v4, %v2423_v29  ;;  %v7416_v29 = vperm.slane %v7125_v14, 2 }
 0x310   : > { %5690 = vmatmul.msk.f32.gmra.mxu1 %vm1222_vm1, %v2680_v59  ;;  %v5964_v58 = vpop.eup %5963  ;;  %v2585_v44 = vmul.f32 %v5962_v18, %v2584_v20 }
 0x311   : > { %v2591_v7 = vmul.f32 %v5964_v58, %v2457_v42  ;;  %5965 = vrsqrt.f32 %v2458_v53  ;;  %v2681_v21 = vmax.f32 %v2665_v30, 0.0  ;;  %v2426_v28 = vrot.slane %v2425_v13, 1 }
 0x312   : > { %v2589_v0 = vsel %vm2588_vm13, %v5962_v18, %v2585_v44  ;;  %vm2597_vm14 = vweird.f32 %v5964_v58  ;;  %vm2606_vm4 = vweird.f32 %v2458_v53 }
 0x313   : > { %v2632_v8 = vmul.f32 %v2589_v0, %v7335_v39  ;;  %v2592_v12 = vmul.f32 %v5964_v58, %v2591_v7  ;;  %v2427_v40 = vadd.f32 %v2426_v28, %v2425_v13  ;;  %vm2598_vm2 = vmor %vm2596_vm15, %vm2597_vm14  ;;  %v8586_v0 = vld [vmem:[#allocation6_spill] sm:$0xff]  ;;  %v8589_v28 = vld [vmem:[#allocation7_spill] sm:$0xff] }
 0x315   : > { %v2649_v38 = vmul.f32 %v7134_v62, %v2632_v8  ;;  %v2593_v48 = vmul.f32 0.5, %v2592_v12  ;;  %v2443_v41 = vmul.f32 %v2427_v40, %v7096_v54  ;;  %v8587_v12 = vld [vmem:[#allocation5_spill] sm:$0xff]  ;;  %v8591_v40 = vld [vmem:[#allocation11_spill] sm:$0xff] }
 0x316   : > { %v6126_v54 = vld [vmem:[%s6217_s11 + $0x68] sm:$0xff] }
 0x317   : > { %v5966_v24 = vpop.eup %5965  ;;  %v2594_v63 = vsub.f32 1.5, %v2593_v48  ;;  %v2666_v46 = vadd.f32 %v7141_v61, %v2649_v38  ;;  %v2459_v1 = vadd.f32 1e-05, %v2443_v41  ;;  %v8594_v41 = vld [vmem:[#allocation2_spill] sm:$0xff] }
 0x318   : > { %5691 = vmatmul.msk.f32.gmra.mxu1 %vm1222_vm1, %v2681_v21  ;;  %v2601_v50 = vmul.f32 %v5966_v24, %v2458_v53  ;;  %vm2607_vm3 = vweird.f32 %v5966_v24 }
 0x319   : > { %v2595_v56 = vmul.f32 %v5964_v58, %v2594_v63  ;;  %v2682_v2 = vmax.f32 %v2666_v46, 0.0  ;;  %5967 = vrsqrt.f32 %v2459_v1  ;;  %vm2608_vm5 = vmor %vm2606_vm4, %vm2607_vm3  ;;  %vm2616_vm7 = vweird.f32 %v2459_v1 }
 0x31a   : > { %v2602_v39 = vmul.f32 %v5966_v24, %v2601_v50 }
 0x31b   : > { %v2599_v18 = vsel %vm2598_vm2, %v5964_v58, %v2595_v56  ;;  %v8595_v56 = vld [vmem:[#allocation3_spill] sm:$0xff] }
 0x31c   : > { %v2633_v27 = vmul.f32 %v2599_v18, %v7358_v34  ;;  %v2603_v5 = vmul.f32 0.5, %v2602_v39 }
 0x31e   : > { %v2650_v36 = vmul.f32 %v7134_v62, %v2633_v27  ;;  %v2604_v43 = vsub.f32 1.5, %v2603_v5  ;;  %v8598_v27 = vld [vmem:[#allocation10_spill] sm:$0xff] }
 0x31f   : > { %v5968_v42 = vpop.eup %5967 }
 0x320   : > { %5692 = vmatmul.msk.f32.gmra.mxu1 %vm1222_vm1, %v2682_v2  ;;  %v2605_v31 = vmul.f32 %v5966_v24, %v2604_v43  ;;  %v2667_v32 = vadd.f32 %v7141_v61, %v2650_v36  ;;  %v2611_v19 = vmul.f32 %v5968_v42, %v2459_v1  ;;  %vm2617_vm6 = vweird.f32 %v5968_v42  ;;  %v8597_v2 = vld [vmem:[#allocation4_spill] sm:$0xff] }
 0x321   : > { %vm2618_vm8 = vmor %vm2616_vm7, %vm2617_vm6 }
 0x322   : > { %v2609_v22 = vsel %vm2608_vm5, %v5966_v24, %v2605_v31  ;;  %v2683_v59 = vmax.f32 %v2667_v32, 0.0  ;;  %v2612_v49 = vmul.f32 %v5968_v42, %v2611_v19  ;;  %v8592_v24 = vld [vmem:[#allocation8_spill] sm:$0xff]  ;;  %v8600_v31 = vld [vmem:[#allocation13_spill] sm:$0xff] }
 0x323   : > { %v2634_v23 = vmul.f32 %v2609_v22, %v7374_v55  ;;  %v8601_v32 = vld [vmem:[#allocation9_spill] sm:$0xff]  ;;  %v8603_v19 = vld [vmem:[#allocation12_spill] sm:$0xff] }
 0x324   : > { %v2613_v17 = vmul.f32 0.5, %v2612_v49 }
 0x325   : > { %v2651_v34 = vmul.f32 %v7134_v62, %v2634_v23 }
 0x326   : > { %v2614_v20 = vsub.f32 1.5, %v2613_v17 }
 0x327   : > { %v2668_v16 = vadd.f32 %v7141_v61, %v2651_v34 }
 0x328   : > { %5693 = vmatmul.msk.f32.gmra.mxu1 %vm1222_vm1, %v2683_v59  ;;  %v2615_v53 = vmul.f32 %v5968_v42, %v2614_v20  ;;  %v8604_v59 = vld [vmem:[#allocation14_spill] sm:$0xff]  ;;  %v8607_v20 = vld [vmem:[#allocation16_spill] sm:$0xff] }
 0x329   : > { %v2684_v4 = vmax.f32 %v2668_v16, 0.0  ;;  %v8606_v16 = vld [vmem:[#allocation17_spill] sm:$0xff] }
 0x32a   : > { %v2619_v58 = vsel %vm2618_vm8, %v5968_v42, %v2615_v53 }
 0x32b   : > { %v2635_v44 = vmul.f32 %v2619_v58, %v7388_v47  ;;  %v8609_v58 = vld [vmem:[#allocation18_spill] sm:$0xff] }
 0x32d   : > { %v2752_v30 = vpop.f32.mrf.mxu1  ;;  %v2652_v14 = vmul.f32 %v7134_v62, %v2635_v44  ;;  %v8610_v44 = vld [vmem:[#allocation19_spill] sm:$0xff] }
 0x32e   : > { %v7419_v55 = vadd.f32 %v2752_v30, %v7416_v29 }
 0x32f   : > { %v2669_v13 = vadd.f32 %v7141_v61, %v2652_v14 }
 0x330   : > { %8585 = vst [vmem:[#allocation38_spill] sm:$0xff] %v7419_v55  ;;  %v8491_v7 = vmax.f32 %v7419_v55, 0.0  ;;  %5694 = vmatmul.msk.f32.gmra.mxu1 %vm1222_vm1, %v2684_v4 }
 0x331   : > { %v2685_v8 = vmax.f32 %v2669_v13, 0.0 }
 0x332   : > { %2834 = vmatpush.msra.mxu2 %v8491_v7 }
 0x333   : > { %5696 = vmatmul.msk.f32.vlgmr.msra.gmra.mxu2 %vm392_vm0, %v8586_v0 }
 0x338   : > { %5695 = vmatmul.msk.f32.gmra.mxu1 %vm1222_vm1, %v2685_v8  ;;  %v8612_v8 = vld [vmem:[#allocation22_spill] sm:$0xff] }
 0x33b   : > { %5697 = vmatmul.msk.f32.gmra.mxu2 %vm392_vm0, %v8587_v12  ;;  %v8613_v12 = vld [vmem:[#allocation21_spill] sm:$0xff] }
 0x33e   : > { %v2755_v47 = vpop.f32.mrf.mxu1 }
 0x33f   : > { %v7434_v21 = vadd.f32 %v2755_v47, %v7416_v29 }
 0x341   : > { %8588 = vst [vmem:[#allocation37_spill] sm:$0xff] %v7434_v21  ;;  %v8490_v62 = vmax.f32 %v7434_v21, 0.0 }
 0x343   : > { %2857 = vmatpush.msra.mxu3 %v8490_v62 }
 0x344   : > { %5698 = vmatmul.msk.f32.vlgmr.msra.gmra.mxu3 %vm392_vm0, %v8589_v28 }
 0x346   : > { %v2758_v38 = vpop.f32.mrf.mxu1 }
 0x347   : > { %v7442_v61 = vadd.f32 %v2758_v38, %v7416_v29 }
 0x349   : > { %8590 = vst [vmem:[#allocation49_spill] sm:$0xff] %v7442_v61  ;;  %v8489_v48 = vmax.f32 %v7442_v61, 0.0 }
 0x34b   : > { %2880 = vmatpush.msrb.mxu2 %v8489_v48  ;;  %v6123_v48 = vld [vmem:[%s6217_s11 + $0x50] sm:$0xff] }
 0x34c   : > { %5699 = vmatmul.msk.f32.gmra.mxu3 %vm392_vm0, %v8591_v40  ;;  %5700 = vmatmul.msk.f32.vlgmr.msrb.gmra.mxu2 %vm392_vm0, %v8592_v24  ;;  %v8615_v40 = vld [vmem:[#allocation24_spill] sm:$0xff]  ;;  %v8616_v24 = vld [vmem:[#allocation15_spill] sm:$0xff] }
 0x34e   : > { %v2761_v63 = vpop.f32.mrf.mxu1 }
 0x34f   : > { %v7452_v46 = vadd.f32 %v2761_v63, %v7416_v29 }
 0x351   : > { %8593 = vst [vmem:[#allocation34_spill] sm:$0xff] %v7452_v46  ;;  %v8488_v50 = vmax.f32 %v7452_v46, 0.0 }
 0x353   : > { %2903 = vmatpush.msrb.mxu3 %v8488_v50 }
 0x354   : > { %5701 = vmatmul.msk.f32.gmra.mxu2 %vm392_vm0, %v8594_v41  ;;  %5702 = vmatmul.msk.f32.vlgmr.msrb.gmra.mxu3 %vm392_vm0, %v8595_v56 }
 0x357   : > { %v2764_v39 = vpop.f32.mrf.mxu1 }
 0x358   : > { %v7462_v1 = vadd.f32 %v2764_v39, %v7416_v29  ;;  %v8618_v39 = vld [vmem:[#allocation20_spill] sm:$0xff] }
 0x35a   : > { %8596 = vst [vmem:[#allocation39_spill] sm:$0xff] %v7462_v1  ;;  %v8487_v18 = vmax.f32 %v7462_v1, 0.0 }
 0x35c   : > { %2926 = vmatpush.msra.mxu2 %v8487_v18  ;;  %5703 = vmatmul.msk.f32.gmra.mxu3 %vm392_vm0, %v8597_v2  ;;  %v8619_v2 = vld [vmem:[#allocation25_spill] sm:$0xff] }
 0x35d   : > { %5704 = vmatmul.msk.f32.vlgmr.msra.gmra.mxu2 %vm392_vm0, %v8598_v27 }
 0x360   : > { %v2767_v5 = vpop.f32.mrf.mxu1 }
 0x361   : > { %v7472_v36 = vadd.f32 %v2767_v5, %v7416_v29 }
 0x363   : > { %8599 = vst [vmem:[#allocation50_spill] sm:$0xff] %v7472_v36  ;;  %v8486_v43 = vmax.f32 %v7472_v36, 0.0 }
 0x365   : > { %2949 = vmatpush.msra.mxu3 %v8486_v43  ;;  %5705 = vmatmul.msk.f32.gmra.mxu2 %vm392_vm0, %v8600_v31 }
 0x366   : > { %5706 = vmatmul.msk.f32.vlgmr.msra.gmra.mxu3 %vm392_vm0, %v8601_v32  ;;  %v8621_v32 = vld [vmem:[#allocation28_spill] sm:$0xff] }
 0x368   : > { %v2770_v42 = vpop.f32.mrf.mxu1 }
 0x369   : > { %v7482_v22 = vadd.f32 %v2770_v42, %v7416_v29  ;;  %v8622_v42 = vld [vmem:[#allocation23_spill] sm:$0xff] }
 0x36b   : > { %8602 = vst [vmem:[#allocation35_spill] sm:$0xff] %v7482_v22  ;;  %v8485_v23 = vmax.f32 %v7482_v22, 0.0 }
 0x36d   : > { %2972 = vmatpush.msrb.mxu2 %v8485_v23 }
 0x36e   : > { %5707 = vmatmul.msk.f32.gmra.mxu3 %vm392_vm0, %v8603_v19  ;;  %5708 = vmatmul.msk.f32.vlgmr.msrb.gmra.mxu2 %vm392_vm0, %v8604_v59 }
 0x375   : > { %v2773_v34 = vpop.f32.mrf.mxu1 }
 0x376   : > { %v7492_v49 = vadd.f32 %v2773_v34, %v7416_v29  ;;  %5709 = vmatmul.msk.f32.gmra.mxu2 %vm392_vm0, %v8606_v16  ;;  %v8624_v16 = vld [vmem:[#allocation26_spill] sm:$0xff] }
 0x378   : > { %8605 = vst [vmem:[#allocation45_spill] sm:$0xff] %v7492_v49  ;;  %v8484_v17 = vmax.f32 %v7492_v49, 0.0 }
 0x37a   : > { %2995 = vmatpush.msrb.mxu3 %v8484_v17  ;;  %v6121_v17 = vld [vmem:[%s6217_s11 + $0x40] sm:$0xff] }
 0x37b   : > { %5710 = vmatmul.msk.f32.vlgmr.msrb.gmra.mxu3 %vm392_vm0, %v8607_v20  ;;  %v8625_v20 = vld [vmem:[#allocation31_spill] sm:$0xff] }
 0x37d   : > { %v2776_v53 = vpop.f32.mrf.mxu1 }
 0x37e   : > { %v7502_v4 = vadd.f32 %v2776_v53, %v7416_v29 }
 0x380   : > { %8608 = vst [vmem:[#allocation44_spill] sm:$0xff] %v7502_v4  ;;  %v8483_v30 = vmax.f32 %v7502_v4, 0.0 }
 0x382   : > { %3018 = vmatpush.msra.mxu2 %v8483_v30 }
 0x383   : > { %5711 = vmatmul.msk.f32.gmra.mxu3 %vm392_vm0, %v8609_v58  ;;  %5712 = vmatmul.msk.f32.vlgmr.msra.gmra.mxu2 %vm392_vm0, %v8610_v44 }
 0x385   : > { %v2779_v14 = vpop.f32.mrf.mxu1 }
 0x386   : > { %v7512_v0 = vadd.f32 %v2779_v14, %v7416_v29  ;;  %v8627_v14 = vld [vmem:[#allocation33_spill] sm:$0xff] }
 0x388   : > { %8611 = vst [vmem:[#allocation42_spill] sm:$0xff] %v7512_v0  ;;  %v8482_v13 = vmax.f32 %v7512_v0, 0.0 }
 0x38a   : > { %3041 = vmatpush.msra.mxu3 %v8482_v13 }
 0x38b   : > { %5713 = vmatmul.msk.f32.gmra.mxu2 %vm392_vm0, %v8612_v8  ;;  %5714 = vmatmul.msk.f32.vlgmr.msra.gmra.mxu3 %vm392_vm0, %v8613_v12  ;;  %v8628_v8 = vld [vmem:[#allocation27_spill] sm:$0xff] }
 0x38d   : > { %v2782_v47 = vpop.f32.mrf.mxu1 }
 0x38e   : > { %v7522_v28 = vadd.f32 %v2782_v47, %v7416_v29 }
 0x390   : > { %8614 = vst [vmem:[#allocation40_spill] sm:$0xff] %v7522_v28  ;;  %v8481_v38 = vmax.f32 %v7522_v28, 0.0 }
 0x392   : > { %3064 = vmatpush.msrb.mxu2 %v8481_v38 }
 0x393   : > { %5715 = vmatmul.msk.f32.gmra.mxu3 %vm392_vm0, %v8615_v40  ;;  %5716 = vmatmul.msk.f32.vlgmr.msrb.gmra.mxu2 %vm392_vm0, %v8616_v24 }
 0x395   : > { %v2785_v63 = vpop.f32.mrf.mxu1 }
 0x396   : > { %v7532_v41 = vadd.f32 %v2785_v63, %v7416_v29  ;;  %v6113_v63 = vld [vmem:[%s6217_s11] sm:$0xff] }
 0x398   : > { %8617 = vst [vmem:[#allocation6_spill] sm:$0xff] %v7532_v41  ;;  %v8480_v56 = vmax.f32 %v7532_v41, 0.0  ;;  %v6133_v41 = vld [vmem:[%s6217_s11 + $0xa0] sm:$0xff] }
 0x39a   : > { %3087 = vmatpush.msrb.mxu3 %v8480_v56 }
 0x39b   : > { %5717 = vmatmul.msk.f32.gmra.mxu2 %vm392_vm0, %v8618_v39  ;;  %5718 = vmatmul.msk.f32.vlgmr.msrb.gmra.mxu3 %vm392_vm0, %v8619_v2  ;;  %v8630_v2 = vld [vmem:[#allocation30_spill] sm:$0xff] }
 0x39d   : > { %v2788_v27 = vpop.f32.mrf.mxu1 }
 0x39e   : > { %v7542_v5 = vadd.f32 %v2788_v27, %v7416_v29  ;;  %v8631_v27 = vld [vmem:[#allocation29_spill] sm:$0xff] }
 0x3a0   : > { %8620 = vst [vmem:[#allocation5_spill] sm:$0xff] %v7542_v5  ;;  %v8479_v31 = vmax.f32 %v7542_v5, 0.0 }
 0x3a2   : > { %3110 = vmatpush.msra.mxu2 %v8479_v31 }
 0x3a3   : > { %5719 = vmatmul.msk.f32.gmra.mxu3 %vm392_vm0, %v8621_v32  ;;  %5720 = vmatmul.msk.f32.vlgmr.msra.gmra.mxu2 %vm392_vm0, %v8622_v42 }
 0x3a5   : > { %v2791_v19 = vpop.f32.mrf.mxu1 }
 0x3a6   : > { %v7552_v59 = vadd.f32 %v2791_v19, %v7416_v29  ;;  %v6114_v19 = vld [vmem:[%s6217_s11 + $0x8] sm:$0xff] }
 0x3a8   : > { %8623 = vst [vmem:[#allocation7_spill] sm:$0xff] %v7552_v59  ;;  %v8478_v34 = vmax.f32 %v7552_v59, 0.0 }
 0x3aa   : > { %3133 = vmatpush.msra.mxu3 %v8478_v34 }
 0x3ab   : > { %5721 = vmatmul.msk.f32.gmra.mxu2 %vm392_vm0, %v8624_v16  ;;  %5722 = vmatmul.msk.f32.vlgmr.msra.gmra.mxu3 %vm392_vm0, %v8625_v20 }
 0x3ad   : > { %v2794_v53 = vpop.f32.mrf.mxu1 }
 0x3ae   : > { %v7562_v58 = vadd.f32 %v2794_v53, %v7416_v29 }
 0x3b0   : > { %8626 = vst [vmem:[#allocation11_spill] sm:$0xff] %v7562_v58  ;;  %v8477_v44 = vmax.f32 %v7562_v58, 0.0 }
 0x3b2   : > { %3156 = vmatpush.msrb.mxu2 %v8477_v44 }
 0x3b3   : > { %5723 = vmatmul.msk.f32.gmra.mxu3 %vm392_vm0, %v8627_v14  ;;  %5724 = vmatmul.msk.f32.vlgmr.msrb.gmra.mxu2 %vm392_vm0, %v8628_v8  ;;  %v8632_v14 = vld [vmem:[#allocation32_spill] sm:$0xff] }
 0x3b5   : > { %v2797_v12 = vpop.f32.mrf.mxu1 }
 0x3b6   : > { %v2836_v47 = vpop.f32.mrf.mxu2  ;;  %v7572_v40 = vadd.f32 %v2797_v12, %v7416_v29 }
 0x3b7   : > { %v2837_v39 = vadd.f32 %v6113_v63, %v2836_v47 }
 0x3b8   : > { %8629 = vst [vmem:[#allocation8_spill] sm:$0xff] %v7572_v40  ;;  %v8476_v24 = vmax.f32 %v7572_v40, 0.0 }
 0x3b9   : > { %v3187_v32 = vmax.f32 %v2837_v39, 0.0 }
 0x3ba   : > { %3179 = vmatpush.msrb.mxu3 %v8476_v24  ;;  %v6115_v24 = vld [vmem:[%s6217_s11 + $0x10] sm:$0xff] }
 0x3bb   : > { %5725 = vmatmul.msk.f32.gmra.mxu2 %vm392_vm0, %v8630_v2  ;;  %5726 = vmatmul.msk.f32.vlgmr.msrb.gmra.mxu3 %vm392_vm0, %v8631_v27  ;;  %v3219_v29 = vadd.f32 1e-07, %v3187_v32 }
 0x3bd   : > { %v3251_v8 = vsel %vm392_vm0, %v3219_v29, -inf }
 0x3be   : > { %v2839_v42 = vpop.f32.mrf.mxu2 }
 0x3bf   : > { %v2840_v16 = vadd.f32 %v6114_v19, %v2839_v42 }
 0x3c1   : > { %v3188_v20 = vmax.f32 %v2840_v16, 0.0 }
 0x3c3   : > { %v3220_v53 = vadd.f32 1e-07, %v3188_v20  ;;  %5727 = vmatmul.msk.f32.gmra.mxu3 %vm392_vm0, %v8632_v14  ;;  %v6116_v14 = vld [vmem:[%s6217_s11 + $0x18] sm:$0xff] }
 0x3c5   : > { %v3252_v12 = vsel %vm392_vm0, %v3220_v53, -inf }
 0x3c6   : > { %v3253_v47 = vmax.f32 %v3251_v8, %v3252_v12  ;;  %v6117_v12 = vld [vmem:[%s6217_s11 + $0x20] sm:$0xff] }
 0x3c7   : > { %v2859_v27 = vpop.f32.mrf.mxu3 }
 0x3c8   : > { %v3254_v63 = vrot.slane %v3253_v47, 4  ;;  %v2860_v44 = vadd.f32 %v6115_v24, %v2859_v27 }
 0x3ca   : > { %v3255_v2 = vmax.f32 %v3253_v47, %v3254_v63  ;;  %v3189_v19 = vmax.f32 %v2860_v44, 0.0 }
 0x3cc   : > { %v3256_v39 = vrot.slane %v3255_v2, 2  ;;  %v7589_v13 = vadd.f32 1e-07, %v3189_v19 }
 0x3ce   : > { %v3257_v42 = vmax.f32 %v3255_v2, %v3256_v39  ;;  %v3260_v44 = vsel %vm392_vm0, %v7589_v13, -inf }
 0x3cf   : > { %v2862_v20 = vpop.f32.mrf.mxu3  ;;  %v2882_v34 = vpop.f32.mrf.mxu2 }
 0x3d0   : > { %v3258_v32 = vrot.slane %v3257_v42, 1  ;;  %v2863_v31 = vadd.f32 %v6116_v14, %v2862_v20  ;;  %v2883_v47 = vadd.f32 %v6117_v12, %v2882_v34 }
 0x3d2   : > { %v3259_v16 = vmax.f32 %v3257_v42, %v3258_v32  ;;  %v3190_v8 = vmax.f32 %v2863_v31, 0.0  ;;  %v3191_v27 = vmax.f32 %v2883_v47, 0.0  ;;  %v6118_v31 = vld [vmem:[%s6217_s11 + $0x28] sm:$0xff] }
 0x3d4   : > { %v3395_v56 = vsub.f32 %v3219_v29, %v3259_v16  ;;  %v3396_v38 = vsub.f32 %v3220_v53, %v3259_v16  ;;  %v7592_v24 = vadd.f32 1e-07, %v3190_v8  ;;  %v6119_v16 = vld [vmem:[%s6217_s11 + $0x30] sm:$0xff] }
 0x3d6   : > { %v3427_v63 = vmul.f32 1.442695, %v3395_v56  ;;  %v3429_v30 = vmul.f32 1.442695, %v3396_v38  ;;  %v3261_v2 = vsel %vm392_vm0, %v7592_v24, -inf }
 0x3d7   : > { %v3262_v39 = vmax.f32 %v3260_v44, %v3261_v2  ;;  %v2885_v42 = vpop.f32.mrf.mxu2  ;;  %v2905_v32 = vpop.f32.mrf.mxu3  ;;  %v7599_v56 = vadd.f32 1e-07, %v3191_v27 }
 0x3d8   : > { %5969 = vpow2.f32 %v3427_v63  ;;  %v2886_v19 = vadd.f32 %v6118_v31, %v2885_v42  ;;  %v2906_v20 = vadd.f32 %v6119_v16, %v2905_v32 }
 0x3d9   : > { %5971 = vpow2.f32 %v3429_v30  ;;  %v3263_v34 = vrot.slane %v3262_v39, 4  ;;  %v3269_v2 = vsel %vm392_vm0, %v7599_v56, -inf }
 0x3da   : > { %v3192_v38 = vmax.f32 %v2886_v19, 0.0  ;;  %v3193_v42 = vmax.f32 %v2906_v20, 0.0 }
 0x3db   : > { %v3264_v30 = vmax.f32 %v3262_v39, %v3263_v34  ;;  %v6120_v34 = vld [vmem:[%s6217_s11 + $0x38] sm:$0xff] }
 0x3dc   : > { %v7602_v12 = vadd.f32 1e-07, %v3192_v38  ;;  %v7615_v16 = vadd.f32 1e-07, %v3193_v42 }
 0x3dd   : > { %v3265_v44 = vrot.slane %v3264_v30, 2 }
 0x3de   : > { %v5970_v14 = vpop.eup %5969  ;;  %v3270_v27 = vsel %vm392_vm0, %v7602_v12, -inf }
 0x3df   : > { %v5972_v8 = vpop.eup %5971  ;;  %v7604_v63 = vmul.f32 %v5970_v14, %v3219_v29  ;;  %v3266_v32 = vmax.f32 %v3264_v30, %v3265_v44  ;;  %v3271_v31 = vmax.f32 %v3269_v2, %v3270_v27  ;;  %v2908_v39 = vpop.f32.mrf.mxu3  ;;  %v3278_v27 = vsel %vm392_vm0, %v7615_v16, -inf }
 0x3e0   : > { %v7606_v47 = vmul.f32 %v5972_v8, %v3220_v53  ;;  %3505 = vmatpush.msrb.mxu0 %v5972_v8  ;;  %v2928_v19 = vpop.f32.mrf.mxu2  ;;  %v2909_v29 = vadd.f32 %v6120_v34, %v2908_v39 }
 0x3e1   : > { %v3267_v53 = vrot.slane %v3266_v32, 1  ;;  %v3272_v38 = vrot.slane %v3271_v31, 4  ;;  %v2929_v23 = vadd.f32 %v6121_v17, %v2928_v19 }
 0x3e2   : > { %3506 = vmatpush.msrb.mxu0 %v5970_v14  ;;  %v3194_v8 = vmax.f32 %v2909_v29, 0.0 }
 0x3e3   : > { %5728 = vmatmul.msk.f32.vlgmr.msrb.gmra.mxu0 %vm1222_vm1, %v6715_v10  ;;  %v3268_v43 = vmax.f32 %v3266_v32, %v3267_v53  ;;  %v3273_v20 = vmax.f32 %v3271_v31, %v3272_v38  ;;  %v3195_v39 = vmax.f32 %v2929_v23, 0.0  ;;  %v6122_v53 = vld [vmem:[%s6217_s11 + $0x48] sm:$0xff] }
 0x3e4   : > { %v7618_v30 = vadd.f32 1e-07, %v3194_v8 }
 0x3e5   : > { %v3397_v44 = vsub.f32 %v7589_v13, %v3268_v43  ;;  %v3398_v14 = vsub.f32 %v7592_v24, %v3268_v43  ;;  %v3274_v2 = vrot.slane %v3273_v20, 2  ;;  %v7627_v18 = vadd.f32 1e-07, %v3195_v39 }
 0x3e6   : > { %v3279_v42 = vsel %vm392_vm0, %v7618_v30, -inf }
 0x3e7   : > { %v3431_v34 = vmul.f32 1.442695, %v3397_v44  ;;  %v3433_v17 = vmul.f32 1.442695, %v3398_v14  ;;  %v3275_v19 = vmax.f32 %v3273_v20, %v3274_v2  ;;  %v3280_v32 = vmax.f32 %v3278_v27, %v3279_v42 }
 0x3e8   : > { %v2931_v31 = vpop.f32.mrf.mxu2  ;;  %v3287_v27 = vsel %vm392_vm0, %v7627_v18, -inf }
 0x3e9   : > { %v2951_v29 = vpop.f32.mrf.mxu3  ;;  %v2932_v38 = vadd.f32 %v6122_v53, %v2931_v31  ;;  %5973 = vpow2.f32 %v3431_v34  ;;  %v3276_v8 = vrot.slane %v3275_v19, 1  ;;  %v3281_v43 = vrot.slane %v3280_v32, 4 }
 0x3ea   : > { %5975 = vpow2.f32 %v3433_v17  ;;  %v2952_v62 = vadd.f32 %v6123_v48, %v2951_v29  ;;  %v6124_v29 = vld [vmem:[%s6217_s11 + $0x58] sm:$0xff] }
 0x3eb   : > { %v3196_v50 = vmax.f32 %v2932_v38, 0.0  ;;  %v3277_v7 = vmax.f32 %v3275_v19, %v3276_v8  ;;  %v3282_v23 = vmax.f32 %v3280_v32, %v3281_v43 }
 0x3ec   : > { %v3197_v39 = vmax.f32 %v2952_v62, 0.0 }
 0x3ed   : > { %v7630_v44 = vadd.f32 1e-07, %v3196_v50  ;;  %v3399_v20 = vsub.f32 %v7599_v56, %v3277_v7  ;;  %v3400_v14 = vsub.f32 %v7602_v12, %v3277_v7  ;;  %v3283_v2 = vrot.slane %v3282_v23, 2 }
 0x3ef   : > { %v3288_v42 = vsel %vm392_vm0, %v7630_v44, -inf  ;;  %v5974_v34 = vpop.eup %5973  ;;  %v3435_v17 = vmul.f32 1.442695, %v3399_v20  ;;  %v3437_v48 = vmul.f32 1.442695, %v3400_v14  ;;  %v3284_v19 = vmax.f32 %v3282_v23, %v3283_v2 }
 0x3f0   : > { %v3289_v31 = vmax.f32 %v3287_v27, %v3288_v42  ;;  %v5976_v50 = vpop.eup %5975  ;;  %v7640_v7 = vmul.f32 %v5974_v34, %v7589_v13  ;;  %v7645_v20 = vadd.f32 1e-07, %v3197_v39  ;;  %v6125_v42 = vld [vmem:[%s6217_s11 + $0x60] sm:$0xff] }
 0x3f1   : > { %v2954_v32 = vpop.f32.mrf.mxu3  ;;  %v7643_v38 = vmul.f32 %v5976_v50, %v7592_v24  ;;  %5977 = vpow2.f32 %v3435_v17  ;;  %v3285_v8 = vrot.slane %v3284_v19, 1  ;;  %v2974_v62 = vpop.f32.mrf.mxu2  ;;  %3525 = vmatpush.msrb.mxu1 %v5976_v50 }
 0x3f2   : > { %v2955_v53 = vadd.f32 %v6124_v29, %v2954_v32  ;;  %v3290_v43 = vrot.slane %v3289_v31, 4  ;;  %5979 = vpow2.f32 %v3437_v48  ;;  %v2975_v13 = vadd.f32 %v6125_v42, %v2974_v62 }
 0x3f3   : > { %v3286_v14 = vmax.f32 %v3284_v19, %v3285_v8  ;;  %3526 = vmatpush.msrb.mxu1 %v5974_v34  ;;  %v3296_v39 = vsel %vm392_vm0, %v7645_v20, -inf }
 0x3f4   : > { %v3198_v23 = vmax.f32 %v2955_v53, 0.0  ;;  %v3291_v2 = vmax.f32 %v3289_v31, %v3290_v43  ;;  %5729 = vmatmul.msk.f32.vlgmr.msrb.gmra.mxu1 %vm1222_vm1, %v8567_v37  ;;  %v3199_v8 = vmax.f32 %v2975_v13, 0.0 }
 0x3f5   : > { %v3401_v24 = vsub.f32 %v7615_v16, %v3286_v14  ;;  %v3402_v17 = vsub.f32 %v7618_v30, %v3286_v14 }
 0x3f6   : > { %v7647_v27 = vadd.f32 1e-07, %v3198_v23  ;;  %v3292_v32 = vrot.slane %v3291_v2, 2 }
 0x3f7   : > { %v5978_v34 = vpop.eup %5977  ;;  %v3439_v19 = vmul.f32 1.442695, %v3401_v24  ;;  %v3441_v31 = vmul.f32 1.442695, %v3402_v17 }
 0x3f8   : > { %v3297_v48 = vsel %vm392_vm0, %v7647_v27, -inf  ;;  %v3293_v50 = vmax.f32 %v3291_v2, %v3292_v32  ;;  %v5980_v53 = vpop.eup %5979  ;;  %v7659_v43 = vmul.f32 %v5978_v34, %v7599_v56  ;;  %v7665_v32 = vadd.f32 1e-07, %v3199_v8 }
 0x3f9   : > { %v3298_v29 = vmax.f32 %v3296_v39, %v3297_v48  ;;  %v7662_v62 = vmul.f32 %v5980_v53, %v7602_v12  ;;  %5981 = vpow2.f32 %v3439_v19  ;;  %v2977_v42 = vpop.f32.mrf.mxu2  ;;  %3545 = vmatpush.msra.mxu2 %v5980_v53 }
 0x3fa   : > { %v3294_v23 = vrot.slane %v3293_v50, 1  ;;  %5983 = vpow2.f32 %v3441_v31  ;;  %v2978_v24 = vadd.f32 %v6126_v54, %v2977_v42  ;;  %v6127_v31 = vld [vmem:[%s6217_s11 + $0x70] sm:$0xff] }
 0x3fb   : > { %v3299_v14 = vrot.slane %v3298_v29, 4  ;;  %3546 = vmatpush.msra.mxu2 %v5978_v34 }
 0x3fc   : > { %v3295_v17 = vmax.f32 %v3293_v50, %v3294_v23  ;;  %v3200_v13 = vmax.f32 %v2978_v24, 0.0  ;;  %5730 = vmatmul.msk.f32.vlgmr.msra.gmra.mxu2 %vm1222_vm1, %v6756_v6  ;;  %v3305_v23 = vsel %vm392_vm0, %v7665_v32, -inf }
 0x3fd   : > { %v3300_v2 = vmax.f32 %v3298_v29, %v3299_v14 }
 0x3fe   : > { %v2997_v56 = vpop.f32.mrf.mxu3  ;;  %v3403_v12 = vsub.f32 %v7627_v18, %v3295_v17  ;;  %v3404_v39 = vsub.f32 %v7630_v44, %v3295_v17  ;;  %v7671_v19 = vadd.f32 1e-07, %v3200_v13 }
 0x3ff   : > { %v3301_v48 = vrot.slane %v3300_v2, 2  ;;  %v2998_v53 = vadd.f32 %v6127_v31, %v2997_v56  ;;  %v5982_v54 = vpop.eup %5981 }
 0x400   : > { %v3443_v50 = vmul.f32 1.442695, %v3403_v12  ;;  %v3445_v29 = vmul.f32 1.442695, %v3404_v39  ;;  %v5984_v8 = vpop.eup %5983  ;;  %v3306_v14 = vsel %vm392_vm0, %v7671_v19, -inf  ;;  %v7679_v42 = vmul.f32 %v5982_v54, %v7615_v16 }
 0x401   : > { %v3302_v34 = vmax.f32 %v3300_v2, %v3301_v48  ;;  %v7682_v24 = vmul.f32 %v5984_v8, %v7618_v30  ;;  %v3307_v13 = vmax.f32 %v3305_v23, %v3306_v14  ;;  %3565 = vmatpush.msra.mxu3 %v5984_v8  ;;  %v3201_v2 = vmax.f32 %v2998_v53, 0.0  ;;  %v6129_v8 = vld [vmem:[%s6217_s11 + $0x80] sm:$0xff] }
 0x402   : > { %5985 = vpow2.f32 %v3443_v50  ;;  %v6128_v50 = vld [vmem:[%s6217_s11 + $0x78] sm:$0xff] }
 0x403   : > { %v3303_v17 = vrot.slane %v3302_v34, 1  ;;  %5987 = vpow2.f32 %v3445_v29  ;;  %v3308_v12 = vrot.slane %v3307_v13, 4  ;;  %3566 = vmatpush.msra.mxu3 %v5982_v54  ;;  %v7689_v23 = vadd.f32 1e-07, %v3201_v2 }
 0x404   : > { %5731 = vmatmul.msk.f32.vlgmr.msra.gmra.mxu3 %vm1222_vm1, %v8577_v26 }
 0x405   : > { %v3304_v56 = vmax.f32 %v3302_v34, %v3303_v17  ;;  %v3309_v31 = vmax.f32 %v3307_v13, %v3308_v12 }
 0x406   : > { %v3000_v39 = vpop.f32.mrf.mxu3  ;;  %v3020_v48 = vpop.f32.mrf.mxu2 }
 0x407   : > { %v3405_v16 = vsub.f32 %v7645_v20, %v3304_v56  ;;  %v3406_v30 = vsub.f32 %v7647_v27, %v3304_v56  ;;  %v3001_v40 = vadd.f32 %v6128_v50, %v3000_v39  ;;  %v3021_v29 = vadd.f32 %v6129_v8, %v3020_v48 }
 0x408   : > { %v5986_v53 = vpop.eup %5985  ;;  %v3310_v54 = vrot.slane %v3309_v31, 2  ;;  %v3314_v39 = vsel %vm392_vm0, %v7689_v23, -inf }
 0x409   : > { %v3447_v34 = vmul.f32 1.442695, %v3405_v16  ;;  %v3449_v14 = vmul.f32 1.442695, %v3406_v30  ;;  %v3202_v17 = vmax.f32 %v3001_v40, 0.0  ;;  %v5988_v58 = vpop.eup %5987  ;;  %v7693_v59 = vmul.f32 %v5986_v53, %v7627_v18  ;;  %v6130_v30 = vld [vmem:[%s6217_s11 + $0x88] sm:$0xff] }
 0x40a   : > { %v7696_v5 = vmul.f32 %v5988_v58, %v7630_v44  ;;  %v3311_v13 = vmax.f32 %v3309_v31, %v3310_v54  ;;  %3585 = vmatpush.msra.mxu0 %v5988_v58  ;;  %v3203_v2 = vmax.f32 %v3021_v29, 0.0  ;;  %v6131_v54 = vld [vmem:[%s6217_s11 + $0x90] sm:$0xff] }
 0x40b   : > { %5989 = vpow2.f32 %v3447_v34  ;;  %v7698_v56 = vadd.f32 1e-07, %v3202_v17 }
 0x40c   : > { %5991 = vpow2.f32 %v3449_v14  ;;  %v3312_v12 = vrot.slane %v3311_v13, 1  ;;  %3586 = vmatpush.msra.mxu0 %v5986_v53  ;;  %v7707_v50 = vadd.f32 1e-07, %v3203_v2 }
 0x40d   : > { %v3315_v18 = vsel %vm392_vm0, %v7698_v56, -inf  ;;  %5732 = vmatmul.msk.f32.vlgmr.msra.gmra.mxu0 %vm1222_vm1, %v6771_v60 }
 0x40e   : > { %v3316_v40 = vmax.f32 %v3314_v39, %v3315_v18  ;;  %v3023_v44 = vpop.f32.mrf.mxu2  ;;  %v3043_v48 = vpop.f32.mrf.mxu3  ;;  %v3313_v16 = vmax.f32 %v3311_v13, %v3312_v12 }
 0x40f   : > { %v3024_v58 = vadd.f32 %v6130_v30, %v3023_v44  ;;  %v3044_v53 = vadd.f32 %v6131_v54, %v3043_v48 }
 0x410   : > { %v3317_v31 = vrot.slane %v3316_v40, 4  ;;  %v3407_v29 = vsub.f32 %v7665_v32, %v3313_v16  ;;  %v3408_v34 = vsub.f32 %v7671_v19, %v3313_v16  ;;  %v3323_v16 = vsel %vm392_vm0, %v7707_v50, -inf }
 0x411   : > { %v5990_v8 = vpop.eup %5989  ;;  %v3204_v14 = vmax.f32 %v3024_v58, 0.0 }
 0x412   : > { %v5992_v17 = vpop.eup %5991  ;;  %v3318_v39 = vmax.f32 %v3316_v40, %v3317_v31  ;;  %v7713_v18 = vmul.f32 %v5990_v8, %v7645_v20  ;;  %v3451_v12 = vmul.f32 1.442695, %v3407_v29  ;;  %v3453_v2 = vmul.f32 1.442695, %v3408_v34  ;;  %v6132_v29 = vld [vmem:[%s6217_s11 + $0x98] sm:$0xff] }
 0x413   : > { %v7716_v13 = vmul.f32 %v5992_v17, %v7647_v27  ;;  %v7718_v44 = vadd.f32 1e-07, %v3204_v14  ;;  %3605 = vmatpush.msra.mxu1 %v5992_v17  ;;  %v3205_v20 = vmax.f32 %v3044_v53, 0.0 }
 0x414   : > { %v3319_v30 = vrot.slane %v3318_v39, 2  ;;  %5993 = vpow2.f32 %v3451_v12 }
 0x415   : > { %v3324_v40 = vsel %vm392_vm0, %v7718_v44, -inf  ;;  %3606 = vmatpush.msra.mxu1 %v5990_v8  ;;  %5995 = vpow2.f32 %v3453_v2  ;;  %v7727_v17 = vadd.f32 1e-07, %v3205_v20 }
 0x416   : > { %v3320_v27 = vmax.f32 %v3318_v39, %v3319_v30  ;;  %v3325_v48 = vmax.f32 %v3323_v16, %v3324_v40  ;;  %v3046_v58 = vpop.f32.mrf.mxu3  ;;  %v3066_v31 = vpop.f32.mrf.mxu2  ;;  %5733 = vmatmul.msk.f32.vlgmr.msra.gmra.mxu1 %vm1222_vm1, %v8579_v35 }
 0x417   : > { %v3047_v34 = vadd.f32 %v6132_v29, %v3046_v58  ;;  %v3067_v28 = vadd.f32 %v6133_v41, %v3066_v31  ;;  %v3332_v41 = vsel %vm392_vm0, %v7727_v17, -inf }
 0x418   : > { %v3321_v14 = vrot.slane %v3320_v27, 1  ;;  %v3326_v54 = vrot.slane %v3325_v48, 4 }
 0x419   : > { %v3206_v12 = vmax.f32 %v3047_v34, 0.0 }
 0x41a   : > { %v3322_v0 = vmax.f32 %v3320_v27, %v3321_v14  ;;  %v3327_v53 = vmax.f32 %v3325_v48, %v3326_v54  ;;  %v5994_v8 = vpop.eup %5993  ;;  %v3207_v48 = vmax.f32 %v3067_v28, 0.0 }
 0x41b   : > { %v7730_v2 = vadd.f32 1e-07, %v3206_v12  ;;  %v5996_v39 = vpop.eup %5995  ;;  %v7735_v58 = vmul.f32 %v5994_v8, %v7665_v32  ;;  %v6134_v32 = vld [vmem:[%s6217_s11 + $0xa8] sm:$0xff] }
 0x41c   : > { %v3409_v30 = vsub.f32 %v7689_v23, %v3322_v0  ;;  %v3410_v16 = vsub.f32 %v7698_v56, %v3322_v0  ;;  %v3328_v40 = vrot.slane %v3327_v53, 2  ;;  %v7738_v20 = vmul.f32 %v5996_v39, %v7671_v19  ;;  %3625 = vmatpush.msrb.mxu2 %v5996_v39  ;;  %v6135_v39 = vld [vmem:[%s6217_s11 + $0xb0] sm:$0xff] }
 0x41d   : > { %v3333_v27 = vsel %vm392_vm0, %v7730_v2, -inf  ;;  %v7747_v49 = vadd.f32 1e-07, %v3207_v48 }
 0x41e   : > { %v3455_v31 = vmul.f32 1.442695, %v3409_v30  ;;  %v3457_v29 = vmul.f32 1.442695, %v3410_v16  ;;  %v3329_v34 = vmax.f32 %v3327_v53, %v3328_v40  ;;  %v3334_v0 = vmax.f32 %v3332_v41, %v3333_v27  ;;  %v3069_v14 = vpop.f32.mrf.mxu2  ;;  %v3089_v54 = vpop.f32.mrf.mxu3  ;;  %3626 = vmatpush.msrb.mxu2 %v5994_v8 }
 0x41f   : > { %v3070_v12 = vadd.f32 %v6134_v32, %v3069_v14  ;;  %5734 = vmatmul.msk.f32.vlgmr.msrb.gmra.mxu2 %vm1222_vm1, %v8576_v25  ;;  %v3090_v30 = vadd.f32 %v6135_v39, %v3089_v54 }
 0x420   : > { %5997 = vpow2.f32 %v3455_v31  ;;  %v3330_v19 = vrot.slane %v3329_v34, 1  ;;  %v3335_v4 = vrot.slane %v3334_v0, 4  ;;  %v3341_v31 = vsel %vm392_vm0, %v7747_v49, -inf }
 0x421   : > { %5999 = vpow2.f32 %v3457_v29  ;;  %v3208_v28 = vmax.f32 %v3070_v12, 0.0  ;;  %v3209_v29 = vmax.f32 %v3090_v30, 0.0 }
 0x422   : > { %v3331_v16 = vmax.f32 %v3329_v34, %v3330_v19  ;;  %v3336_v53 = vmax.f32 %v3334_v0, %v3335_v4 }
 0x423   : > { %v7750_v40 = vadd.f32 1e-07, %v3208_v28  ;;  %v6136_v28 = vld [vmem:[%s6217_s11 + $0xb8] sm:$0xff]  ;;  %v7765_v30 = vadd.f32 1e-07, %v3209_v29 }
 0x424   : > { %v3411_v41 = vsub.f32 %v7707_v50, %v3331_v16  ;;  %v3412_v8 = vsub.f32 %v7718_v44, %v3331_v16  ;;  %v3337_v27 = vrot.slane %v3336_v53, 2 }
 0x425   : > { %v3342_v48 = vsel %vm392_vm0, %v7750_v40, -inf  ;;  %8635 = vst [vmem:[#allocation4_spill] sm:$0xff] %v7765_v30  ;;  %v3350_v29 = vsel %vm392_vm0, %v7765_v30, -inf }
 0x426   : > { %v5998_v14 = vpop.eup %5997  ;;  %v3461_v32 = vmul.f32 1.442695, %v3412_v8  ;;  %v3338_v54 = vmax.f32 %v3336_v53, %v3337_v27  ;;  %v3343_v4 = vmax.f32 %v3341_v31, %v3342_v48  ;;  %v3092_v34 = vpop.f32.mrf.mxu3  ;;  %v3459_v19 = vmul.f32 1.442695, %v3411_v41  ;;  %v6137_v8 = vld [vmem:[%s6217_s11 + $0xc0] sm:$0xff] }
 0x427   : > { %v3112_v0 = vpop.f32.mrf.mxu2  ;;  %v6000_v12 = vpop.eup %5999  ;;  %v3093_v39 = vadd.f32 %v6136_v28, %v3092_v34  ;;  %v7760_v16 = vmul.f32 %v5998_v14, %v7689_v23  ;;  %v6138_v28 = vld [vmem:[%s6217_s11 + $0xc8] sm:$0xff] }
 0x428   : > { %v7763_v22 = vmul.f32 %v6000_v12, %v7698_v56  ;;  %v3339_v36 = vrot.slane %v3338_v54, 1  ;;  %v3344_v1 = vrot.slane %v3343_v4, 4  ;;  %3645 = vmatpush.msrb.mxu3 %v6000_v12  ;;  %6001 = vpow2.f32 %v3461_v32 }
 0x429   : > { %8633 = vst [vmem:[#allocation2_spill] sm:$0xff] %v7760_v16  ;;  %v3210_v53 = vmax.f32 %v3093_v39, 0.0  ;;  %v3113_v27 = vadd.f32 %v6137_v8, %v3112_v0  ;;  %6003 = vpow2.f32 %v3459_v19 }
 0x42a   : > { %8634 = vst [vmem:[#allocation3_spill] sm:$0xff] %v7763_v22  ;;  %v3340_v31 = vmax.f32 %v3338_v54, %v3339_v36  ;;  %v3345_v48 = vmax.f32 %v3343_v4, %v3344_v1  ;;  %3646 = vmatpush.msrb.mxu3 %v5998_v14 }
 0x42b   : > { %v7768_v41 = vadd.f32 1e-07, %v3210_v53  ;;  %5735 = vmatmul.msk.f32.vlgmr.msrb.gmra.mxu3 %vm1222_vm1, %v8581_v9  ;;  %v3211_v1 = vmax.f32 %v3113_v27, 0.0 }
 0x42c   : > { %v3413_v23 = vsub.f32 %v7727_v17, %v3340_v31  ;;  %v3414_v56 = vsub.f32 %v7730_v2, %v3340_v31  ;;  %v3346_v32 = vrot.slane %v3345_v48, 2 }
 0x42d   : > { %8636 = vst [vmem:[#allocation10_spill] sm:$0xff] %v7768_v41  ;;  %v3351_v36 = vsel %vm392_vm0, %v7768_v41, -inf  ;;  %v7784_v46 = vadd.f32 1e-07, %v3211_v1 }
 0x42e   : > { %v3465_v14 = vmul.f32 1.442695, %v3414_v56  ;;  %v3347_v54 = vmax.f32 %v3345_v48, %v3346_v32  ;;  %v3352_v4 = vmax.f32 %v3350_v29, %v3351_v36  ;;  %v3135_v0 = vpop.f32.mrf.mxu3  ;;  %v7778_v12 = vpop.eup %6001  ;;  %v3463_v19 = vmul.f32 1.442695, %v3413_v23  ;;  %v6139_v56 = vld [vmem:[%s6217_s11 + $0xd0] sm:$0xff] }
 0x42f   : > { %v3115_v34 = vpop.f32.mrf.mxu2  ;;  %3665 = vmatpush.msrb.mxu0 %v7778_v12  ;;  %v7782_v31 = vpop.eup %6003  ;;  %v3136_v48 = vadd.f32 %v6139_v56, %v3135_v0  ;;  %v6140_v56 = vld [vmem:[%s6217_s11 + $0xd8] sm:$0xff] }
 0x430   : > { %v3116_v39 = vadd.f32 %v6138_v28, %v3115_v34  ;;  %v3348_v53 = vrot.slane %v3347_v54, 1  ;;  %v3353_v8 = vrot.slane %v3352_v4, 4  ;;  %6005 = vpow2.f32 %v3465_v14 }
 0x431   : > { %3666 = vmatpush.msrb.mxu0 %v7782_v31  ;;  %6007 = vpow2.f32 %v3463_v19  ;;  %v3359_v34 = vsel %vm392_vm0, %v7784_v46, -inf }
 0x432   : > { %v3212_v27 = vmax.f32 %v3116_v39, 0.0  ;;  %v3349_v32 = vmax.f32 %v3347_v54, %v3348_v53  ;;  %v3354_v29 = vmax.f32 %v3352_v4, %v3353_v8  ;;  %5736 = vmatmul.msk.f32.vlgmr.msrb.gmra.mxu0 %vm1222_vm1, %v6807_v15  ;;  %v3213_v4 = vmax.f32 %v3136_v48, 0.0 }
 0x434   : > { %v7788_v23 = vadd.f32 1e-07, %v3212_v27  ;;  %v3415_v36 = vsub.f32 %v7747_v49, %v3349_v32  ;;  %v3416_v14 = vsub.f32 %v7750_v40, %v3349_v32  ;;  %v3355_v1 = vrot.slane %v3354_v29, 2 }
 0x435   : > { %v7804_v9 = vadd.f32 1e-07, %v3213_v4 }
 0x436   : > { %v3360_v54 = vsel %vm392_vm0, %v7788_v23, -inf  ;;  %v3469_v0 = vmul.f32 1.442695, %v3416_v14  ;;  %v3356_v19 = vmax.f32 %v3354_v29, %v3355_v1  ;;  %v3138_v39 = vpop.f32.mrf.mxu3  ;;  %v7798_v8 = vpop.eup %6005  ;;  %v3467_v27 = vmul.f32 1.442695, %v3415_v36  ;;  %v6141_v14 = vld [vmem:[%s6217_s11 + $0xe0] sm:$0xff] }
 0x437   : > { %v3361_v28 = vmax.f32 %v3359_v34, %v3360_v54  ;;  %v3158_v53 = vpop.f32.mrf.mxu2  ;;  %v3139_v61 = vadd.f32 %v6140_v56, %v3138_v39  ;;  %3685 = vmatpush.msrb.mxu1 %v7798_v8  ;;  %v7802_v55 = vpop.eup %6007 }
 0x438   : > { %v3357_v32 = vrot.slane %v3356_v19, 1  ;;  %6009 = vpow2.f32 %v3469_v0  ;;  %v3159_v29 = vadd.f32 %v6141_v14, %v3158_v53  ;;  %v6142_v14 = vld [vmem:[%s6217_s11 + $0xe8] sm:$0xff] }
 0x439   : > { %v3362_v21 = vrot.slane %v3361_v28, 4  ;;  %v3214_v48 = vmax.f32 %v3139_v61, 0.0  ;;  %3686 = vmatpush.msrb.mxu1 %v7802_v55  ;;  %6011 = vpow2.f32 %v3467_v27  ;;  %v3368_v61 = vsel %vm392_vm0, %v7804_v9, -inf }
 0x43a   : > { %v3358_v1 = vmax.f32 %v3356_v19, %v3357_v32  ;;  %5737 = vmatmul.msk.f32.vlgmr.msrb.gmra.mxu1 %vm1222_vm1, %v6847_v57  ;;  %v3215_v19 = vmax.f32 %v3159_v29, 0.0 }
 0x43b   : > { %v3363_v34 = vmax.f32 %v3361_v28, %v3362_v21  ;;  %v7808_v36 = vadd.f32 1e-07, %v3214_v48 }
 0x43c   : > { %v3417_v54 = vsub.f32 %v7765_v30, %v3358_v1  ;;  %v3418_v0 = vsub.f32 %v7768_v41, %v3358_v1  ;;  %v7824_v26 = vadd.f32 1e-07, %v3215_v19 }
 0x43d   : > { %v3364_v4 = vrot.slane %v3363_v34, 2  ;;  %v3369_v21 = vsel %vm392_vm0, %v7808_v36, -inf }
 0x43e   : > { %v3473_v28 = vmul.f32 1.442695, %v3418_v0  ;;  %v3370_v53 = vmax.f32 %v3368_v61, %v3369_v21  ;;  %v3181_v56 = vpop.f32.mrf.mxu3  ;;  %v7818_v32 = vpop.eup %6009  ;;  %v3471_v48 = vmul.f32 1.442695, %v3417_v54  ;;  %v6143_v0 = vld [vmem:[%s6217_s11 + $0xf0] sm:$0xff] }
 0x43f   : > { %v3365_v39 = vmax.f32 %v3363_v34, %v3364_v4  ;;  %v3161_v27 = vpop.f32.mrf.mxu2  ;;  %3705 = vmatpush.msra.mxu2 %v7818_v32  ;;  %v7822_v25 = vpop.eup %6011  ;;  %v3182_v34 = vadd.f32 %v6143_v0, %v3181_v56 }
 0x440   : > { %v3162_v30 = vadd.f32 %v6142_v14, %v3161_v27  ;;  %v3371_v57 = vrot.slane %v3370_v53, 4  ;;  %6013 = vpow2.f32 %v3473_v28 }
 0x441   : > { %v3366_v1 = vrot.slane %v3365_v39, 1  ;;  %3706 = vmatpush.msra.mxu2 %v7822_v25  ;;  %6015 = vpow2.f32 %v3471_v48 }
 0x442   : > { %v3216_v29 = vmax.f32 %v3162_v30, 0.0  ;;  %v3372_v61 = vmax.f32 %v3370_v53, %v3371_v57  ;;  %5738 = vmatmul.msk.f32.vlgmr.msra.gmra.mxu2 %vm1222_vm1, %v8580_v52  ;;  %v3377_v30 = vsel %vm392_vm0, %v7824_v26, -inf }
 0x443   : > { %v3367_v4 = vmax.f32 %v3365_v39, %v3366_v1  ;;  %v3217_v39 = vmax.f32 %v3182_v34, 0.0 }
 0x444   : > { %v7828_v54 = vadd.f32 1e-07, %v3216_v29  ;;  %v3373_v19 = vrot.slane %v3372_v61, 2  ;;  %v6144_v29 = vld [vmem:[%s6217_s11 + $0xf8] sm:$0xff] }
 0x445   : > { %v3419_v21 = vsub.f32 %v7784_v46, %v3367_v4  ;;  %v3420_v28 = vsub.f32 %v7788_v23, %v3367_v4  ;;  %v7844_v16 = vadd.f32 1e-07, %v3217_v39 }
 0x446   : > { %v3378_v57 = vsel %vm392_vm0, %v7828_v54, -inf  ;;  %v3374_v27 = vmax.f32 %v3372_v61, %v3373_v19  ;;  %v3184_v48 = vpop.f32.mrf.mxu3  ;;  %v7838_v14 = vpop.eup %6013 }
 0x447   : > { %v3477_v53 = vmul.f32 1.442695, %v3420_v28  ;;  %v3379_v56 = vmax.f32 %v3377_v30, %v3378_v57  ;;  %v3475_v1 = vmul.f32 1.442695, %v3419_v21  ;;  %v3185_v0 = vadd.f32 %v6144_v29, %v3184_v48  ;;  %3725 = vmatpush.msra.mxu3 %v7838_v14  ;;  %v7842_v4 = vpop.eup %6015 }
 0x448   : > { %v3375_v52 = vrot.slane %v3374_v27, 1  ;;  %v3386_v57 = vsel %vm392_vm0, %v7844_v16, -inf }
 0x449   : > { %v3380_v41 = vrot.slane %v3379_v56, 4  ;;  %6017 = vpow2.f32 %v3477_v53  ;;  %v3218_v22 = vmax.f32 %v3185_v0, 0.0  ;;  %3726 = vmatpush.msra.mxu3 %v7842_v4 }
 0x44a   : > { %v3376_v34 = vmax.f32 %v3374_v27, %v3375_v52  ;;  %6019 = vpow2.f32 %v3475_v1  ;;  %5739 = vmatmul.msk.f32.vlgmr.msra.gmra.mxu3 %vm1222_vm1, %v6924_v45 }
 0x44b   : > { %v3381_v28 = vmax.f32 %v3379_v56, %v3380_v41  ;;  %v7847_v61 = vadd.f32 1e-07, %v3218_v22 }
 0x44c   : > { %v3421_v21 = vsub.f32 %v7804_v9, %v3376_v34  ;;  %v3422_v19 = vsub.f32 %v7808_v36, %v3376_v34 }
 0x44d   : > { %v3382_v30 = vrot.slane %v3381_v28, 2  ;;  %v3387_v52 = vsel %vm392_vm0, %v7847_v61, -inf }
 0x44e   : > { %v3481_v41 = vmul.f32 1.442695, %v3422_v19  ;;  %v3388_v53 = vmax.f32 %v3386_v57, %v3387_v52  ;;  %v3479_v22 = vmul.f32 1.442695, %v3421_v21 }
 0x44f   : > { %v3383_v39 = vmax.f32 %v3381_v28, %v3382_v30  ;;  %v6018_v27 = vpop.eup %6017 }
 0x450   : > { %v3389_v48 = vrot.slane %v3388_v53, 4  ;;  %3745 = vmatpush.msra.mxu0 %v6018_v27  ;;  %v6020_v1 = vpop.eup %6019  ;;  %6021 = vpow2.f32 %v3481_v41 }
 0x451   : > { %v3384_v56 = vrot.slane %v3383_v39, 1  ;;  %6023 = vpow2.f32 %v3479_v22 }
 0x452   : > { %v3390_v0 = vmax.f32 %v3388_v53, %v3389_v48  ;;  %3746 = vmatpush.msra.mxu0 %v6020_v1  ;;  %v3828_v53 = vmul.f32 %v7778_v12, %v7718_v44  ;;  %v8646_v48 = vld [vmem:[#allocation38_spill] sm:$0xff] }
 0x453   : > { %v3385_v29 = vmax.f32 %v3383_v39, %v3384_v56  ;;  %5740 = vmatmul.msk.f32.vlgmr.msra.gmra.mxu0 %vm1222_vm1, %v6916_v3  ;;  %v3836_v56 = vmul.f32 %v6018_v27, %v7788_v23 }
 0x454   : > { %v3391_v28 = vrot.slane %v3390_v0, 2  ;;  %3857 = vmatpush.msrb.mxu0 %v7606_v47 }
 0x455   : > { %v3423_v34 = vsub.f32 %v7824_v26, %v3385_v29  ;;  %v3424_v19 = vsub.f32 %v7828_v54, %v3385_v29 }
 0x456   : > { %v3392_v30 = vmax.f32 %v3390_v0, %v3391_v28  ;;  %3858 = vmatpush.msrb.mxu0 %v7604_v63  ;;  %v6022_v57 = vpop.eup %6021 }
 0x457   : > { %v3485_v21 = vmul.f32 1.442695, %v3424_v19  ;;  %v3483_v52 = vmul.f32 1.442695, %v3423_v34  ;;  %3765 = vmatpush.msra.mxu1 %v6022_v57  ;;  %v6024_v39 = vpop.eup %6023 }
 0x458   : > { %3937 = vmatpush.msra.mxu0 %v7696_v5  ;;  %v3393_v41 = vrot.slane %v3392_v30, 1 }
 0x459   : > { %6025 = vpow2.f32 %v3485_v21  ;;  %3766 = vmatpush.msra.mxu1 %v6024_v39 }
 0x45a   : > { %3938 = vmatpush.msra.mxu0 %v7693_v59  ;;  %v3394_v22 = vmax.f32 %v3392_v30, %v3393_v41  ;;  %6027 = vpow2.f32 %v3483_v52  ;;  %5741 = vmatmul.msk.f32.vlgmr.msra.gmra.mxu1 %vm1222_vm1, %v6951_v11  ;;  %v3827_v59 = vmul.f32 %v7782_v31, %v7707_v50  ;;  %v3835_v50 = vmul.f32 %v6020_v1, %v7784_v46  ;;  %v8648_v30 = vld [vmem:[#allocation37_spill] sm:$0xff] }
 0x45b   : > { %5744 = vmatmul.msk.f32.vlgmr.msrb.gmra.mxu0 %vm1222_vm1, %v6715_v10  ;;  %3877 = vmatpush.msrb.mxu1 %v7643_v38  ;;  %v3830_v38 = vmul.f32 %v7798_v8, %v7730_v2  ;;  %v3831_v46 = vmul.f32 %v7822_v25, %v7747_v49  ;;  %v8641_v25 = vld [vmem:[#allocation43_spill] sm:$0xff]  ;;  %v8642_v49 = vld [vmem:[#allocation46_spill] sm:$0xff]  ;;  %v8647_v1 = vmax.f32 %v8646_v48, 0.0 }
 0x45c   : > { %v3425_v5 = vsub.f32 %v7844_v16, %v3394_v22  ;;  %v3426_v63 = vsub.f32 %v7847_v61, %v3394_v22  ;;  %4017 = vmatpush.msrb.mxu0 %v3828_v53 }
 0x45d   : > { %3878 = vmatpush.msrb.mxu1 %v7640_v7  ;;  %v3829_v7 = vmul.f32 %v7802_v55, %v7727_v17  ;;  %v3838_v55 = vmul.f32 %v6022_v57, %v7808_v36  ;;  %v8649_v57 = vmax.f32 %v8648_v30, 0.0  ;;  %v8664_v30 = vld [vmem:[#allocation42_spill] sm:$0xff] }
 0x45e   : > { %v3489_v47 = vmul.f32 1.442695, %v3426_v63  ;;  %4018 = vmatpush.msrb.mxu0 %v3827_v59  ;;  %v3487_v12 = vmul.f32 1.442695, %v3425_v5 }
 0x45f   : > { %v6026_v44 = vpop.eup %6025  ;;  %3957 = vmatpush.msra.mxu1 %v7716_v13  ;;  %v8640_v13 = vld [vmem:[#allocation41_spill] sm:$0xff] }
 0x460   : > { %3785 = vmatpush.msrb.mxu2 %v6026_v44  ;;  %v6028_v10 = vpop.eup %6027  ;;  %6029 = vpow2.f32 %v3489_v47 }
 0x461   : > { %3958 = vmatpush.msra.mxu1 %v7713_v18  ;;  %6031 = vpow2.f32 %v3487_v12  ;;  %v3839_v17 = vmul.f32 %v6028_v10, %v7824_v26  ;;  %v2816_v26 = vld [vmem:[%s8418_s4] sm:$0xff] }
 0x462   : > { %3786 = vmatpush.msrb.mxu2 %v6028_v10  ;;  %5745 = vmatmul.msk.f32.vlgmr.msrb.gmra.mxu1 %vm1222_vm1, %v8567_v37 }
 0x463   : > { %5742 = vmatmul.msk.f32.vlgmr.msrb.gmra.mxu2 %vm1222_vm1, %v6949_v33  ;;  %5748 = vmatmul.msk.f32.vlgmr.msra.gmra.mxu0 %vm1222_vm1, %v6771_v60  ;;  %v3832_v60 = vmul.f32 %v7818_v32, %v7750_v40 }
 0x464   : > { %3897 = vmatpush.msra.mxu2 %v7662_v62  ;;  %4037 = vmatpush.msrb.mxu1 %v3830_v38  ;;  %v8638_v62 = vld [vmem:[#allocation2_spill] sm:$0xff] }
 0x465   : > { %4097 = vmatpush.msra.mxu0 %v3836_v56 }
 0x466   : > { %3898 = vmatpush.msra.mxu2 %v7659_v43  ;;  %v6030_v18 = vpop.eup %6029  ;;  %4038 = vmatpush.msrb.mxu1 %v3829_v7  ;;  %v3837_v43 = vmul.f32 %v6024_v39, %v7804_v9  ;;  %v8643_v9 = vld [vmem:[#allocation4_spill] sm:$0xff] }
 0x467   : > { %4098 = vmatpush.msra.mxu0 %v3835_v50  ;;  %3805 = vmatpush.msrb.mxu3 %v6030_v18  ;;  %v6032_v37 = vpop.eup %6031  ;;  %v3842_v2 = vmul.f32 %v6030_v18, %v7847_v61  ;;  %v8652_v18 = vld [vmem:[#allocation34_spill] sm:$0xff] }
 0x468   : > { %3977 = vmatpush.msrb.mxu2 %v7738_v20  ;;  %v8645_v20 = vld [vmem:[#allocation48_spill] sm:$0xff]  ;;  %v3841_v40 = vmul.f32 %v6032_v37, %v7844_v16 }
 0x469   : > { %3806 = vmatpush.msrb.mxu3 %v6032_v37  ;;  %v8653_v37 = vmax.f32 %v8652_v18, 0.0 }
 0x46a   : > { %3978 = vmatpush.msrb.mxu2 %v7735_v58  ;;  %5743 = vmatmul.msk.f32.vlgmr.msrb.gmra.mxu3 %vm1222_vm1, %v6977_v51  ;;  %v8644_v58 = vld [vmem:[#allocation47_spill] sm:$0xff] }
 0x46b   : > { %5746 = vmatmul.msk.f32.vlgmr.msra.gmra.mxu2 %vm1222_vm1, %v6756_v6  ;;  %3917 = vmatpush.msra.mxu3 %v7682_v24  ;;  %v8637_v6 = vld [vmem:[#allocation3_spill] sm:$0xff]  ;;  %v8639_v24 = vld [vmem:[#allocation10_spill] sm:$0xff] }
 0x46c   : > { %5749 = vmatmul.msk.f32.vlgmr.msra.gmra.mxu1 %vm1222_vm1, %v8579_v35  ;;  %5752 = vmatmul.msk.f32.vlgmr.msrb.gmra.mxu0 %vm1222_vm1, %v6807_v15  ;;  %v3834_v35 = vmul.f32 %v7838_v14, %v8639_v24  ;;  %v3840_v15 = vmul.f32 %v6026_v44, %v7828_v54  ;;  %v8650_v44 = vld [vmem:[#allocation49_spill] sm:$0xff] }
 0x46d   : > { %4057 = vmatpush.msra.mxu2 %v3832_v60  ;;  %4117 = vmatpush.msra.mxu1 %v3838_v55  ;;  %v8651_v12 = vmax.f32 %v8650_v44, 0.0 }
 0x46e   : > { %3918 = vmatpush.msra.mxu3 %v7679_v42  ;;  %v3833_v42 = vmul.f32 %v7842_v4, %v8643_v9  ;;  %4290 = vmatpush.msrb.mxu0 %v2816_v26  ;;  %v8656_v9 = vld [vmem:[#allocation50_spill] sm:$0xff] }
 0x46f   : > { %4058 = vmatpush.msra.mxu2 %v3831_v46  ;;  %4118 = vmatpush.msra.mxu1 %v3837_v43 }
 0x470   : > { %3997 = vmatpush.msrb.mxu3 %v8637_v6 }
 0x472   : > { %3998 = vmatpush.msrb.mxu3 %v8638_v62  ;;  %v8654_v62 = vld [vmem:[#allocation39_spill] sm:$0xff] }
 0x473   : > { %5747 = vmatmul.msk.f32.vlgmr.msra.gmra.mxu3 %vm1222_vm1, %v8640_v13  ;;  %5750 = vmatmul.msk.f32.vlgmr.msrb.gmra.mxu2 %vm1222_vm1, %v8641_v25  ;;  %v8655_v24 = vmax.f32 %v8654_v62, 0.0 }
 0x474   : > { %5753 = vmatmul.msk.f32.vlgmr.msrb.gmra.mxu1 %vm1222_vm1, %v8642_v49  ;;  %4077 = vmatpush.msra.mxu3 %v3834_v35 }
 0x475   : > { %5756 = vmatmul.msk.f32.vlgmr.msra.gmra.mxu0 %vm1222_vm1, %v6916_v3  ;;  %4137 = vmatpush.msrb.mxu2 %v3840_v15  ;;  %v3508_v3 = vpop.f32.mrf.mxu0 }
 0x476   : > { %4078 = vmatpush.msra.mxu3 %v3833_v42  ;;  %v4163_v8 = vmax.f32 %v3508_v3, 1e-12  ;;  %v8657_v42 = vmax.f32 %v8656_v9, 0.0  ;;  %v8658_v3 = vld [vmem:[#allocation35_spill] sm:$0xff] }
 0x477   : > { %4138 = vmatpush.msrb.mxu2 %v3839_v17  ;;  %v8659_v26 = vmax.f32 %v8658_v3, 0.0 }
 0x478   : > { %6033 = vrcp.f32 %v4163_v8 }
 0x47b   : > { %5751 = vmatmul.msk.f32.vlgmr.msrb.gmra.mxu3 %vm1222_vm1, %v8644_v58  ;;  %5754 = vmatmul.msk.f32.vlgmr.msra.gmra.mxu2 %vm1222_vm1, %v8645_v20 }
 0x47c   : > { %5757 = vmatmul.msk.f32.vlgmr.msra.gmra.mxu1 %vm1222_vm1, %v6951_v11  ;;  %4157 = vmatpush.msrb.mxu3 %v3842_v2  ;;  %v3528_v11 = vpop.f32.mrf.mxu1 }
 0x47e   : > { %4158 = vmatpush.msrb.mxu3 %v3841_v40  ;;  %v6034_v14 = vpop.eup %6033 }
 0x47f   : > { %v3548_v36 = vpop.f32.mrf.mxu2 }
 0x480   : > { %v4165_v41 = vmax.f32 %v3548_v36, 1e-12 }
 0x483   : > { %5755 = vmatmul.msk.f32.vlgmr.msra.gmra.mxu3 %vm1222_vm1, %v6924_v45  ;;  %5758 = vmatmul.msk.f32.vlgmr.msrb.gmra.mxu2 %vm1222_vm1, %v6949_v33  ;;  %v4164_v33 = vmax.f32 %v3528_v11, 1e-12 }
 0x485   : > { %6035 = vrcp.f32 %v4164_v33  ;;  %v8660_v33 = vld [vmem:[#allocation45_spill] sm:$0xff] }
 0x486   : > { %6037 = vrcp.f32 %v4165_v41 }
 0x48a   : > { %v3588_v31 = vpop.f32.mrf.mxu0 }
 0x48b   : > { %5759 = vmatmul.msk.f32.vlgmr.msrb.gmra.mxu3 %vm1222_vm1, %v6977_v51  ;;  %v3568_v51 = vpop.f32.mrf.mxu3  ;;  %v6036_v19 = vpop.eup %6035  ;;  %v4167_v38 = vmax.f32 %v3588_v31, 1e-12 }
 0x48c   : > { %v4166_v22 = vmax.f32 %v3568_v51, 1e-12  ;;  %v6038_v5 = vpop.eup %6037  ;;  %v8661_v51 = vmax.f32 %v8660_v33, 0.0 }
 0x48e   : > { %6039 = vrcp.f32 %v4166_v22 }
 0x48f   : > { %6041 = vrcp.f32 %v4167_v38 }
 0x493   : > { %v3608_v23 = vpop.f32.mrf.mxu1 }
 0x494   : > { %v6040_v56 = vpop.eup %6039  ;;  %v4168_v55 = vmax.f32 %v3608_v23, 1e-12 }
 0x495   : > { %v6042_v43 = vpop.eup %6041 }
 0x496   : > { %6043 = vrcp.f32 %v4168_v55  ;;  %v8670_v55 = vld [vmem:[#allocation5_spill] sm:$0xff] }
 0x49c   : > { %v6044_v25 = vpop.eup %6043 }
 0x4a2   : > { %v3628_v54 = vpop.f32.mrf.mxu2 }
 0x4a3   : > { %v4169_v15 = vmax.f32 %v3628_v54, 1e-12 }
 0x4a5   : > { %6045 = vrcp.f32 %v4169_v15 }
 0x4ab   : > { %v6046_v20 = vpop.eup %6045 }
 0x4ae   : > { %v3648_v0 = vpop.f32.mrf.mxu3 }
 0x4af   : > { %v7944_v16 = vpop.f32.mrf.mxu0  ;;  %v4170_v2 = vmax.f32 %v3648_v0, 1e-12 }
 0x4b0   : > { %v4171_v31 = vmax.f32 %v7944_v16, 1e-12 }
 0x4b1   : > { %6047 = vrcp.f32 %v4170_v2 }
 0x4b2   : > { %6049 = vrcp.f32 %v4171_v31 }
 0x4b7   : > { %v7946_v45 = vpop.f32.mrf.mxu1  ;;  %v6048_v8 = vpop.eup %6047 }
 0x4c5   : > { %v7955_v34 = vpop.f32.mrf.mxu2 }
 0x4c6   : > { %v4173_v0 = vmax.f32 %v7955_v34, 1e-12 }
 0x4cd   : > { %v7960_v39 = vpop.f32.mrf.mxu3 }
 0x4d0   : > { %v7948_v32 = vpop.f32.mrf.mxu0 }
 0x4d1   : > { %v4175_v44 = vmax.f32 %v7948_v32, 1e-12 }
 0x4d7   : > { %v7950_v4 = vpop.f32.mrf.mxu1 }
 0x4d8   : > { %v3860_v61 = vpop.f32.mrf.mxu0 }
 0x4d9   : > { %v4195_v27 = vmul.f32 %v6034_v14, %v3860_v61  ;;  %v4172_v14 = vmax.f32 %v7946_v45, 1e-12 }
 0x4db   : > { %v4211_v29 = vadd.f32 %v4195_v27, %v8647_v1  ;;  %v6050_v27 = vpop.eup %6049  ;;  %6051 = vrcp.f32 %v4172_v14  ;;  %v8662_v1 = vld [vmem:[#allocation44_spill] sm:$0xff] }
 0x4dc   : > { %6053 = vrcp.f32 %v4173_v0 }
 0x4dd   : > { %5760 = vmatmul.msk.f32.vlgmr.msrb.gmra.mxu0 %vm392_vm0, %v4211_v29  ;;  %v8663_v29 = vmax.f32 %v8662_v1, 0.0 }
 0x4df   : > { %v3880_v28 = vpop.f32.mrf.mxu1 }
 0x4e0   : > { %v4196_v21 = vmul.f32 %v6036_v19, %v3880_v28  ;;  %v3940_v46 = vpop.f32.mrf.mxu0 }
 0x4e1   : > { %v4199_v6 = vmul.f32 %v6042_v43, %v3940_v46  ;;  %v6052_v28 = vpop.eup %6051  ;;  %v8671_v46 = vmax.f32 %v8670_v55, 0.0 }
 0x4e2   : > { %v4212_v52 = vadd.f32 %v4196_v21, %v8649_v57  ;;  %v8665_v57 = vmax.f32 %v8664_v30, 0.0  ;;  %v6054_v22 = vpop.eup %6053 }
 0x4e3   : > { %v4215_v35 = vadd.f32 %v4199_v6, %v8655_v24 }
 0x4e5   : > { %5761 = vmatmul.msk.f32.gmra.mxu0 %vm392_vm0, %v4212_v52  ;;  %v4174_v52 = vmax.f32 %v7960_v39, 1e-12 }
 0x4e6   : > { %v7962_v53 = vpop.f32.mrf.mxu2 }
 0x4e7   : > { %6055 = vrcp.f32 %v4174_v52  ;;  %v4177_v43 = vmax.f32 %v7962_v53, 1e-12 }
 0x4e8   : > { %6057 = vrcp.f32 %v4175_v44 }
 0x4e9   : > { %v3960_v13 = vpop.f32.mrf.mxu1  ;;  %v4020_v61 = vpop.f32.mrf.mxu0 }
 0x4ea   : > { %v4200_v49 = vmul.f32 %v6044_v25, %v3960_v13  ;;  %v4203_v48 = vmul.f32 %v6050_v27, %v4020_v61 }
 0x4ec   : > { %v4216_v17 = vadd.f32 %v4200_v49, %v8657_v42  ;;  %v4219_v16 = vadd.f32 %v4203_v48, %v8663_v29  ;;  %v8674_v42 = vld [vmem:[#allocation11_spill] sm:$0xff]  ;;  %v8678_v48 = vld [vmem:[#allocation36_spill] sm:$0xff] }
 0x4ed   : > { %v7964_v63 = vpop.f32.mrf.mxu3 }
 0x4ee   : > { %v3900_v59 = vpop.f32.mrf.mxu2  ;;  %v4178_v13 = vmax.f32 %v7964_v63, 1e-12 }
 0x4ef   : > { %v4197_v47 = vmul.f32 %v6038_v5, %v3900_v59  ;;  %v8666_v59 = vld [vmem:[#allocation40_spill] sm:$0xff] }
 0x4f1   : > { %v4213_v10 = vadd.f32 %v4197_v47, %v8651_v12  ;;  %v4040_v19 = vpop.f32.mrf.mxu1  ;;  %v8667_v47 = vmax.f32 %v8666_v59, 0.0 }
 0x4f2   : > { %v4204_v21 = vmul.f32 %v6052_v28, %v4040_v19  ;;  %v4100_v18 = vpop.f32.mrf.mxu0 }
 0x4f3   : > { %5762 = vmatmul.msk.f32.gmra.mxu0 %vm392_vm0, %v4213_v10  ;;  %v6056_v10 = vpop.eup %6055 }
 0x4f4   : > { %v4220_v45 = vadd.f32 %v4204_v21, %v8665_v57 }
 0x4f6   : > { %v3920_v7 = vpop.f32.mrf.mxu3  ;;  %v3980_v58 = vpop.f32.mrf.mxu2 }
 0x4f7   : > { %v4198_v50 = vmul.f32 %v6040_v56, %v3920_v7  ;;  %v4201_v40 = vmul.f32 %v6046_v20, %v3980_v58  ;;  %v8668_v56 = vld [vmem:[#allocation6_spill] sm:$0xff] }
 0x4f8   : > { %v8669_v7 = vmax.f32 %v8668_v56, 0.0 }
 0x4f9   : > { %v4214_v60 = vadd.f32 %v4198_v50, %v8653_v37  ;;  %v4217_v11 = vadd.f32 %v4201_v40, %v8659_v26  ;;  %v4176_v50 = vmax.f32 %v7950_v4, 1e-12  ;;  %v6058_v37 = vpop.eup %6057  ;;  %v4120_v6 = vpop.f32.mrf.mxu1  ;;  %v8676_v40 = vld [vmem:[#allocation8_spill] sm:$0xff] }
 0x4fa   : > { %v8677_v3 = vmax.f32 %v8676_v40, 0.0 }
 0x4fb   : > { %5763 = vmatmul.msk.f32.gmra.mxu0 %vm392_vm0, %v4214_v60  ;;  %v4207_v60 = vmul.f32 %v6058_v37, %v4100_v18  ;;  %6059 = vrcp.f32 %v4176_v50 }
 0x4fc   : > { %6061 = vrcp.f32 %v4177_v43 }
 0x4fd   : > { %v4223_v32 = vadd.f32 %v4207_v60, %v8671_v46  ;;  %6063 = vrcp.f32 %v4178_v13 }
 0x4fe   : > { %v4000_v23 = vpop.f32.mrf.mxu3  ;;  %v4060_v41 = vpop.f32.mrf.mxu2 }
 0x4ff   : > { %v4202_v36 = vmul.f32 %v6048_v8, %v4000_v23  ;;  %v4205_v5 = vmul.f32 %v6054_v22, %v4060_v41 }
 0x501   : > { %v4218_v54 = vadd.f32 %v4202_v36, %v8661_v51  ;;  %v4221_v34 = vadd.f32 %v4205_v5, %v8667_v47  ;;  %v6060_v62 = vpop.eup %6059 }
 0x502   : > { %v4208_v24 = vmul.f32 %v6060_v62, %v4120_v6  ;;  %v6062_v49 = vpop.eup %6061 }
 0x503   : > { %5764 = vmatmul.msk.f32.gmra.mxu0 %vm392_vm0, %v4215_v35  ;;  %v8672_v35 = vld [vmem:[#allocation7_spill] sm:$0xff]  ;;  %v6064_v58 = vpop.eup %6063 }
 0x504   : > { %v8673_v15 = vmax.f32 %v8672_v35, 0.0 }
 0x506   : > { %v4080_v12 = vpop.f32.mrf.mxu3  ;;  %v4224_v4 = vadd.f32 %v4208_v24, %v8673_v15  ;;  %v4140_v25 = vpop.f32.mrf.mxu2 }
 0x507   : > { %v4206_v38 = vmul.f32 %v6056_v10, %v4080_v12  ;;  %v4209_v9 = vmul.f32 %v6062_v49, %v4140_v25 }
 0x509   : > { %v4222_v39 = vadd.f32 %v4206_v38, %v8669_v7 }
 0x50b   : > { %5765 = vmatmul.msk.f32.gmra.mxu0 %vm392_vm0, %v4216_v17  ;;  %v8675_v17 = vmax.f32 %v8674_v42, 0.0 }
 0x50d   : > { %v4225_v53 = vadd.f32 %v4209_v9, %v8675_v17 }
 0x50e   : > { %v4160_v2 = vpop.f32.mrf.mxu3 }
 0x50f   : > { %v4210_v20 = vmul.f32 %v6064_v58, %v4160_v2 }
 0x511   : > { %v4226_v26 = vadd.f32 %v4210_v20, %v8677_v3 }
 0x513   : > { %5766 = vmatmul.msk.f32.gmra.mxu0 %vm392_vm0, %v4217_v11 }
 0x51b   : > { %5767 = vmatmul.msk.f32.gmra.mxu0 %vm392_vm0, %v4218_v54 }
 0x523   : > { %5768 = vmatmul.msk.f32.gmra.mxu0 %vm392_vm0, %v4219_v16 }
 0x52b   : > { %5769 = vmatmul.msk.f32.gmra.mxu0 %vm392_vm0, %v4220_v45 }
 0x533   : > { %5770 = vmatmul.msk.f32.gmra.mxu0 %vm392_vm0, %v4221_v34 }
 0x53b   : > { %5771 = vmatmul.msk.f32.gmra.mxu0 %vm392_vm0, %v4222_v39 }
 0x543   : > { %5772 = vmatmul.msk.f32.gmra.mxu0 %vm392_vm0, %v4223_v32 }
 0x54b   : > { %5773 = vmatmul.msk.f32.gmra.mxu0 %vm392_vm0, %v4224_v4 }
 0x553   : > { %5774 = vmatmul.msk.f32.gmra.mxu0 %vm392_vm0, %v4225_v53 }
 0x55a   : > { %v4292_v11 = vpop.f32.mrf.mxu0 }
 0x55b   : > { %v4340_v63 = vsel %vm1222_vm1, %v4292_v11, 0.0  ;;  %5775 = vmatmul.msk.f32.gmra.mxu0 %vm392_vm0, %v4226_v26 }
 0x55c   : > { %v4341_v31 = vrot.slane %v4340_v63, 4 }
 0x55e   : > { %v4342_v23 = vadd.f32 %v4341_v31, %v4340_v63 }
 0x560   : > { %v4343_v8 = vrot.slane %v4342_v23, 2 }
 0x562   : > { %v4344_v36 = vadd.f32 %v4343_v8, %v4342_v23  ;;  %v4295_v33 = vpop.f32.mrf.mxu0 }
 0x563   : > { %v4347_v51 = vsel %vm1222_vm1, %v4295_v33, 0.0 }
 0x564   : > { %v4345_v54 = vrot.slane %v4344_v36, 1  ;;  %v4348_v14 = vrot.slane %v4347_v51, 4 }
 0x566   : > { %v4346_v61 = vadd.f32 %v4345_v54, %v4344_v36  ;;  %v4349_v27 = vadd.f32 %v4348_v14, %v4347_v51 }
 0x568   : > { %v4452_v1 = vmul.f32 %v4346_v61, %v8678_v48  ;;  %v4350_v29 = vrot.slane %v4349_v27, 2 }
 0x56a   : > { %v8019_v16 = vsub.f32 %v4292_v11, %v4452_v1  ;;  %v4351_v0 = vadd.f32 %v4350_v29, %v4349_v27 }
 0x56c   : > { %v4484_v19 = vmul.f32 %v8019_v16, %v8019_v16  ;;  %v4352_v28 = vrot.slane %v4351_v0, 1 }
 0x56e   : > { %v4500_v21 = vsel %vm1222_vm1, %v4484_v19, 0.0  ;;  %v4353_v30 = vadd.f32 %v4352_v28, %v4351_v0 }
 0x56f   : > { %v4501_v57 = vrot.slane %v4500_v21, 4 }
 0x570   : > { %v4453_v45 = vmul.f32 %v4353_v30, %v8678_v48  ;;  %v4298_v52 = vpop.f32.mrf.mxu0  ;;  %v2818_v30 = vld [vmem:[%s8419_s5 + $0x8] sm:$0xff] }
 0x571   : > { %v4502_v41 = vadd.f32 %v4501_v57, %v4500_v21  ;;  %v4354_v22 = vsel %vm1222_vm1, %v4298_v52, 0.0  ;;  %4933 = vmatpush.msrb.mxu1 %v2818_v30 }
 0x572   : > { %v8026_v5 = vsub.f32 %v4295_v33, %v4453_v45  ;;  %v4355_v59 = vrot.slane %v4354_v22, 4 }
 0x573   : > { %v4503_v47 = vrot.slane %v4502_v41, 2 }
 0x574   : > { %v4485_v34 = vmul.f32 %v8026_v5, %v8026_v5  ;;  %v4356_v44 = vadd.f32 %v4355_v59, %v4354_v22 }
 0x575   : > { %v4504_v12 = vadd.f32 %v4503_v47, %v4502_v41 }
 0x576   : > { %v4507_v10 = vsel %vm1222_vm1, %v4485_v34, 0.0  ;;  %v4357_v38 = vrot.slane %v4356_v44, 2  ;;  %v2817_v34 = vld [vmem:[%s8419_s5] sm:$0xff] }
 0x577   : > { %v4505_v56 = vrot.slane %v4504_v12, 1  ;;  %v4508_v7 = vrot.slane %v4507_v10, 4  ;;  %4934 = vmatpush.msrb.mxu1 %v2817_v34 }
 0x578   : > { %v4358_v39 = vadd.f32 %v4357_v38, %v4356_v44  ;;  %v4301_v50 = vpop.f32.mrf.mxu0  ;;  %v8066_v38 = vld [vmem:[%s8421_s7] sm:$0xff] }
 0x579   : > { %v4506_v18 = vadd.f32 %v4505_v56, %v4504_v12  ;;  %v4509_v37 = vadd.f32 %v4508_v7, %v4507_v10  ;;  %v4361_v60 = vsel %vm1222_vm1, %v4301_v50, 0.0  ;;  %v8069_v56 = vperm.slane %v8066_v38, 3 }
 0x57a   : > { %v4359_v55 = vrot.slane %v4358_v39, 1  ;;  %v4362_v46 = vrot.slane %v4361_v60, 4 }
 0x57b   : > { %v4612_v32 = vmul.f32 %v4506_v18, %v8678_v48  ;;  %v4510_v43 = vrot.slane %v4509_v37, 2 }
 0x57c   : > { %v4360_v6 = vadd.f32 %v4359_v55, %v4358_v39  ;;  %v4363_v62 = vadd.f32 %v4362_v46, %v4361_v60 }
 0x57d   : > { %v4628_v24 = vadd.f32 1e-05, %v4612_v32  ;;  %v4511_v35 = vadd.f32 %v4510_v43, %v4509_v37  ;;  %v8072_v37 = vperm.slane %v8066_v38, 4 }
 0x57e   : > { %v4454_v15 = vmul.f32 %v4360_v6, %v8678_v48  ;;  %v4364_v4 = vrot.slane %v4363_v62, 2 }
 0x57f   : > { %6065 = vrsqrt.f32 %v4628_v24  ;;  %v4512_v13 = vrot.slane %v4511_v35, 1  ;;  %vm4650_vm10 = vweird.f32 %v4628_v24 }
 0x580   : > { %v8034_v25 = vsub.f32 %v4298_v52, %v4454_v15  ;;  %v4365_v49 = vadd.f32 %v4364_v4, %v4363_v62  ;;  %v4304_v9 = vpop.f32.mrf.mxu0 }
 0x581   : > { %v4513_v42 = vadd.f32 %v4512_v13, %v4511_v35  ;;  %v4368_v17 = vsel %vm1222_vm1, %v4304_v9, 0.0 }
 0x582   : > { %v4486_v53 = vmul.f32 %v8034_v25, %v8034_v25  ;;  %v4366_v2 = vrot.slane %v4365_v49, 1  ;;  %v4369_v58 = vrot.slane %v4368_v17, 4 }
 0x583   : > { %v4613_v20 = vmul.f32 %v4513_v42, %v8678_v48 }
 0x584   : > { %v4514_v40 = vsel %vm1222_vm1, %v4486_v53, 0.0  ;;  %v4367_v3 = vadd.f32 %v4366_v2, %v4365_v49  ;;  %v4370_v26 = vadd.f32 %v4369_v58, %v4368_v17 }
 0x585   : > { %v6066_v11 = vpop.eup %6065  ;;  %v8041_v63 = vadd.f32 1e-05, %v4613_v20  ;;  %v4515_v31 = vrot.slane %v4514_v40, 4 }
 0x586   : > { %v4645_v23 = vmul.f32 %v6066_v11, %v4628_v24  ;;  %v4455_v8 = vmul.f32 %v4367_v3, %v8678_v48  ;;  %v4371_v36 = vrot.slane %v4370_v26, 2  ;;  %vm4651_vm9 = vweird.f32 %v6066_v11 }
 0x587   : > { %6067 = vrsqrt.f32 %v8041_v63  ;;  %v4516_v33 = vadd.f32 %v4515_v31, %v4514_v40  ;;  %vm4652_vm11 = vmor %vm4650_vm10, %vm4651_vm9  ;;  %vm4660_vm13 = vweird.f32 %v8041_v63 }
 0x588   : > { %v4646_v51 = vmul.f32 %v6066_v11, %v4645_v23  ;;  %v8045_v54 = vsub.f32 %v4301_v50, %v4455_v8  ;;  %v4372_v14 = vadd.f32 %v4371_v36, %v4370_v26  ;;  %v8047_v61 = vpop.f32.mrf.mxu0 }
 0x589   : > { %v4517_v27 = vrot.slane %v4516_v33, 2  ;;  %v4375_v1 = vsel %vm1222_vm1, %v8047_v61, 0.0 }
 0x58a   : > { %v4647_v29 = vmul.f32 0.5, %v4646_v51  ;;  %v4487_v0 = vmul.f32 %v8045_v54, %v8045_v54  ;;  %v4373_v19 = vrot.slane %v4372_v14, 1  ;;  %v4376_v28 = vrot.slane %v4375_v1, 4 }
 0x58b   : > { %v4518_v21 = vadd.f32 %v4517_v27, %v4516_v33 }
 0x58c   : > { %v4648_v57 = vsub.f32 1.5, %v4647_v29  ;;  %v4521_v45 = vsel %vm1222_vm1, %v4487_v0, 0.0  ;;  %v4374_v52 = vadd.f32 %v4373_v19, %v4372_v14  ;;  %v4377_v41 = vadd.f32 %v4376_v28, %v4375_v1 }
 0x58d   : > { %v6068_v22 = vpop.eup %6067  ;;  %v4519_v59 = vrot.slane %v4518_v21, 1  ;;  %v4522_v47 = vrot.slane %v4521_v45, 4 }
 0x58e   : > { %v4649_v44 = vmul.f32 %v6066_v11, %v4648_v57  ;;  %v4655_v12 = vmul.f32 %v6068_v22, %v8041_v63  ;;  %v4456_v10 = vmul.f32 %v4374_v52, %v8678_v48  ;;  %v4378_v50 = vrot.slane %v4377_v41, 2 }
 0x58f   : > { %v4520_v7 = vadd.f32 %v4519_v59, %v4518_v21  ;;  %v4523_v39 = vadd.f32 %v4522_v47, %v4521_v45  ;;  %vm4661_vm12 = vweird.f32 %v6068_v22 }
 0x590   : > { %v4653_v18 = vsel %vm4652_vm11, %v6066_v11, %v4649_v44  ;;  %v4656_v60 = vmul.f32 %v6068_v22, %v4655_v12  ;;  %v8074_v55 = vsub.f32 %v4304_v9, %v4456_v10  ;;  %v8076_v46 = vpop.f32.mrf.mxu0  ;;  %v4379_v62 = vadd.f32 %v4378_v50, %v4377_v41  ;;  %vm4662_vm14 = vmor %vm4660_vm13, %vm4661_vm12 }
 0x591   : > { %v4804_v32 = vmul.f32 %v4653_v18, %v8019_v16  ;;  %v4614_v43 = vmul.f32 %v4520_v7, %v8678_v48  ;;  %v4524_v6 = vrot.slane %v4523_v39, 2  ;;  %v4382_v15 = vsel %vm1222_vm1, %v8076_v46, 0.0 }
 0x592   : > { %v4657_v24 = vmul.f32 0.5, %v4656_v60  ;;  %v4488_v35 = vmul.f32 %v8074_v55, %v8074_v55  ;;  %v4380_v9 = vrot.slane %v4379_v62, 1  ;;  %v4383_v17 = vrot.slane %v4382_v15, 4 }
 0x593   : > { %v4821_v4 = vmul.f32 %v8069_v56, %v4804_v32  ;;  %v8085_v13 = vadd.f32 1e-05, %v4614_v43  ;;  %v4525_v49 = vadd.f32 %v4524_v6, %v4523_v39 }
 0x594   : > { %v4658_v42 = vsub.f32 1.5, %v4657_v24  ;;  %v4528_v16 = vsel %vm1222_vm1, %v4488_v35, 0.0  ;;  %v4381_v40 = vadd.f32 %v4380_v9, %v4379_v62  ;;  %v4384_v3 = vadd.f32 %v4383_v17, %v4382_v15 }
 0x595   : > { %v4838_v53 = vadd.f32 %v8072_v37, %v4821_v4  ;;  %6069 = vrsqrt.f32 %v8085_v13  ;;  %v4526_v2 = vrot.slane %v4525_v49, 1  ;;  %v4529_v20 = vrot.slane %v4528_v16, 4 }
 0x596   : > { %v4659_v58 = vmul.f32 %v6068_v22, %v4658_v42  ;;  %v4457_v8 = vmul.f32 %v4381_v40, %v8678_v48  ;;  %v4385_v36 = vrot.slane %v4384_v3, 2  ;;  %vm4670_vm2 = vweird.f32 %v8085_v13 }
 0x597   : > { %v4854_v26 = vmax.f32 %v4838_v53, 0.0  ;;  %v4527_v11 = vadd.f32 %v4526_v2, %v4525_v49  ;;  %v4530_v23 = vadd.f32 %v4529_v20, %v4528_v16 }
 0x598   : > { %v4663_v31 = vsel %vm4662_vm14, %v6068_v22, %v4659_v58  ;;  %v8092_v33 = vpop.f32.mrf.mxu0  ;;  %v8100_v1 = vsub.f32 %v8047_v61, %v4457_v8  ;;  %v4386_v29 = vadd.f32 %v4385_v36, %v4384_v3 }
 0x599   : > { %v4805_v51 = vmul.f32 %v4663_v31, %v8026_v5  ;;  %v4615_v63 = vmul.f32 %v4527_v11, %v8678_v48  ;;  %v4389_v14 = vsel %vm1222_vm1, %v8092_v33, 0.0  ;;  %5776 = vmatmul.msk.f32.vlgmr.msrb.gmra.mxu1 %vm1222_vm1, %v4854_v26  ;;  %v4531_v27 = vrot.slane %v4530_v23, 2 }
 0x59a   : > { %v4390_v0 = vrot.slane %v4389_v14, 4  ;;  %v4489_v57 = vmul.f32 %v8100_v1, %v8100_v1  ;;  %v4387_v52 = vrot.slane %v4386_v29, 1 }
 0x59b   : > { %v6070_v19 = vpop.eup %6069  ;;  %v4822_v28 = vmul.f32 %v8069_v56, %v4805_v51  ;;  %v8103_v21 = vadd.f32 1e-05, %v4615_v63  ;;  %v4532_v30 = vadd.f32 %v4531_v27, %v4530_v23 }
 0x59c   : > { %v4665_v5 = vmul.f32 %v6070_v19, %v8085_v13  ;;  %v4535_v22 = vsel %vm1222_vm1, %v4489_v57, 0.0  ;;  %v4391_v59 = vadd.f32 %v4390_v0, %v4389_v14  ;;  %v4388_v34 = vadd.f32 %v4387_v52, %v4386_v29 }
 0x59d   : > { %v4839_v45 = vadd.f32 %v8072_v37, %v4822_v28  ;;  %6071 = vrsqrt.f32 %v8103_v21  ;;  %v4533_v41 = vrot.slane %v4532_v30, 1  ;;  %v4536_v47 = vrot.slane %v4535_v22, 4 }
 0x59e   : > { %v4666_v61 = vmul.f32 %v6070_v19, %v4665_v5  ;;  %v4392_v7 = vrot.slane %v4391_v59, 2  ;;  %vm4671_vm15 = vweird.f32 %v6070_v19  ;;  %v4458_v18 = vmul.f32 %v4388_v34, %v8678_v48 }
 0x59f   : > { %v4855_v44 = vmax.f32 %v4839_v45, 0.0  ;;  %v4534_v10 = vadd.f32 %v4533_v41, %v4532_v30  ;;  %v4537_v50 = vadd.f32 %v4536_v47, %v4535_v22  ;;  %vm4672_vm3 = vmor %vm4670_vm2, %vm4671_vm15  ;;  %vm4680_vm5 = vweird.f32 %v8103_v21 }
 0x5a0   : > { %v4667_v12 = vmul.f32 0.5, %v4666_v61  ;;  %v8111_v39 = vpop.f32.mrf.mxu0  ;;  %v4393_v6 = vadd.f32 %v4392_v7, %v4391_v59  ;;  %v8119_v15 = vsub.f32 %v8076_v46, %v4458_v18 }
 0x5a1   : > { %v4396_v60 = vsel %vm1222_vm1, %v8111_v39, 0.0  ;;  %5777 = vmatmul.msk.f32.gmra.mxu1 %vm1222_vm1, %v4855_v44  ;;  %v4616_v43 = vmul.f32 %v4534_v10, %v8678_v48  ;;  %v4538_v35 = vrot.slane %v4537_v50, 2 }
 0x5a2   : > { %v4668_v32 = vsub.f32 1.5, %v4667_v12  ;;  %v4397_v62 = vrot.slane %v4396_v60, 4  ;;  %v4490_v16 = vmul.f32 %v8119_v15, %v8119_v15  ;;  %v4394_v17 = vrot.slane %v4393_v6, 1 }
 0x5a3   : > { %v6072_v24 = vpop.eup %6071  ;;  %v8123_v9 = vadd.f32 1e-05, %v4616_v43  ;;  %v4539_v42 = vadd.f32 %v4538_v35, %v4537_v50 }
 0x5a4   : > { %v4669_v4 = vmul.f32 %v6070_v19, %v4668_v32  ;;  %v4675_v49 = vmul.f32 %v6072_v24, %v8103_v21  ;;  %v4398_v53 = vadd.f32 %v4397_v62, %v4396_v60  ;;  %v4542_v13 = vsel %vm1222_vm1, %v4490_v16, 0.0 }
 0x5a5   : > { %6073 = vrsqrt.f32 %v8123_v9  ;;  %v4540_v20 = vrot.slane %v4539_v42, 1  ;;  %v4395_v40 = vadd.f32 %v4394_v17, %v4393_v6  ;;  %vm4681_vm4 = vweird.f32 %v6072_v24 }
 0x5a6   : > { %v4673_v2 = vsel %vm4672_vm3, %v6070_v19, %v4669_v4  ;;  %v4676_v58 = vmul.f32 %v6072_v24, %v4675_v49  ;;  %v4543_v26 = vrot.slane %v4542_v13, 4  ;;  %v4399_v11 = vrot.slane %v4398_v53, 2  ;;  %vm4682_vm6 = vmor %vm4680_vm5, %vm4681_vm4 }
 0x5a7   : > { %v4806_v46 = vmul.f32 %v4673_v2, %v8034_v25  ;;  %v4541_v8 = vadd.f32 %v4540_v20, %v4539_v42  ;;  %v4459_v36 = vmul.f32 %v4395_v40, %v8678_v48  ;;  %vm4690_vm8 = vweird.f32 %v8123_v9 }
 0x5a8   : > { %v4677_v3 = vmul.f32 0.5, %v4676_v58  ;;  %v8131_v31 = vpop.f32.mrf.mxu0  ;;  %v4544_v25 = vadd.f32 %v4543_v26, %v4542_v13  ;;  %v4400_v14 = vadd.f32 %v4399_v11, %v4398_v53 }
 0x5a9   : > { %v4823_v23 = vmul.f32 %v8069_v56, %v4806_v46  ;;  %v4403_v51 = vsel %vm1222_vm1, %v8131_v31, 0.0  ;;  %v4617_v29 = vmul.f32 %v4541_v8, %v8678_v48  ;;  %v8140_v0 = vsub.f32 %v8092_v33, %v4459_v36 }
 0x5aa   : > { %v4678_v63 = vsub.f32 1.5, %v4677_v3  ;;  %v4404_v27 = vrot.slane %v4403_v51, 4  ;;  %v4545_v5 = vrot.slane %v4544_v25, 2  ;;  %v4401_v30 = vrot.slane %v4400_v14, 1 }
 0x5ab   : > { %v6074_v19 = vpop.eup %6073  ;;  %v4840_v45 = vadd.f32 %v8072_v37, %v4823_v23  ;;  %v8145_v61 = vadd.f32 1e-05, %v4617_v29  ;;  %v4491_v21 = vmul.f32 %v8140_v0, %v8140_v0 }
 0x5ac   : > { %v4679_v28 = vmul.f32 %v6072_v24, %v4678_v63  ;;  %v4405_v57 = vadd.f32 %v4404_v27, %v4403_v51  ;;  %v4685_v52 = vmul.f32 %v6074_v19, %v8123_v9  ;;  %v4546_v22 = vadd.f32 %v4545_v5, %v4544_v25 }
 0x5ad   : > { %v4402_v33 = vadd.f32 %v4401_v30, %v4400_v14  ;;  %vm4691_vm7 = vweird.f32 %v6074_v19  ;;  %6075 = vrsqrt.f32 %v8145_v61  ;;  %v4549_v12 = vsel %vm1222_vm1, %v4491_v21, 0.0 }
 0x5ae   : > { %v4683_v41 = vsel %vm4682_vm6, %v6072_v24, %v4679_v28  ;;  %v4406_v59 = vrot.slane %v4405_v57, 2  ;;  %v4686_v34 = vmul.f32 %v6074_v19, %v4685_v52  ;;  %v4547_v44 = vrot.slane %v4546_v22, 1  ;;  %vm4692_vm9 = vmor %vm4690_vm8, %vm4691_vm7 }
 0x5af   : > { %v4807_v47 = vmul.f32 %v4683_v41, %v8045_v54  ;;  %v4460_v10 = vmul.f32 %v4402_v33, %v8678_v48  ;;  %v4550_v32 = vrot.slane %v4549_v12, 4  ;;  %v4856_v43 = vmax.f32 %v4840_v45, 0.0 }
 0x5b0   : > { %v4407_v7 = vadd.f32 %v4406_v59, %v4405_v57  ;;  %v8153_v50 = vpop.f32.mrf.mxu0  ;;  %v4687_v60 = vmul.f32 0.5, %v4686_v34  ;;  %v4548_v6 = vadd.f32 %v4547_v44, %v4546_v22  ;;  %vm4700_vm11 = vweird.f32 %v8145_v61 }
 0x5b1   : > { %v4824_v18 = vmul.f32 %v8069_v56, %v4807_v47  ;;  %v8157_v54 = vsub.f32 %v8111_v39, %v4460_v10  ;;  %v4410_v24 = vsel %vm1222_vm1, %v8153_v50, 0.0  ;;  %v4551_v49 = vadd.f32 %v4550_v32, %v4549_v12  ;;  %5778 = vmatmul.msk.f32.gmra.mxu1 %vm1222_vm1, %v4856_v43 }
 0x5b2   : > { %v4408_v62 = vrot.slane %v4407_v7, 1  ;;  %v4688_v4 = vsub.f32 1.5, %v4687_v60  ;;  %v4411_v42 = vrot.slane %v4410_v24, 4  ;;  %v4618_v16 = vmul.f32 %v4548_v6, %v8678_v48 }
 0x5b3   : > { %v4841_v35 = vadd.f32 %v8072_v37, %v4824_v18  ;;  %v4492_v17 = vmul.f32 %v8157_v54, %v8157_v54  ;;  %v6076_v2 = vpop.eup %6075  ;;  %v4552_v58 = vrot.slane %v4551_v49, 2 }
 0x5b4   : > { %v4409_v53 = vadd.f32 %v4408_v62, %v4407_v7  ;;  %v4689_v39 = vmul.f32 %v6074_v19, %v4688_v4  ;;  %v4412_v46 = vadd.f32 %v4411_v42, %v4410_v24  ;;  %v4695_v20 = vmul.f32 %v6076_v2, %v8145_v61 }
 0x5b5   : > { %v8169_v13 = vadd.f32 1e-05, %v4618_v16  ;;  %v4556_v40 = vsel %vm1222_vm1, %v4492_v17, 0.0  ;;  %v4857_v3 = vmax.f32 %v4841_v35, 0.0  ;;  %v4553_v11 = vadd.f32 %v4552_v58, %v4551_v49 }
 0x5b6   : > { %v4693_v26 = vsel %vm4692_vm9, %v6074_v19, %v4689_v39  ;;  %v4557_v23 = vrot.slane %v4556_v40, 4  ;;  %v4461_v8 = vmul.f32 %v4409_v53, %v8678_v48  ;;  %v4696_v51 = vmul.f32 %v6076_v2, %v4695_v20 }
 0x5b7   : > { %v4808_v36 = vmul.f32 %v4693_v26, %v8074_v55  ;;  %6077 = vrsqrt.f32 %v8169_v13  ;;  %v4554_v63 = vrot.slane %v4553_v11, 1  ;;  %v4413_v27 = vrot.slane %v4412_v46, 2 }
 0x5b8   : > { %v8175_v9 = vpop.f32.mrf.mxu0  ;;  %v4558_v25 = vadd.f32 %v4557_v23, %v4556_v40  ;;  %v8178_v14 = vsub.f32 %v8131_v31, %v4461_v8  ;;  %v4697_v19 = vmul.f32 0.5, %v4696_v51  ;;  %vm4701_vm10 = vweird.f32 %v6076_v2 }
 0x5b9   : > { %v4825_v29 = vmul.f32 %v8069_v56, %v4808_v36  ;;  %v4417_v28 = vsel %vm1222_vm1, %v8175_v9, 0.0  ;;  %v4555_v5 = vadd.f32 %v4554_v63, %v4553_v11  ;;  %v4414_v57 = vadd.f32 %v4413_v27, %v4412_v46  ;;  %5779 = vmatmul.msk.f32.gmra.mxu1 %vm1222_vm1, %v4857_v3  ;;  %vm4702_vm12 = vmor %vm4700_vm11, %vm4701_vm10 }
 0x5ba   : > { %v4559_v30 = vrot.slane %v4558_v25, 2  ;;  %v4493_v55 = vmul.f32 %v8178_v14, %v8178_v14  ;;  %v4698_v52 = vsub.f32 1.5, %v4697_v19  ;;  %v4418_v31 = vrot.slane %v4417_v28, 4 }
 0x5bb   : > { %v4842_v45 = vadd.f32 %v8072_v37, %v4825_v29  ;;  %v4619_v21 = vmul.f32 %v4555_v5, %v8678_v48  ;;  %v4415_v33 = vrot.slane %v4414_v57, 1  ;;  %vm4710_vm14 = vweird.f32 %v8169_v13 }
 0x5bc   : > { %v4560_v41 = vadd.f32 %v4559_v30, %v4558_v25  ;;  %v4563_v22 = vsel %vm1222_vm1, %v4493_v55, 0.0  ;;  %v4699_v47 = vmul.f32 %v6076_v2, %v4698_v52  ;;  %v4419_v44 = vadd.f32 %v4418_v31, %v4417_v28 }
 0x5bd   : > { %v6078_v59 = vpop.eup %6077  ;;  %v4564_v34 = vrot.slane %v4563_v22, 4  ;;  %v8191_v10 = vadd.f32 1e-05, %v4619_v21  ;;  %v4858_v18 = vmax.f32 %v4842_v45, 0.0  ;;  %v4416_v43 = vadd.f32 %v4415_v33, %v4414_v57 }
 0x5be   : > { %v4705_v12 = vmul.f32 %v6078_v59, %v8169_v13  ;;  %v4561_v7 = vrot.slane %v4560_v41, 1  ;;  %v4703_v60 = vsel %vm4702_vm12, %v6076_v2, %v4699_v47  ;;  %v4420_v6 = vrot.slane %v4419_v44, 2 }
 0x5bf   : > { %v4565_v32 = vadd.f32 %v4564_v34, %v4563_v22  ;;  %v4809_v24 = vmul.f32 %v4703_v60, %v8100_v1  ;;  %6079 = vrsqrt.f32 %v8191_v10  ;;  %v4462_v49 = vmul.f32 %v4416_v43, %v8678_v48 }
 0x5c0   : > { %v8193_v62 = vpop.f32.mrf.mxu0  ;;  %v4706_v35 = vmul.f32 %v6078_v59, %v4705_v12  ;;  %v4562_v61 = vadd.f32 %v4561_v7, %v4560_v41  ;;  %v4421_v42 = vadd.f32 %v4420_v6, %v4419_v44  ;;  %vm4711_vm13 = vweird.f32 %v6078_v59 }
 0x5c1   : > { %v4566_v4 = vrot.slane %v4565_v32, 2  ;;  %v4826_v16 = vmul.f32 %v8069_v56, %v4809_v24  ;;  %5780 = vmatmul.msk.f32.gmra.mxu1 %vm1222_vm1, %v4858_v18  ;;  %v4424_v53 = vsel %vm1222_vm1, %v8193_v62, 0.0  ;;  %v8204_v1 = vsub.f32 %v8153_v50, %v4462_v49  ;;  %vm4712_vm15 = vmor %vm4710_vm14, %vm4711_vm13 }
 0x5c2   : > { %v4707_v17 = vmul.f32 0.5, %v4706_v35  ;;  %v4620_v2 = vmul.f32 %v4562_v61, %v8678_v48  ;;  %v4422_v58 = vrot.slane %v4421_v42, 1  ;;  %v4425_v40 = vrot.slane %v4424_v53, 4 }
 0x5c3   : > { %v4567_v39 = vadd.f32 %v4566_v4, %v4565_v32  ;;  %v4843_v46 = vadd.f32 %v8072_v37, %v4826_v16  ;;  %v4494_v11 = vmul.f32 %v8204_v1, %v8204_v1  ;;  %vm4720_vm3 = vweird.f32 %v8191_v10 }
 0x5c4   : > { %v4708_v20 = vsub.f32 1.5, %v4707_v17  ;;  %v8207_v3 = vadd.f32 1e-05, %v4620_v2  ;;  %v4423_v23 = vadd.f32 %v4422_v58, %v4421_v42  ;;  %v4426_v51 = vadd.f32 %v4425_v40, %v4424_v53 }
 0x5c5   : > { %v4568_v26 = vrot.slane %v4567_v39, 1  ;;  %v6080_v8 = vpop.eup %6079  ;;  %v4859_v50 = vmax.f32 %v4843_v46, 0.0  ;;  %v4570_v19 = vsel %vm1222_vm1, %v4494_v11, 0.0 }
 0x5c6   : > { %v4709_v36 = vmul.f32 %v6078_v59, %v4708_v20  ;;  %v4715_v63 = vmul.f32 %v6080_v8, %v8191_v10  ;;  %6081 = vrsqrt.f32 %v8207_v3  ;;  %v4463_v28 = vmul.f32 %v4423_v23, %v8678_v48 }
 0x5c7   : > { %v4569_v29 = vadd.f32 %v4568_v26, %v4567_v39  ;;  %v4571_v55 = vrot.slane %v4570_v19, 4  ;;  %v4427_v13 = vrot.slane %v4426_v51, 2  ;;  %vm4721_vm2 = vweird.f32 %v6080_v8 }
 0x5c8   : > { %v8214_v25 = vpop.f32.mrf.mxu0  ;;  %v4713_v27 = vsel %vm4712_vm15, %v6078_v59, %v4709_v36  ;;  %v4716_v30 = vmul.f32 %v6080_v8, %v4715_v63  ;;  %v8221_v45 = vsub.f32 %v8175_v9, %v4463_v28  ;;  %vm4722_vm4 = vmor %vm4720_vm3, %vm4721_vm2  ;;  %vm4730_vm6 = vweird.f32 %v8207_v3 }
 0x5c9   : > { %v4810_v5 = vmul.f32 %v4713_v27, %v8119_v15  ;;  %v4621_v57 = vmul.f32 %v4569_v29, %v8678_v48  ;;  %5781 = vmatmul.msk.f32.gmra.mxu1 %vm1222_vm1, %v4859_v50  ;;  %v4431_v52 = vsel %vm1222_vm1, %v8214_v25, 0.0  ;;  %v4572_v41 = vadd.f32 %v4571_v55, %v4570_v19 }
 0x5ca   : > { %v4717_v21 = vmul.f32 0.5, %v4716_v30  ;;  %v4428_v22 = vadd.f32 %v4427_v13, %v4426_v51  ;;  %v4495_v33 = vmul.f32 %v8221_v45, %v8221_v45  ;;  %v4432_v59 = vrot.slane %v4431_v52, 4 }
 0x5cb   : > { %v4827_v31 = vmul.f32 %v8069_v56, %v4810_v5  ;;  %v8227_v15 = vadd.f32 1e-05, %v4621_v57  ;;  %v4573_v44 = vrot.slane %v4572_v41, 2 }
 0x5cc   : > { %v6082_v47 = vpop.eup %6081  ;;  %v4718_v34 = vsub.f32 1.5, %v4717_v21  ;;  %v4429_v12 = vrot.slane %v4428_v22, 1  ;;  %v4577_v32 = vsel %vm1222_vm1, %v4495_v33, 0.0  ;;  %v4433_v61 = vadd.f32 %v4432_v59, %v4431_v52 }
 0x5cd   : > { %v4844_v9 = vadd.f32 %v8072_v37, %v4827_v31  ;;  %v4725_v7 = vmul.f32 %v6082_v47, %v8207_v3  ;;  %6083 = vrsqrt.f32 %v8227_v15  ;;  %v4574_v60 = vadd.f32 %v4573_v44, %v4572_v41 }
 0x5ce   : > { %v4719_v18 = vmul.f32 %v6080_v8, %v4718_v34  ;;  %v4430_v43 = vadd.f32 %v4429_v12, %v4428_v22  ;;  %v4578_v35 = vrot.slane %v4577_v32, 4  ;;  %v4434_v39 = vrot.slane %v4433_v61, 2 }
 0x5cf   : > { %v4726_v24 = vmul.f32 %v6082_v47, %v4725_v7  ;;  %v4860_v4 = vmax.f32 %v4844_v9, 0.0  ;;  %v4575_v42 = vrot.slane %v4574_v60, 1  ;;  %vm4731_vm5 = vweird.f32 %v6082_v47 }
 0x5d0   : > { %v8236_v6 = vpop.f32.mrf.mxu0  ;;  %v4723_v49 = vsel %vm4722_vm4, %v6080_v8, %v4719_v18  ;;  %v4464_v10 = vmul.f32 %v4430_v43, %v8678_v48  ;;  %v4579_v2 = vadd.f32 %v4578_v35, %v4577_v32  ;;  %v4435_v8 = vadd.f32 %v4434_v39, %v4433_v61  ;;  %vm4732_vm7 = vmor %vm4730_vm6, %vm4731_vm5 }
 0x5d1   : > { %v4438_v16 = vsel %vm1222_vm1, %v8236_v6, 0.0  ;;  %v4811_v17 = vmul.f32 %v4723_v49, %v8140_v0  ;;  %v4727_v53 = vmul.f32 0.5, %v4726_v24  ;;  %5782 = vmatmul.msk.f32.gmra.mxu1 %vm1222_vm1, %v4860_v4  ;;  %v4576_v58 = vadd.f32 %v4575_v42, %v4574_v60 }
 0x5d2   : > { %v8245_v46 = vsub.f32 %v8193_v62, %v4464_v10  ;;  %v4439_v20 = vrot.slane %v4438_v16, 4  ;;  %v4580_v23 = vrot.slane %v4579_v2, 2  ;;  %v4436_v27 = vrot.slane %v4435_v8, 1 }
 0x5d3   : > { %v6084_v40 = vpop.eup %6083  ;;  %v4828_v26 = vmul.f32 %v8069_v56, %v4811_v17  ;;  %v4728_v11 = vsub.f32 1.5, %v4727_v53  ;;  %v4622_v36 = vmul.f32 %v4576_v58, %v8678_v48  ;;  %vm4740_vm9 = vweird.f32 %v8227_v15 }
 0x5d4   : > { %v4735_v0 = vmul.f32 %v6084_v40, %v8227_v15  ;;  %v4496_v51 = vmul.f32 %v8245_v46, %v8245_v46  ;;  %v4581_v63 = vadd.f32 %v4580_v23, %v4579_v2  ;;  %v4440_v3 = vadd.f32 %v4439_v20, %v4438_v16 }
 0x5d5   : > { %v4845_v50 = vadd.f32 %v8072_v37, %v4828_v26  ;;  %v4729_v62 = vmul.f32 %v6082_v47, %v4728_v11  ;;  %v8255_v19 = vadd.f32 1e-05, %v4622_v36  ;;  %v4437_v13 = vadd.f32 %v4436_v27, %v4435_v8 }
 0x5d6   : > { %v4736_v29 = vmul.f32 %v6084_v40, %v4735_v0  ;;  %v4584_v28 = vsel %vm1222_vm1, %v4496_v51, 0.0  ;;  %v4582_v30 = vrot.slane %v4581_v63, 1  ;;  %vm4741_vm8 = vweird.f32 %v6084_v40 }
 0x5d7   : > { %v4733_v5 = vsel %vm4732_vm7, %v6082_v47, %v4729_v62  ;;  %v4585_v55 = vrot.slane %v4584_v28, 4  ;;  %6085 = vrsqrt.f32 %v8255_v19  ;;  %v4465_v22 = vmul.f32 %v4437_v13, %v8678_v48  ;;  %vm4742_vm10 = vmor %vm4740_vm9, %vm4741_vm8 }
 0x5d8   : > { %v8258_v57 = vpop.f32.mrf.mxu0  ;;  %v4812_v52 = vmul.f32 %v4733_v5, %v8157_v54  ;;  %v4737_v31 = vmul.f32 0.5, %v4736_v29  ;;  %v4583_v21 = vadd.f32 %v4582_v30, %v4581_v63  ;;  %v4441_v33 = vrot.slane %v4440_v3, 2 }
 0x5d9   : > { %v4586_v41 = vadd.f32 %v4585_v55, %v4584_v28  ;;  %v4861_v47 = vmax.f32 %v4845_v50, 0.0  ;;  %v4445_v34 = vsel %vm1222_vm1, %v8258_v57, 0.0  ;;  %v8268_v54 = vsub.f32 %v8214_v25, %v4465_v22 }
 0x5da   : > { %v4829_v59 = vmul.f32 %v8069_v56, %v4812_v52  ;;  %v4738_v9 = vsub.f32 1.5, %v4737_v31  ;;  %v4623_v44 = vmul.f32 %v4583_v21, %v8678_v48  ;;  %v4442_v7 = vadd.f32 %v4441_v33, %v4440_v3 }
 0x5db   : > { %v4587_v12 = vrot.slane %v4586_v41, 2  ;;  %5783 = vmatmul.msk.f32.gmra.mxu1 %vm1222_vm1, %v4861_v47  ;;  %v4446_v32 = vrot.slane %v4445_v34, 4  ;;  %v4497_v35 = vmul.f32 %v8268_v54, %v8268_v54  ;;  %vm4750_vm12 = vweird.f32 %v8255_v19 }
 0x5dc   : > { %v4846_v18 = vadd.f32 %v8072_v37, %v4829_v59  ;;  %v4739_v60 = vmul.f32 %v6084_v40, %v4738_v9  ;;  %v8274_v43 = vadd.f32 1e-05, %v4623_v44  ;;  %v4443_v61 = vrot.slane %v4442_v7, 1 }
 0x5dd   : > { %v4588_v24 = vadd.f32 %v4587_v12, %v4586_v41  ;;  %v6086_v25 = vpop.eup %6085  ;;  %v4447_v49 = vadd.f32 %v4446_v32, %v4445_v34  ;;  %v4591_v16 = vsel %vm1222_vm1, %v4497_v35, 0.0  ;;  %vm5050_vm6 = vcmask 1046528  }
 0x5de   : > { %v4743_v4 = vsel %vm4742_vm10, %v6084_v40, %v4739_v60  ;;  %v4745_v10 = vmul.f32 %v6086_v25, %v8255_v19  ;;  %6087 = vrsqrt.f32 %v8274_v43  ;;  %v4444_v17 = vadd.f32 %v4443_v61, %v4442_v7 }
 0x5df   : > { %v4813_v42 = vmul.f32 %v4743_v4, %v8178_v14  ;;  %v4589_v15 = vrot.slane %v4588_v24, 1  ;;  %v4862_v53 = vmax.f32 %v4846_v18, 0.0  ;;  %v4592_v58 = vrot.slane %v4591_v16, 4 }
 0x5e0   : > { %v4746_v39 = vmul.f32 %v6086_v25, %v4745_v10  ;;  %v4448_v20 = vrot.slane %v4447_v49, 2  ;;  %v4466_v40 = vmul.f32 %v4444_v17, %v8678_v48  ;;  %vm4751_vm11 = vweird.f32 %v6086_v25 }
 0x5e1   : > { %v4830_v2 = vmul.f32 %v8069_v56, %v4813_v42  ;;  %v4590_v26 = vadd.f32 %v4589_v15, %v4588_v24  ;;  %v4593_v23 = vadd.f32 %v4592_v58, %v4591_v16  ;;  %vm4752_vm13 = vmor %vm4750_vm12, %vm4751_vm11  ;;  %vm4760_vm15 = vweird.f32 %v8274_v43 }
 0x5e2   : > { %v4747_v11 = vmul.f32 0.5, %v4746_v39  ;;  %v4449_v14 = vadd.f32 %v4448_v20, %v4447_v49  ;;  %v8287_v36 = vsub.f32 %v8236_v6, %v4466_v40 }
 0x5e3   : > { %v4847_v8 = vadd.f32 %v8072_v37, %v4830_v2  ;;  %v4624_v0 = vmul.f32 %v4590_v26, %v8678_v48  ;;  %5784 = vmatmul.msk.f32.gmra.mxu1 %vm1222_vm1, %v4862_v53  ;;  %v4594_v62 = vrot.slane %v4593_v23, 2 }
 0x5e4   : > { %v6088_v51 = vpop.eup %6087  ;;  %v4748_v50 = vsub.f32 1.5, %v4747_v11  ;;  %v4450_v63 = vrot.slane %v4449_v14, 1  ;;  %v4498_v28 = vmul.f32 %v8287_v36, %v8287_v36 }
 0x5e5   : > { %v4755_v27 = vmul.f32 %v6088_v51, %v8274_v43  ;;  %v4640_v29 = vadd.f32 1e-05, %v4624_v0  ;;  %v4595_v5 = vadd.f32 %v4594_v62, %v4593_v23  ;;  %v4863_v13 = vmax.f32 %v4847_v8, 0.0 }
 0x5e6   : > { %v4749_v3 = vmul.f32 %v6086_v25, %v4748_v50  ;;  %v4451_v30 = vadd.f32 %v4450_v63, %v4449_v14  ;;  %v4598_v55 = vsel %vm1222_vm1, %v4498_v28, 0.0  ;;  %vm4761_vm14 = vweird.f32 %v6088_v51 }
 0x5e7   : > { %v4756_v6 = vmul.f32 %v6088_v51, %v4755_v27  ;;  %6089 = vrsqrt.f32 %v4640_v29  ;;  %v4596_v31 = vrot.slane %v4595_v5, 1  ;;  %v4599_v21 = vrot.slane %v4598_v55, 4  ;;  %vm4762_vm2 = vmor %vm4760_vm15, %vm4761_vm14  ;;  %v5000_v27 = vld [vmem:[%s8420_s6] sm:$0x7f] }
 0x5e8   : > { %v4753_v52 = vsel %vm4752_vm13, %v6086_v25, %v4749_v3  ;;  %v4467_v41 = vmul.f32 %v4451_v30, %v8678_v48  ;;  %vm4770_vm4 = vweird.f32 %v4640_v29  ;;  %5792 = vmatpush.msk.msra.mxu2 %vm5050_vm6, %v5000_v27 }
 0x5e9   : > { %v4814_v22 = vmul.f32 %v4753_v52, %v8204_v1  ;;  %v4757_v33 = vmul.f32 0.5, %v4756_v6  ;;  %v4597_v59 = vadd.f32 %v4596_v31, %v4595_v5  ;;  %v4600_v9 = vadd.f32 %v4599_v21, %v4598_v55 }
 0x5ea   : > { %v8298_v19 = vsub.f32 %v8258_v57, %v4467_v41 }
 0x5eb   : > { %v4831_v47 = vmul.f32 %v8069_v56, %v4814_v22  ;;  %v4758_v34 = vsub.f32 1.5, %v4757_v33  ;;  %5785 = vmatmul.msk.f32.gmra.mxu1 %vm1222_vm1, %v4863_v13  ;;  %v4625_v44 = vmul.f32 %v4597_v59, %v8678_v48  ;;  %v4601_v12 = vrot.slane %v4600_v9, 2 }
 0x5ec   : > { %v4499_v7 = vmul.f32 %v8298_v19, %v8298_v19 }
 0x5ed   : > { %v6090_v18 = vpop.eup %6089  ;;  %v4848_v1 = vadd.f32 %v8072_v37, %v4831_v47  ;;  %v4759_v60 = vmul.f32 %v6088_v51, %v4758_v34  ;;  %v4641_v32 = vadd.f32 1e-05, %v4625_v44  ;;  %v4602_v24 = vadd.f32 %v4601_v12, %v4600_v9 }
 0x5ee   : > { %v4765_v57 = vmul.f32 %v6090_v18, %v4640_v29  ;;  %v4605_v61 = vsel %vm1222_vm1, %v4499_v7, 0.0  ;;  %vm4771_vm3 = vweird.f32 %v6090_v18 }
 0x5ef   : > { %v4763_v35 = vsel %vm4762_vm2, %v6088_v51, %v4759_v60  ;;  %v4864_v25 = vmax.f32 %v4848_v1, 0.0  ;;  %6091 = vrsqrt.f32 %v4641_v32  ;;  %v4603_v42 = vrot.slane %v4602_v24, 1  ;;  %vm4772_vm5 = vmor %vm4770_vm4, %vm4771_vm3 }
 0x5f0   : > { %v4815_v4 = vmul.f32 %v4763_v35, %v8221_v45  ;;  %v4766_v49 = vmul.f32 %v6090_v18, %v4765_v57  ;;  %v4606_v10 = vrot.slane %v4605_v61, 4  ;;  %vm4780_vm8 = vweird.f32 %v4641_v32 }
 0x5f1   : > { %v4604_v17 = vadd.f32 %v4603_v42, %v4602_v24  ;;  %v8330_v60 = vperm.slane %v8066_v38, 5  ;;  %vm5001_vm2 = vcmask 56320  }
 0x5f2   : > { %v4832_v15 = vmul.f32 %v8069_v56, %v4815_v4  ;;  %v4767_v16 = vmul.f32 0.5, %v4766_v49  ;;  %v4607_v53 = vadd.f32 %v4606_v10, %v4605_v61 }
 0x5f3   : > { %5786 = vmatmul.msk.f32.gmra.mxu1 %vm1222_vm1, %v4864_v25  ;;  %v4626_v39 = vmul.f32 %v4604_v17, %v8678_v48 }
 0x5f4   : > { %v4849_v43 = vadd.f32 %v8072_v37, %v4832_v15  ;;  %v4768_v2 = vsub.f32 1.5, %v4767_v16  ;;  %v4608_v58 = vrot.slane %v4607_v53, 2 }
 0x5f5   : > { %v6092_v20 = vpop.eup %6091  ;;  %v4642_v40 = vadd.f32 1e-05, %v4626_v39 }
 0x5f6   : > { %v4769_v45 = vmul.f32 %v6090_v18, %v4768_v2  ;;  %v4775_v26 = vmul.f32 %v6092_v20, %v4641_v32  ;;  %v4609_v11 = vadd.f32 %v4608_v58, %v4607_v53  ;;  %v4865_v23 = vmax.f32 %v4849_v43, 0.0 }
 0x5f7   : > { %6093 = vrsqrt.f32 %v4642_v40  ;;  %vm4781_vm7 = vweird.f32 %v6092_v20  ;;  %vm4790_vm11 = vweird.f32 %v4642_v40 }
 0x5f8   : > { %v4773_v14 = vsel %vm4772_vm5, %v6090_v18, %v4769_v45  ;;  %v4776_v0 = vmul.f32 %v6092_v20, %v4775_v26  ;;  %v4610_v51 = vrot.slane %v4609_v11, 1  ;;  %vm4782_vm9 = vmor %vm4780_vm8, %vm4781_vm7 }
 0x5f9   : > { %v4816_v8 = vmul.f32 %v4773_v14, %v8245_v46 }
 0x5fa   : > { %v4777_v62 = vmul.f32 0.5, %v4776_v0  ;;  %v4611_v63 = vadd.f32 %v4610_v51, %v4609_v11 }
 0x5fb   : > { %v4833_v50 = vmul.f32 %v8069_v56, %v4816_v8  ;;  %5787 = vmatmul.msk.f32.gmra.mxu1 %vm1222_vm1, %v4865_v23 }
 0x5fc   : > { %v4778_v28 = vsub.f32 1.5, %v4777_v62  ;;  %v4627_v46 = vmul.f32 %v4611_v63, %v8678_v48 }
 0x5fd   : > { %v4850_v29 = vadd.f32 %v8072_v37, %v4833_v50  ;;  %v6094_v3 = vpop.eup %6093 }
 0x5fe   : > { %v4779_v5 = vmul.f32 %v6092_v20, %v4778_v28  ;;  %v4785_v6 = vmul.f32 %v6094_v3, %v4642_v40  ;;  %v4643_v55 = vadd.f32 1e-05, %v4627_v46  ;;  %vm4791_vm10 = vweird.f32 %v6094_v3 }
 0x5ff   : > { %v4866_v30 = vmax.f32 %v4850_v29, 0.0  ;;  %vm4792_vm12 = vmor %vm4790_vm11, %vm4791_vm10 }
 0x600   : > { %v4783_v13 = vsel %vm4782_vm9, %v6092_v20, %v4779_v5  ;;  %v4786_v31 = vmul.f32 %v6094_v3, %v4785_v6  ;;  %6095 = vrsqrt.f32 %v4643_v55  ;;  %vm4800_vm14 = vweird.f32 %v4643_v55 }
 0x601   : > { %v4817_v52 = vmul.f32 %v4783_v13, %v8268_v54 }
 0x602   : > { %v4787_v41 = vmul.f32 0.5, %v4786_v31 }
 0x603   : > { %5788 = vmatmul.msk.f32.gmra.mxu1 %vm1222_vm1, %v4866_v30  ;;  %v4834_v21 = vmul.f32 %v8069_v56, %v4817_v52 }
 0x604   : > { %v4788_v48 = vsub.f32 1.5, %v4787_v41 }
 0x605   : > { %v4851_v22 = vadd.f32 %v8072_v37, %v4834_v21 }
 0x606   : > { %v6096_v33 = vpop.eup %6095  ;;  %v4789_v59 = vmul.f32 %v6094_v3, %v4788_v48 }
 0x607   : > { %v4867_v9 = vmax.f32 %v4851_v22, 0.0  ;;  %v4795_v47 = vmul.f32 %v6096_v33, %v4643_v55  ;;  %vm4801_vm13 = vweird.f32 %v6096_v33 }
 0x608   : > { %v4793_v34 = vsel %vm4792_vm12, %v6094_v3, %v4789_v59  ;;  %vm4802_vm15 = vmor %vm4800_vm14, %vm4801_vm13 }
 0x609   : > { %v4818_v54 = vmul.f32 %v4793_v34, %v8287_v36  ;;  %v4796_v44 = vmul.f32 %v6096_v33, %v4795_v47 }
 0x60b   : > { %5789 = vmatmul.msk.f32.gmra.mxu1 %vm1222_vm1, %v4867_v9  ;;  %v4835_v12 = vmul.f32 %v8069_v56, %v4818_v54  ;;  %v4797_v7 = vmul.f32 0.5, %v4796_v44  ;;  %v5121_v9 = vpop.permute.xlu0 %5120  ;;  %v5145_v54 = vpop.permute.xlu1 %5144 }
 0x60d   : > { %v4852_v18 = vadd.f32 %v8072_v37, %v4835_v12  ;;  %v4798_v1 = vsub.f32 1.5, %v4797_v7  ;;  %v5169_v12 = vpop.permute.xlu2 %5168 }
 0x60f   : > { %v4799_v57 = vmul.f32 %v6096_v33, %v4798_v1  ;;  %v4868_v32 = vmax.f32 %v4852_v18, 0.0 }
 0x611   : > { %v4803_v24 = vsel %vm4802_vm15, %v6096_v33, %v4799_v57 }
 0x612   : > { %v4819_v35 = vmul.f32 %v4803_v24, %v8298_v19 }
 0x613   : > { %5790 = vmatmul.msk.f32.gmra.mxu1 %vm1222_vm1, %v4868_v32  ;;  %v5193_v18 = vpop.permute.xlu0 %5192 }
 0x614   : > { %v4836_v25 = vmul.f32 %v8069_v56, %v4819_v35 }
 0x615   : > { %v5241_v32 = vpop.permute.xlu2 %5240 }
 0x616   : > { %v4936_v36 = vpop.f32.mrf.mxu1  ;;  %v4853_v49 = vadd.f32 %v8072_v37, %v4836_v25 }
 0x617   : > { %v4937_v61 = vadd.f32 %v4936_v36, %v8330_v60 }
 0x618   : > { %v4869_v38 = vmax.f32 %v4853_v49, 0.0 }
 0x619   : > { %v4984_v4 = vmax.f32 %v4937_v61, 0.0 }
 0x61b   : > { %5793 = vmatmul.msk.f32.vlgmr.msra.gmra.mxu2 %vm5001_vm2, %v4984_v4  ;;  %5791 = vmatmul.msk.f32.gmra.mxu1 %vm1222_vm1, %v4869_v38  ;;  %v5265_v36 = vpop.permute.xlu0 %5264 }
 0x61d   : > { %v5313_v4 = vpop.permute.xlu2 %5312 }
 0x61e   : > { %v4939_v42 = vpop.f32.mrf.mxu1 }
 0x61f   : > { %v4940_v10 = vadd.f32 %v4939_v42, %v8330_v60 }
 0x621   : > { %v4985_v15 = vmax.f32 %v4940_v10, 0.0 }
 0x623   : > { %5794 = vmatmul.msk.f32.gmra.mxu2 %vm5001_vm2, %v4985_v15  ;;  %v5337_v38 = vpop.permute.xlu0 %5336 }
 0x62e   : > { %v4942_v19 = vpop.f32.mrf.mxu1 }
 0x62f   : > { %v4943_v16 = vadd.f32 %v4942_v19, %v8330_v60  ;;  %v5385_v19 = vpop.permute.xlu2 %5384 }
 0x631   : > { %v4986_v17 = vmax.f32 %v4943_v16, 0.0 }
 0x633   : > { %5795 = vmatmul.msk.f32.gmra.mxu2 %vm5001_vm2, %v4986_v17  ;;  %v5409_v17 = vpop.permute.xlu0 %5408 }
 0x636   : > { %v4945_v56 = vpop.f32.mrf.mxu1 }
 0x637   : > { %v4946_v37 = vadd.f32 %v4945_v56, %v8330_v60 }
 0x639   : > { %v4987_v53 = vmax.f32 %v4946_v37, 0.0 }
 0x63b   : > { %5796 = vmatmul.msk.f32.gmra.mxu2 %vm5001_vm2, %v4987_v53 }
 0x63e   : > { %v4948_v43 = vpop.f32.mrf.mxu1 }
 0x63f   : > { %v4949_v2 = vadd.f32 %v4948_v43, %v8330_v60  ;;  %v5457_v43 = vpop.permute.xlu2 %5456 }
 0x641   : > { %v4988_v39 = vmax.f32 %v4949_v2, 0.0 }
 0x643   : > { %5797 = vmatmul.msk.f32.gmra.mxu2 %vm5001_vm2, %v4988_v39  ;;  %v6146_v39 = vld [vmem:[%s8421_s7] sm:$0xff] }
 0x646   : > { %v4951_v58 = vpop.f32.mrf.mxu1 }
 0x647   : > { %v4952_v20 = vadd.f32 %v4951_v58, %v8330_v60  ;;  %v5119_v58 = vperm.slane %v6146_v39, 6 }
 0x649   : > { %v4989_v45 = vmax.f32 %v4952_v20, 0.0  ;;  %v5481_v20 = vpop.permute.xlu0 %5480 }
 0x64b   : > { %5798 = vmatmul.msk.f32.gmra.mxu2 %vm5001_vm2, %v4989_v45 }
 0x64e   : > { %v4954_v26 = vpop.f32.mrf.mxu1 }
 0x64f   : > { %v4955_v40 = vadd.f32 %v4954_v26, %v8330_v60 }
 0x651   : > { %v4990_v11 = vmax.f32 %v4955_v40, 0.0 }
 0x653   : > { %5799 = vmatmul.msk.f32.gmra.mxu2 %vm5001_vm2, %v4990_v11 }
 0x658   : > { %v4957_v23 = vpop.f32.mrf.mxu1 }
 0x659   : > { %v4958_v14 = vadd.f32 %v4957_v23, %v8330_v60 }
 0x65b   : > { %v4991_v8 = vmax.f32 %v4958_v14, 0.0 }
 0x65d   : > { %5800 = vmatmul.msk.f32.gmra.mxu2 %vm5001_vm2, %v4991_v8 }
 0x660   : > { %v4960_v0 = vpop.f32.mrf.mxu1 }
 0x661   : > { %v4961_v51 = vadd.f32 %v4960_v0, %v8330_v60 }
 0x663   : > { %v4992_v50 = vmax.f32 %v4961_v51, 0.0 }
 0x665   : > { %5801 = vmatmul.msk.f32.gmra.mxu2 %vm5001_vm2, %v4992_v50 }
 0x668   : > { %v4963_v62 = vpop.f32.mrf.mxu1 }
 0x669   : > { %v4964_v63 = vadd.f32 %v4963_v62, %v8330_v60 }
 0x66b   : > { %v4993_v27 = vmax.f32 %v4964_v63, 0.0 }
 0x66d   : > { %5802 = vmatmul.msk.f32.gmra.mxu2 %vm5001_vm2, %v4993_v27 }
 0x670   : > { %v4966_v29 = vpop.f32.mrf.mxu1 }
 0x671   : > { %v4967_v28 = vadd.f32 %v4966_v29, %v8330_v60 }
 0x673   : > { %v4994_v46 = vmax.f32 %v4967_v28, 0.0 }
 0x675   : > { %5803 = vmatmul.msk.f32.gmra.mxu2 %vm5001_vm2, %v4994_v46 }
 0x678   : > { %v4969_v3 = vpop.f32.mrf.mxu1 }
 0x679   : > { %v4970_v5 = vadd.f32 %v4969_v3, %v8330_v60 }
 0x67b   : > { %v4995_v30 = vmax.f32 %v4970_v5, 0.0 }
 0x67d   : > { %5804 = vmatmul.msk.f32.gmra.mxu2 %vm5001_vm2, %v4995_v30 }
 0x680   : > { %v4972_v6 = vpop.f32.mrf.mxu1 }
 0x681   : > { %v4973_v55 = vadd.f32 %v4972_v6, %v8330_v60 }
 0x683   : > { %v4996_v13 = vmax.f32 %v4973_v55, 0.0 }
 0x685   : > { %5805 = vmatmul.msk.f32.gmra.mxu2 %vm5001_vm2, %v4996_v13 }
 0x688   : > { %v4975_v52 = vpop.f32.mrf.mxu1 }
 0x689   : > { %v4976_v31 = vadd.f32 %v4975_v52, %v8330_v60 }
 0x68b   : > { %v4997_v21 = vmax.f32 %v4976_v31, 0.0 }
 0x68d   : > { %5806 = vmatmul.msk.f32.gmra.mxu2 %vm5001_vm2, %v4997_v21 }
 0x690   : > { %v4978_v41 = vpop.f32.mrf.mxu1 }
 0x691   : > { %v4979_v22 = vadd.f32 %v4978_v41, %v8330_v60 }
 0x693   : > { %v4998_v48 = vmax.f32 %v4979_v22, 0.0 }
 0x695   : > { %5807 = vmatmul.msk.f32.gmra.mxu2 %vm5001_vm2, %v4998_v48 }
 0x698   : > { %v4981_v33 = vpop.f32.mrf.mxu1 }
 0x699   : > { %v4982_v59 = vadd.f32 %v4981_v33, %v8330_v60  ;;  %v5217_v60 = vpop.permute.xlu1 %5216 }
 0x69b   : > { %v4999_v34 = vmax.f32 %v4982_v59, 0.0 }
 0x69d   : > { %5808 = vmatmul.msk.f32.gmra.mxu2 %vm5001_vm2, %v4999_v34 }
 0x69e   : > { %v5071_v47 = vpop.f32.mrf.mxu2 }
 0x69f   : > { %5139 = vmatpush.msra.mxu3 %v5071_v47 }
 0x6a0   : > { %5809 = vmatmul.msk.f32.vlgmr.msra.gmra.mxu3 %vm392_vm0, %v5121_v9 }
 0x6a1   : > { %v5289_v61 = vpop.permute.xlu1 %5288 }
 0x6a6   : > { %v5074_v44 = vpop.f32.mrf.mxu2 }
 0x6a7   : > { %5163 = vmatpush.msrb.mxu3 %v5074_v44 }
 0x6a8   : > { %5810 = vmatmul.msk.f32.vlgmr.msrb.gmra.mxu3 %vm392_vm0, %v5145_v54 }
 0x6a9   : > { %v5361_v10 = vpop.permute.xlu1 %5360 }
 0x6b1   : > { %v5433_v37 = vpop.permute.xlu1 %5432 }
 0x6b6   : > { %v5077_v7 = vpop.f32.mrf.mxu2 }
 0x6b7   : > { %5187 = vmatpush.msra.mxu3 %v5077_v7 }
 0x6b8   : > { %5811 = vmatmul.msk.f32.vlgmr.msra.gmra.mxu3 %vm392_vm0, %v5169_v12 }
 0x6be   : > { %v5080_v1 = vpop.f32.mrf.mxu2 }
 0x6bf   : > { %5211 = vmatpush.msrb.mxu3 %v5080_v1 }
 0x6c0   : > { %5812 = vmatmul.msk.f32.vlgmr.msrb.gmra.mxu3 %vm392_vm0, %v5193_v18 }
 0x6c6   : > { %v5083_v57 = vpop.f32.mrf.mxu2 }
 0x6c7   : > { %5235 = vmatpush.msra.mxu3 %v5083_v57 }
 0x6c8   : > { %5813 = vmatmul.msk.f32.vlgmr.msra.gmra.mxu3 %vm392_vm0, %v5217_v60 }
 0x6ce   : > { %v5086_v24 = vpop.f32.mrf.mxu2 }
 0x6cf   : > { %5259 = vmatpush.msrb.mxu3 %v5086_v24 }
 0x6d0   : > { %5814 = vmatmul.msk.f32.vlgmr.msrb.gmra.mxu3 %vm392_vm0, %v5241_v32 }
 0x6d6   : > { %v5089_v35 = vpop.f32.mrf.mxu2 }
 0x6d7   : > { %5283 = vmatpush.msra.mxu3 %v5089_v35 }
 0x6d8   : > { %5815 = vmatmul.msk.f32.vlgmr.msra.gmra.mxu3 %vm392_vm0, %v5265_v36 }
 0x6e0   : > { %v5092_v25 = vpop.f32.mrf.mxu2 }
 0x6e1   : > { %5307 = vmatpush.msrb.mxu3 %v5092_v25 }
 0x6e2   : > { %5816 = vmatmul.msk.f32.vlgmr.msrb.gmra.mxu3 %vm392_vm0, %v5289_v61 }
 0x6e8   : > { %v5095_v49 = vpop.f32.mrf.mxu2 }
 0x6e9   : > { %5331 = vmatpush.msra.mxu3 %v5095_v49 }
 0x6ea   : > { %5817 = vmatmul.msk.f32.vlgmr.msra.gmra.mxu3 %vm392_vm0, %v5313_v4 }
 0x6f0   : > { %v5098_v42 = vpop.f32.mrf.mxu2 }
 0x6f1   : > { %5355 = vmatpush.msrb.mxu3 %v5098_v42 }
 0x6f2   : > { %5818 = vmatmul.msk.f32.vlgmr.msrb.gmra.mxu3 %vm392_vm0, %v5337_v38 }
 0x6f8   : > { %v5101_v15 = vpop.f32.mrf.mxu2 }
 0x6f9   : > { %5379 = vmatpush.msra.mxu3 %v5101_v15 }
 0x6fa   : > { %5819 = vmatmul.msk.f32.vlgmr.msra.gmra.mxu3 %vm392_vm0, %v5361_v10 }
 0x700   : > { %v5104_v16 = vpop.f32.mrf.mxu2 }
 0x701   : > { %5403 = vmatpush.msrb.mxu3 %v5104_v16 }
 0x702   : > { %5820 = vmatmul.msk.f32.vlgmr.msrb.gmra.mxu3 %vm392_vm0, %v5385_v19 }
 0x708   : > { %v5107_v56 = vpop.f32.mrf.mxu2 }
 0x709   : > { %5427 = vmatpush.msra.mxu3 %v5107_v56 }
 0x70a   : > { %5821 = vmatmul.msk.f32.vlgmr.msra.gmra.mxu3 %vm392_vm0, %v5409_v17 }
 0x710   : > { %v5110_v53 = vpop.f32.mrf.mxu2 }
 0x711   : > { %5451 = vmatpush.msrb.mxu3 %v5110_v53 }
 0x712   : > { %5822 = vmatmul.msk.f32.vlgmr.msrb.gmra.mxu3 %vm392_vm0, %v5433_v37 }
 0x718   : > { %v5113_v2 = vpop.f32.mrf.mxu2 }
 0x719   : > { %5475 = vmatpush.msra.mxu3 %v5113_v2 }
 0x71a   : > { %5823 = vmatmul.msk.f32.vlgmr.msra.gmra.mxu3 %vm392_vm0, %v5457_v43 }
 0x720   : > { %v5116_v26 = vpop.f32.mrf.mxu2 }
 0x721   : > { %5499 = vmatpush.msrb.mxu3 %v5116_v26 }
 0x722   : > { %5824 = vmatmul.msk.f32.vlgmr.msrb.gmra.mxu3 %vm392_vm0, %v5481_v20 }
 0x723   : > { %v5141_v45 = vpop.f32.mrf.mxu3 }
 0x724   : > { %v5142_v40 = vadd.f32 %v5141_v45, %v5119_v58 }
 0x726   : > { %5504 = vst [vmem:[%s8392_s21] sm:$0xff] %v5142_v40 }
 0x72b   : > { %v5165_v11 = vpop.f32.mrf.mxu3 }
 0x72c   : > { %v5166_v23 = vadd.f32 %v5165_v11, %v5119_v58 }
 0x72e   : > { %5505 = vst [vmem:[%s8392_s21 + $0x8] sm:$0xff] %v5166_v23 }
 0x73b   : > { %v5189_v14 = vpop.f32.mrf.mxu3 }
 0x73c   : > { %v5190_v8 = vadd.f32 %v5189_v14, %v5119_v58 }
 0x73e   : > { %5506 = vst [vmem:[%s8392_s21 + $0x10] sm:$0xff] %v5190_v8 }
 0x743   : > { %v5213_v0 = vpop.f32.mrf.mxu3 }
 0x744   : > { %v5214_v51 = vadd.f32 %v5213_v0, %v5119_v58 }
 0x746   : > { %5507 = vst [vmem:[%s8392_s21 + $0x18] sm:$0xff] %v5214_v51 }
 0x74b   : > { %v5237_v50 = vpop.f32.mrf.mxu3 }
 0x74c   : > { %v5238_v62 = vadd.f32 %v5237_v50, %v5119_v58 }
 0x74e   : > { %5508 = vst [vmem:[%s8392_s21 + $0x20] sm:$0xff] %v5238_v62 }
 0x753   : > { %v5261_v63 = vpop.f32.mrf.mxu3 }
 0x754   : > { %v5262_v27 = vadd.f32 %v5261_v63, %v5119_v58 }
 0x756   : > { %5509 = vst [vmem:[%s8392_s21 + $0x28] sm:$0xff] %v5262_v27 }
 0x75b   : > { %v5285_v29 = vpop.f32.mrf.mxu3 }
 0x75c   : > { %v5286_v28 = vadd.f32 %v5285_v29, %v5119_v58 }
 0x75e   : > { %5510 = vst [vmem:[%s8392_s21 + $0x30] sm:$0xff] %v5286_v28 }
 0x765   : > { %v5309_v46 = vpop.f32.mrf.mxu3 }
 0x766   : > { %v5310_v3 = vadd.f32 %v5309_v46, %v5119_v58 }
 0x768   : > { %5511 = vst [vmem:[%s8392_s21 + $0x38] sm:$0xff] %v5310_v3 }
 0x76d   : > { %v5333_v5 = vpop.f32.mrf.mxu3 }
 0x76e   : > { %v5334_v30 = vadd.f32 %v5333_v5, %v5119_v58 }
 0x770   : > { %5512 = vst [vmem:[%s8392_s21 + $0x40] sm:$0xff] %v5334_v30 }
 0x775   : > { %v5357_v6 = vpop.f32.mrf.mxu3 }
 0x776   : > { %v5358_v55 = vadd.f32 %v5357_v6, %v5119_v58 }
 0x778   : > { %5513 = vst [vmem:[%s8392_s21 + $0x48] sm:$0xff] %v5358_v55 }
 0x77d   : > { %v5381_v13 = vpop.f32.mrf.mxu3 }
 0x77e   : > { %v5382_v52 = vadd.f32 %v5381_v13, %v5119_v58 }
 0x780   : > { %5514 = vst [vmem:[%s8392_s21 + $0x50] sm:$0xff] %v5382_v52 }
 0x785   : > { %v5405_v31 = vpop.f32.mrf.mxu3 }
 0x786   : > { %v5406_v21 = vadd.f32 %v5405_v31, %v5119_v58 }
 0x788   : > { %5515 = vst [vmem:[%s8392_s21 + $0x58] sm:$0xff] %v5406_v21 }
 0x78d   : > { %v5429_v41 = vpop.f32.mrf.mxu3 }
 0x78e   : > { %v5430_v22 = vadd.f32 %v5429_v41, %v5119_v58 }
 0x790   : > { %5516 = vst [vmem:[%s8392_s21 + $0x60] sm:$0xff] %v5430_v22 }
 0x795   : > { %v5453_v48 = vpop.f32.mrf.mxu3 }
 0x796   : > { %v5454_v33 = vadd.f32 %v5453_v48, %v5119_v58 }
 0x798   : > { %5517 = vst [vmem:[%s8392_s21 + $0x68] sm:$0xff] %v5454_v33 }
 0x79d   : > { %v5477_v59 = vpop.f32.mrf.mxu3 }
 0x79e   : > { %v5478_v9 = vadd.f32 %v5477_v59, %v5119_v58 }
 0x7a0   : > { %5518 = vst [vmem:[%s8392_s21 + $0x70] sm:$0xff] %v5478_v9 }
 0x7a5   : > { %v5501_v47 = vpop.f32.mrf.mxu3 }
 0x7a6   : > { %v5502_v34 = vadd.f32 %v5501_v47, %v5119_v58 }
 0x7a8   : > { %5519 = vst [vmem:[%s8392_s21 + $0x78] sm:$0xff] %v5502_v34 }
 0x7a9 PF: > { %s18_s27 = sadd.s32 1, %s6153_s27  }
 0x7aa   : > { %p15_p4 = scmp.ge.s32.totalorder %s18_s27, 4  }
 0x7ac   :  { %17 = sbr.rel (!%p15_p4) target bundleno = 1 (0x1), region = 85 }

</bundles_post_ra>
